<compile_context>
chip_gen: v7x
topology: tpu7x:2x2x1
jax: 0.10.0
libtpu: 0.0.40
codegen_flags: <defaults>
</compile_context>

<pallas_src>
import numpy as np
import jax
import jax.numpy as jnp
from jax import lax
from jax.experimental import pallas as pl
from jax.experimental.pallas import tpu as pltpu

# ---------------- deterministic configuration ----------------
SAMPLERATE = 11025.0            # zounds.SR11025()
WINDOW = 128                    # window_size_samples
N_BANDS = 8                     # len(scale)
TAPS = 17                       # taps (odd -> conv1 preserves length)
FINE_BANDS = 16                 # len(fine_scale)  (fine_weights unused in forward)
FINE_TAPS = 9                   # fine_taps

PAD1 = TAPS // 2                      # 8
L1 = WINDOW + 2 * PAD1 - TAPS + 1     # 128  conv1 output length
PAD2 = L1 // 2                        # 64
L2 = 2 * PAD2 + 1                     # 129  conv2 output length

TAPS_PAD = 24                         # taps padded to a sublane multiple for the MXU matmul
LOUT = 256                            # lane-dense accumulator/output width (>= L2, mult of 128)
LSRC = 384                            # lane-dense shifted-source width (>= L1-1 + LOUT)


def _fir_filter_bank(n_bands, taps, lo_hz=50.0, hi_hz=5000.0):
    """Deterministic stand-in for zounds.spectral.fir_filter_bank:
    hanning-windowed sinusoids on a geometric frequency scale, shape (n_bands, 1, taps)."""
    # TODO(synk): zounds.spectral.fir_filter_bank is not reproduced bit-exactly; this is a
    # deterministic filter bank of identical shape/dtype.
    freqs = np.geomspace(lo_hz, hi_hz, n_bands)
    win = np.hanning(taps)
    n = np.arange(taps) - taps // 2
    bank = np.stack([win * np.sin(2.0 * np.pi * f * n / SAMPLERATE) for f in freqs])
    return bank.astype(np.float32).reshape(n_bands, 1, taps)


# Module parameters (deterministic, shapes match FIRAnalyzer.__init__)
WEIGHTS = jnp.asarray(_fir_filter_bank(N_BANDS, TAPS))                                  # (C,1,taps)
FINE_WEIGHTS = jnp.maximum(jnp.asarray(_fir_filter_bank(FINE_BANDS, FINE_TAPS)), 0.0)   # unused

# conv1 weights with the 100x folded in, zero-padded to TAPS_PAD columns
# (padded columns contribute nothing to the matmul).
W_SCALED_PAD = jnp.pad(WEIGHTS[:, 0, :] * 100.0, ((0, 0), (0, TAPS_PAD - TAPS)))        # (C, TAPS_PAD)


# ---------------- Pallas kernel (one 128-sample window per grid step) ----------------
def _fir_analyzer_kernel(x_ref, w_ref, o_ref, src_ref):
    # conv1 (with folded 100x) on the MXU:  (C, TAPS_PAD) @ (TAPS_PAD, L1) -> (C, L1)
    y = jnp.dot(w_ref[...], x_ref[0], preferred_element_type=jnp.float32)
    # relu + log(1 + 100*conv)  (the 100 is already inside the weights)
    y = jnp.log1p(jnp.maximum(y, 0.0))

    # Lane-dense zero-padded copy of y:  src[:, j] = ypad[:, j] for j < 256, 0 beyond.
    src_ref[...] = jnp.zeros_like(src_ref)
    src_ref[:, PAD2:PAD2 + L1] = y

    # conv2: depthwise (groups=C) cross-correlation of each channel with itself
    #   z[c, t] = sum_k y[c, k] * ypad[c, t + k],  t in [0, L2)
    # Accumulate over a 256-lane (vreg-aligned) window; lanes >= L2 hold junk and are
    # sliced away in the wrapper.  Static shifts only; 4 accumulators break the add chain.
    acc = [jnp.zeros((N_BANDS, LOUT), jnp.float32) for _ in range(4)]
    for k in range(L1):                                             # static unroll (128)
        acc[k & 3] = acc[k & 3] + y[:, k:k + 1] * src_ref[:, k:k + LOUT]
    o_ref[0] = (acc[0] + acc[1]) + (acc[2] + acc[3])


# ---------------- wrappers ----------------
@jax.jit
def _run_windows(windows):
    """windows: (B, WINDOW) f32 -> (B, N_BANDS, L2).  Each window is processed
    independently (equivalent to one FIRAnalyzer.forward call per window)."""
    B = windows.shape[0]
    xpad = jnp.pad(windows.astype(jnp.float32), ((0, 0), (PAD1, PAD1)))       # (B, W+2*PAD1)
    # delay-embedding / im2col: X[b, k, t] = xpad[b, t + k]  (cheap XLA glue)
    x_im2col = jnp.stack([xpad[:, k:k + L1] for k in range(TAPS)], axis=1)    # (B, TAPS, L1)
    x_im2col = jnp.pad(x_im2col, ((0, 0), (0, TAPS_PAD - TAPS), (0, 0)))      # (B, TAPS_PAD, L1)

    out = pl.pallas_call(
        _fir_analyzer_kernel,
        out_shape=jax.ShapeDtypeStruct((B, N_BANDS, LOUT), jnp.float32),
        grid_spec=pltpu.PrefetchScalarGridSpec(
            num_scalar_prefetch=0,
            grid=(B,),
            in_specs=[
                pl.BlockSpec((1, TAPS_PAD, L1), lambda b: (b, 0, 0)),
                pl.BlockSpec((N_BANDS, TAPS_PAD), lambda b: (0, 0)),
            ],
            out_specs=pl.BlockSpec((1, N_BANDS, LOUT), lambda b: (b, 0, 0)),
            scratch_shapes=[pltpu.VMEM((N_BANDS, LSRC), jnp.float32)],
        ),
        compiler_params=pltpu.CompilerParams(dimension_semantics=("parallel",)),
    )(x_im2col, W_SCALED_PAD)
    return out[:, :, :L2]                                                     # lane-dense -> 129


def fir_analyzer_forward(x):
    """Reproduces FIRAnalyzer.forward (the torch grouped self-conv requires one window)."""
    xw = x.reshape(-1, WINDOW).astype(jnp.float32)
    assert xw.shape[0] == 1, "grouped self-conv in the original module requires batch == 1"
    return _run_windows(xw)                                                   # (1, C, L2)


# ---------------- pure-JAX reference (verification only) ----------------
def _reference(x, weights=WEIGHTS):
    x = x.reshape(-1, 1, WINDOW).astype(jnp.float32)
    y = lax.conv_general_dilated(
        x, weights, window_strides=(1,), padding=[(PAD1, PAD1)],
        dimension_numbers=("NCH", "OIH", "NCH"), precision=lax.Precision.HIGHEST)
    y = jnp.log1p(100.0 * jnp.maximum(y, 0.0))
    w2 = jnp.transpose(y, (1, 0, 2))                        # (C, 1, L1)
    z = lax.conv_general_dilated(
        y, w2, window_strides=(1,), padding=[(PAD2, PAD2)],
        dimension_numbers=("NCH", "OIH", "NCH"),
        feature_group_count=y.shape[1], precision=lax.Precision.HIGHEST)
    return z


if __name__ == "__main__":
    key = jax.random.PRNGKey(0)
    k1, k2 = jax.random.split(key)

    # Module-exact path: one 128-sample window (the only batch the torch forward accepts).
    x = jax.random.normal(k1, (1, 1, WINDOW), dtype=jnp.float32)
    out = jax.block_until_ready(fir_analyzer_forward(x))
    ref = _reference(x)
    np.testing.assert_allclose(np.asarray(out), np.asarray(ref), rtol=2e-2, atol=1e-2)

    # Grid path: several independent windows in one pallas_call (== per-window module calls).
    xb = jax.random.normal(k2, (4, WINDOW), dtype=jnp.float32)
    outb = jax.block_until_ready(_run_windows(xb))
    refb = jnp.concatenate(
        [_reference(xb[i].reshape(1, 1, WINDOW)) for i in range(4)], axis=0)
    np.testing.assert_allclose(np.asarray(outb), np.asarray(refb), rtol=2e-2, atol=1e-2)

    print("KERNEL_OK")
</pallas_src>

<mosaic_0001>
module attributes {stable_mosaic.version = 11 : i64} {
  func.func @_fir_analyzer_kernel(%arg0: i32, %arg1: memref<1x24x128xf32, #tpu.memory_space<vmem>>, %arg2: memref<8x24xf32, #tpu.memory_space<vmem>>, %arg3: memref<1x8x256xf32, #tpu.memory_space<vmem>>, %arg4: memref<8x384xf32, #tpu.memory_space<vmem>>) attributes {dimension_semantics = [#tpu.dimension_semantics<parallel>], iteration_bounds = array<i64: 1>, scalar_prefetch = 0 : i64, scratch_operands = 1 : i64, tpu.core_type = #tpu.core_type<tc>, window_params = [{transform_indices = @transform_0, window_bounds = array<i64: 1, 24, 128>}, {pipeline_mode = #tpu.pipeline_mode<synchronous>, transform_indices = @transform_1, window_bounds = array<i64: 8, 24>}, {transform_indices = @transform_2, window_bounds = array<i64: 1, 8, 256>}]} {
    %c0 = arith.constant 0 : index
    %c0_0 = arith.constant 0 : index
    %0 = vector.load %arg2[%c0, %c0_0] : memref<8x24xf32, #tpu.memory_space<vmem>>, vector<8x24xf32>
    %c0_1 = arith.constant 0 : index
    %c0_2 = arith.constant 0 : index
    %c0_3 = arith.constant 0 : index
    %1 = vector.load %arg1[%c0_1, %c0_2, %c0_3] : memref<1x24x128xf32, #tpu.memory_space<vmem>>, vector<1x24x128xf32>
    %2 = vector.shape_cast %1 : vector<1x24x128xf32> to vector<24x128xf32>
    %cst = arith.constant dense<0.000000e+00> : vector<8x128xf32>
    %3 = tpu.matmul %0, %2, %cst {dimension_numbers = #tpu.dot_dimension_numbers<[1], [0], [0], [1], [0, 0, 1, 1], [], []>} : vector<8x24xf32>, vector<24x128xf32>, vector<8x128xf32> -> vector<8x128xf32>
    %cst_4 = arith.constant 0.000000e+00 : f32
    %4 = vector.broadcast %cst_4 : f32 to vector<8x128xf32>
    %5 = arith.maximumf %3, %4 : vector<8x128xf32>
    %6 = math.log1p %5 : vector<8x128xf32>
    %cst_5 = arith.constant 0.000000e+00 : f32
    %7 = vector.broadcast %cst_5 : f32 to vector<8x384xf32>
    %c0_6 = arith.constant 0 : index
    %c0_7 = arith.constant 0 : index
    %8 = vector.load %arg4[%c0_6, %c0_7] : memref<8x384xf32, #tpu.memory_space<vmem>>, vector<8x384xf32>
    tpu.vector_store %arg4[%c0_6, %c0_7], %7 {strides = array<i32>} : memref<8x384xf32, #tpu.memory_space<vmem>>, vector<8x384xf32>,
    %c0_8 = arith.constant 0 : index
    %c64 = arith.constant 64 : index
    %9 = vector.load %arg4[%c0_8, %c64] : memref<8x384xf32, #tpu.memory_space<vmem>>, vector<8x128xf32>
    tpu.vector_store %arg4[%c0_8, %c64], %6 {strides = array<i32>} : memref<8x384xf32, #tpu.memory_space<vmem>>, vector<8x128xf32>,
    %cst_9 = arith.constant 0.000000e+00 : f32
    %10 = vector.broadcast %cst_9 : f32 to vector<8x256xf32>
    %cst_10 = arith.constant 0.000000e+00 : f32
    %11 = vector.broadcast %cst_10 : f32 to vector<8x256xf32>
    %cst_11 = arith.constant 0.000000e+00 : f32
    %12 = vector.broadcast %cst_11 : f32 to vector<8x256xf32>
    %cst_12 = arith.constant 0.000000e+00 : f32
    %13 = vector.broadcast %cst_12 : f32 to vector<8x256xf32>
    %14 = vector.extract_strided_slice %6 {offsets = [0, 0], sizes = [8, 1], strides = [1, 1]} : vector<8x128xf32> to vector<8x1xf32>
    %c0_13 = arith.constant 0 : index
    %c0_14 = arith.constant 0 : index
    %15 = vector.load %arg4[%c0_13, %c0_14] : memref<8x384xf32, #tpu.memory_space<vmem>>, vector<8x256xf32>
    %16 = vector.broadcast %14 : vector<8x1xf32> to vector<8x256xf32>
    %17 = arith.mulf %16, %15 : vector<8x256xf32>
    %18 = arith.addf %10, %17 : vector<8x256xf32>
    %19 = vector.extract_strided_slice %6 {offsets = [0, 1], sizes = [8, 1], strides = [1, 1]} : vector<8x128xf32> to vector<8x1xf32>
    %c0_15 = arith.constant 0 : index
    %c1 = arith.constant 1 : index
    %20 = vector.load %arg4[%c0_15, %c1] : memref<8x384xf32, #tpu.memory_space<vmem>>, vector<8x256xf32>
    %21 = vector.broadcast %19 : vector<8x1xf32> to vector<8x256xf32>
    %22 = arith.mulf %21, %20 : vector<8x256xf32>
    %23 = arith.addf %11, %22 : vector<8x256xf32>
    %24 = vector.extract_strided_slice %6 {offsets = [0, 2], sizes = [8, 1], strides = [1, 1]} : vector<8x128xf32> to vector<8x1xf32>
    %c0_16 = arith.constant 0 : index
    %c2 = arith.constant 2 : index
    %25 = vector.load %arg4[%c0_16, %c2] : memref<8x384xf32, #tpu.memory_space<vmem>>, vector<8x256xf32>
    %26 = vector.broadcast %24 : vector<8x1xf32> to vector<8x256xf32>
    %27 = arith.mulf %26, %25 : vector<8x256xf32>
    %28 = arith.addf %12, %27 : vector<8x256xf32>
    %29 = vector.extract_strided_slice %6 {offsets = [0, 3], sizes = [8, 1], strides = [1, 1]} : vector<8x128xf32> to vector<8x1xf32>
    %c0_17 = arith.constant 0 : index
    %c3 = arith.constant 3 : index
    %30 = vector.load %arg4[%c0_17, %c3] : memref<8x384xf32, #tpu.memory_space<vmem>>, vector<8x256xf32>
    %31 = vector.broadcast %29 : vector<8x1xf32> to vector<8x256xf32>
    %32 = arith.mulf %31, %30 : vector<8x256xf32>
    %33 = arith.addf %13, %32 : vector<8x256xf32>
    %34 = vector.extract_strided_slice %6 {offsets = [0, 4], sizes = [8, 1], strides = [1, 1]} : vector<8x128xf32> to vector<8x1xf32>
    %c0_18 = arith.constant 0 : index
    %c4 = arith.constant 4 : index
    %35 = vector.load %arg4[%c0_18, %c4] : memref<8x384xf32, #tpu.memory_space<vmem>>, vector<8x256xf32>
    %36 = vector.broadcast %34 : vector<8x1xf32> to vector<8x256xf32>
    %37 = arith.mulf %36, %35 : vector<8x256xf32>
    %38 = arith.addf %18, %37 : vector<8x256xf32>
    %39 = vector.extract_strided_slice %6 {offsets = [0, 5], sizes = [8, 1], strides = [1, 1]} : vector<8x128xf32> to vector<8x1xf32>
    %c0_19 = arith.constant 0 : index
    %c5 = arith.constant 5 : index
    %40 = vector.load %arg4[%c0_19, %c5] : memref<8x384xf32, #tpu.memory_space<vmem>>, vector<8x256xf32>
    %41 = vector.broadcast %39 : vector<8x1xf32> to vector<8x256xf32>
    %42 = arith.mulf %41, %40 : vector<8x256xf32>
    %43 = arith.addf %23, %42 : vector<8x256xf32>
    %44 = vector.extract_strided_slice %6 {offsets = [0, 6], sizes = [8, 1], strides = [1, 1]} : vector<8x128xf32> to vector<8x1xf32>
    %c0_20 = arith.constant 0 : index
    %c6 = arith.constant 6 : index
    %45 = vector.load %arg4[%c0_20, %c6] : memref<8x384xf32, #tpu.memory_space<vmem>>, vector<8x256xf32>
    %46 = vector.broadcast %44 : vector<8x1xf32> to vector<8x256xf32>
    %47 = arith.mulf %46, %45 : vector<8x256xf32>
    %48 = arith.addf %28, %47 : vector<8x256xf32>
    %49 = vector.extract_strided_slice %6 {offsets = [0, 7], sizes = [8, 1], strides = [1, 1]} : vector<8x128xf32> to vector<8x1xf32>
    %c0_21 = arith.constant 0 : index
    %c7 = arith.constant 7 : index
    %50 = vector.load %arg4[%c0_21, %c7] : memref<8x384xf32, #tpu.memory_space<vmem>>, vector<8x256xf32>
    %51 = vector.broadcast %49 : vector<8x1xf32> to vector<8x256xf32>
    %52 = arith.mulf %51, %50 : vector<8x256xf32>
    %53 = arith.addf %33, %52 : vector<8x256xf32>
    %54 = vector.extract_strided_slice %6 {offsets = [0, 8], sizes = [8, 1], strides = [1, 1]} : vector<8x128xf32> to vector<8x1xf32>
    %c0_22 = arith.constant 0 : index
    %c8 = arith.constant 8 : index
    %55 = vector.load %arg4[%c0_22, %c8] : memref<8x384xf32, #tpu.memory_space<vmem>>, vector<8x256xf32>
    %56 = vector.broadcast %54 : vector<8x1xf32> to vector<8x256xf32>
    %57 = arith.mulf %56, %55 : vector<8x256xf32>
    %58 = arith.addf %38, %57 : vector<8x256xf32>
    %59 = vector.extract_strided_slice %6 {offsets = [0, 9], sizes = [8, 1], strides = [1, 1]} : vector<8x128xf32> to vector<8x1xf32>
    %c0_23 = arith.constant 0 : index
    %c9 = arith.constant 9 : index
    %60 = vector.load %arg4[%c0_23, %c9] : memref<8x384xf32, #tpu.memory_space<vmem>>, vector<8x256xf32>
    %61 = vector.broadcast %59 : vector<8x1xf32> to vector<8x256xf32>
    %62 = arith.mulf %61, %60 : vector<8x256xf32>
    %63 = arith.addf %43, %62 : vector<8x256xf32>
    %64 = vector.extract_strided_slice %6 {offsets = [0, 10], sizes = [8, 1], strides = [1, 1]} : vector<8x128xf32> to vector<8x1xf32>
    %c0_24 = arith.constant 0 : index
    %c10 = arith.constant 10 : index
    %65 = vector.load %arg4[%c0_24, %c10] : memref<8x384xf32, #tpu.memory_space<vmem>>, vector<8x256xf32>
    %66 = vector.broadcast %64 : vector<8x1xf32> to vector<8x256xf32>
    %67 = arith.mulf %66, %65 : vector<8x256xf32>
    %68 = arith.addf %48, %67 : vector<8x256xf32>
    %69 = vector.extract_strided_slice %6 {offsets = [0, 11], sizes = [8, 1], strides = [1, 1]} : vector<8x128xf32> to vector<8x1xf32>
    %c0_25 = arith.constant 0 : index
    %c11 = arith.constant 11 : index
    %70 = vector.load %arg4[%c0_25, %c11] : memref<8x384xf32, #tpu.memory_space<vmem>>, vector<8x256xf32>
    %71 = vector.broadcast %69 : vector<8x1xf32> to vector<8x256xf32>
    %72 = arith.mulf %71, %70 : vector<8x256xf32>
    %73 = arith.addf %53, %72 : vector<8x256xf32>
    %74 = vector.extract_strided_slice %6 {offsets = [0, 12], sizes = [8, 1], strides = [1, 1]} : vector<8x128xf32> to vector<8x1xf32>
    %c0_26 = arith.constant 0 : index
    %c12 = arith.constant 12 : index
    %75 = vector.load %arg4[%c0_26, %c12] : memref<8x384xf32, #tpu.memory_space<vmem>>, vector<8x256xf32>
    %76 = vector.broadcast %74 : vector<8x1xf32> to vector<8x256xf32>
    %77 = arith.mulf %76, %75 : vector<8x256xf32>
    %78 = arith.addf %58, %77 : vector<8x256xf32>
    %79 = vector.extract_strided_slice %6 {offsets = [0, 13], sizes = [8, 1], strides = [1, 1]} : vector<8x128xf32> to vector<8x1xf32>
    %c0_27 = arith.constant 0 : index
    %c13 = arith.constant 13 : index
    %80 = vector.load %arg4[%c0_27, %c13] : memref<8x384xf32, #tpu.memory_space<vmem>>, vector<8x256xf32>
    %81 = vector.broadcast %79 : vector<8x1xf32> to vector<8x256xf32>
    %82 = arith.mulf %81, %80 : vector<8x256xf32>
    %83 = arith.addf %63, %82 : vector<8x256xf32>
    %84 = vector.extract_strided_slice %6 {offsets = [0, 14], sizes = [8, 1], strides = [1, 1]} : vector<8x128xf32> to vector<8x1xf32>
    %c0_28 = arith.constant 0 : index
    %c14 = arith.constant 14 : index
    %85 = vector.load %arg4[%c0_28, %c14] : memref<8x384xf32, #tpu.memory_space<vmem>>, vector<8x256xf32>
    %86 = vector.broadcast %84 : vector<8x1xf32> to vector<8x256xf32>
    %87 = arith.mulf %86, %85 : vector<8x256xf32>
    %88 = arith.addf %68, %87 : vector<8x256xf32>
    %89 = vector.extract_strided_slice %6 {offsets = [0, 15], sizes = [8, 1], strides = [1, 1]} : vector<8x128xf32> to vector<8x1xf32>
    %c0_29 = arith.constant 0 : index
    %c15 = arith.constant 15 : index
    %90 = vector.load %arg4[%c0_29, %c15] : memref<8x384xf32, #tpu.memory_space<vmem>>, vector<8x256xf32>
    %91 = vector.broadcast %89 : vector<8x1xf32> to vector<8x256xf32>
    %92 = arith.mulf %91, %90 : vector<8x256xf32>
    %93 = arith.addf %73, %92 : vector<8x256xf32>
    %94 = vector.extract_strided_slice %6 {offsets = [0, 16], sizes = [8, 1], strides = [1, 1]} : vector<8x128xf32> to vector<8x1xf32>
    %c0_30 = arith.constant 0 : index
    %c16 = arith.constant 16 : index
    %95 = vector.load %arg4[%c0_30, %c16] : memref<8x384xf32, #tpu.memory_space<vmem>>, vector<8x256xf32>
    %96 = vector.broadcast %94 : vector<8x1xf32> to vector<8x256xf32>
    %97 = arith.mulf %96, %95 : vector<8x256xf32>
    %98 = arith.addf %78, %97 : vector<8x256xf32>
    %99 = vector.extract_strided_slice %6 {offsets = [0, 17], sizes = [8, 1], strides = [1, 1]} : vector<8x128xf32> to vector<8x1xf32>
    %c0_31 = arith.constant 0 : index
    %c17 = arith.constant 17 : index
    %100 = vector.load %arg4[%c0_31, %c17] : memref<8x384xf32, #tpu.memory_space<vmem>>, vector<8x256xf32>
    %101 = vector.broadcast %99 : vector<8x1xf32> to vector<8x256xf32>
    %102 = arith.mulf %101, %100 : vector<8x256xf32>
    %103 = arith.addf %83, %102 : vector<8x256xf32>
    %104 = vector.extract_strided_slice %6 {offsets = [0, 18], sizes = [8, 1], strides = [1, 1]} : vector<8x128xf32> to vector<8x1xf32>
    %c0_32 = arith.constant 0 : index
    %c18 = arith.constant 18 : index
    %105 = vector.load %arg4[%c0_32, %c18] : memref<8x384xf32, #tpu.memory_space<vmem>>, vector<8x256xf32>
    %106 = vector.broadcast %104 : vector<8x1xf32> to vector<8x256xf32>
    %107 = arith.mulf %106, %105 : vector<8x256xf32>
    %108 = arith.addf %88, %107 : vector<8x256xf32>
    %109 = vector.extract_strided_slice %6 {offsets = [0, 19], sizes = [8, 1], strides = [1, 1]} : vector<8x128xf32> to vector<8x1xf32>
    %c0_33 = arith.constant 0 : index
    %c19 = arith.constant 19 : index
    %110 = vector.load %arg4[%c0_33, %c19] : memref<8x384xf32, #tpu.memory_space<vmem>>, vector<8x256xf32>
    %111 = vector.broadcast %109 : vector<8x1xf32> to vector<8x256xf32>
    %112 = arith.mulf %111, %110 : vector<8x256xf32>
    %113 = arith.addf %93, %112 : vector<8x256xf32>
    %114 = vector.extract_strided_slice %6 {offsets = [0, 20], sizes = [8, 1], strides = [1, 1]} : vector<8x128xf32> to vector<8x1xf32>
    %c0_34 = arith.constant 0 : index
    %c20 = arith.constant 20 : index
    %115 = vector.load %arg4[%c0_34, %c20] : memref<8x384xf32, #tpu.memory_space<vmem>>, vector<8x256xf32>
    %116 = vector.broadcast %114 : vector<8x1xf32> to vector<8x256xf32>
    %117 = arith.mulf %116, %115 : vector<8x256xf32>
    %118 = arith.addf %98, %117 : vector<8x256xf32>
    %119 = vector.extract_strided_slice %6 {offsets = [0, 21], sizes = [8, 1], strides = [1, 1]} : vector<8x128xf32> to vector<8x1xf32>
    %c0_35 = arith.constant 0 : index
    %c21 = arith.constant 21 : index
    %120 = vector.load %arg4[%c0_35, %c21] : memref<8x384xf32, #tpu.memory_space<vmem>>, vector<8x256xf32>
    %121 = vector.broadcast %119 : vector<8x1xf32> to vector<8x256xf32>
    %122 = arith.mulf %121, %120 : vector<8x256xf32>
    %123 = arith.addf %103, %122 : vector<8x256xf32>
    %124 = vector.extract_strided_slice %6 {offsets = [0, 22], sizes = [8, 1], strides = [1, 1]} : vector<8x128xf32> to vector<8x1xf32>
    %c0_36 = arith.constant 0 : index
    %c22 = arith.constant 22 : index
    %125 = vector.load %arg4[%c0_36, %c22] : memref<8x384xf32, #tpu.memory_space<vmem>>, vector<8x256xf32>
    %126 = vector.broadcast %124 : vector<8x1xf32> to vector<8x256xf32>
    %127 = arith.mulf %126, %125 : vector<8x256xf32>
    %128 = arith.addf %108, %127 : vector<8x256xf32>
    %129 = vector.extract_strided_slice %6 {offsets = [0, 23], sizes = [8, 1], strides = [1, 1]} : vector<8x128xf32> to vector<8x1xf32>
    %c0_37 = arith.constant 0 : index
    %c23 = arith.constant 23 : index
    %130 = vector.load %arg4[%c0_37, %c23] : memref<8x384xf32, #tpu.memory_space<vmem>>, vector<8x256xf32>
    %131 = vector.broadcast %129 : vector<8x1xf32> to vector<8x256xf32>
    %132 = arith.mulf %131, %130 : vector<8x256xf32>
    %133 = arith.addf %113, %132 : vector<8x256xf32>
    %134 = vector.extract_strided_slice %6 {offsets = [0, 24], sizes = [8, 1], strides = [1, 1]} : vector<8x128xf32> to vector<8x1xf32>
    %c0_38 = arith.constant 0 : index
    %c24 = arith.constant 24 : index
    %135 = vector.load %arg4[%c0_38, %c24] : memref<8x384xf32, #tpu.memory_space<vmem>>, vector<8x256xf32>
    %136 = vector.broadcast %134 : vector<8x1xf32> to vector<8x256xf32>
    %137 = arith.mulf %136, %135 : vector<8x256xf32>
    %138 = arith.addf %118, %137 : vector<8x256xf32>
    %139 = vector.extract_strided_slice %6 {offsets = [0, 25], sizes = [8, 1], strides = [1, 1]} : vector<8x128xf32> to vector<8x1xf32>
    %c0_39 = arith.constant 0 : index
    %c25 = arith.constant 25 : index
    %140 = vector.load %arg4[%c0_39, %c25] : memref<8x384xf32, #tpu.memory_space<vmem>>, vector<8x256xf32>
    %141 = vector.broadcast %139 : vector<8x1xf32> to vector<8x256xf32>
    %142 = arith.mulf %141, %140 : vector<8x256xf32>
    %143 = arith.addf %123, %142 : vector<8x256xf32>
    %144 = vector.extract_strided_slice %6 {offsets = [0, 26], sizes = [8, 1], strides = [1, 1]} : vector<8x128xf32> to vector<8x1xf32>
    %c0_40 = arith.constant 0 : index
    %c26 = arith.constant 26 : index
    %145 = vector.load %arg4[%c0_40, %c26] : memref<8x384xf32, #tpu.memory_space<vmem>>, vector<8x256xf32>
    %146 = vector.broadcast %144 : vector<8x1xf32> to vector<8x256xf32>
    %147 = arith.mulf %146, %145 : vector<8x256xf32>
    %148 = arith.addf %128, %147 : vector<8x256xf32>
    %149 = vector.extract_strided_slice %6 {offsets = [0, 27], sizes = [8, 1], strides = [1, 1]} : vector<8x128xf32> to vector<8x1xf32>
    %c0_41 = arith.constant 0 : index
    %c27 = arith.constant 27 : index
    %150 = vector.load %arg4[%c0_41, %c27] : memref<8x384xf32, #tpu.memory_space<vmem>>, vector<8x256xf32>
    %151 = vector.broadcast %149 : vector<8x1xf32> to vector<8x256xf32>
    %152 = arith.mulf %151, %150 : vector<8x256xf32>
    %153 = arith.addf %133, %152 : vector<8x256xf32>
    %154 = vector.extract_strided_slice %6 {offsets = [0, 28], sizes = [8, 1], strides = [1, 1]} : vector<8x128xf32> to vector<8x1xf32>
    %c0_42 = arith.constant 0 : index
    %c28 = arith.constant 28 : index
    %155 = vector.load %arg4[%c0_42, %c28] : memref<8x384xf32, #tpu.memory_space<vmem>>, vector<8x256xf32>
    %156 = vector.broadcast %154 : vector<8x1xf32> to vector<8x256xf32>
    %157 = arith.mulf %156, %155 : vector<8x256xf32>
    %158 = arith.addf %138, %157 : vector<8x256xf32>
    %159 = vector.extract_strided_slice %6 {offsets = [0, 29], sizes = [8, 1], strides = [1, 1]} : vector<8x128xf32> to vector<8x1xf32>
    %c0_43 = arith.constant 0 : index
    %c29 = arith.constant 29 : index
    %160 = vector.load %arg4[%c0_43, %c29] : memref<8x384xf32, #tpu.memory_space<vmem>>, vector<8x256xf32>
    %161 = vector.broadcast %159 : vector<8x1xf32> to vector<8x256xf32>
    %162 = arith.mulf %161, %160 : vector<8x256xf32>
    %163 = arith.addf %143, %162 : vector<8x256xf32>
    %164 = vector.extract_strided_slice %6 {offsets = [0, 30], sizes = [8, 1], strides = [1, 1]} : vector<8x128xf32> to vector<8x1xf32>
    %c0_44 = arith.constant 0 : index
    %c30 = arith.constant 30 : index
    %165 = vector.load %arg4[%c0_44, %c30] : memref<8x384xf32, #tpu.memory_space<vmem>>, vector<8x256xf32>
    %166 = vector.broadcast %164 : vector<8x1xf32> to vector<8x256xf32>
    %167 = arith.mulf %166, %165 : vector<8x256xf32>
    %168 = arith.addf %148, %167 : vector<8x256xf32>
    %169 = vector.extract_strided_slice %6 {offsets = [0, 31], sizes = [8, 1], strides = [1, 1]} : vector<8x128xf32> to vector<8x1xf32>
    %c0_45 = arith.constant 0 : index
    %c31 = arith.constant 31 : index
    %170 = vector.load %arg4[%c0_45, %c31] : memref<8x384xf32, #tpu.memory_space<vmem>>, vector<8x256xf32>
    %171 = vector.broadcast %169 : vector<8x1xf32> to vector<8x256xf32>
    %172 = arith.mulf %171, %170 : vector<8x256xf32>
    %173 = arith.addf %153, %172 : vector<8x256xf32>
    %174 = vector.extract_strided_slice %6 {offsets = [0, 32], sizes = [8, 1], strides = [1, 1]} : vector<8x128xf32> to vector<8x1xf32>
    %c0_46 = arith.constant 0 : index
    %c32 = arith.constant 32 : index
    %175 = vector.load %arg4[%c0_46, %c32] : memref<8x384xf32, #tpu.memory_space<vmem>>, vector<8x256xf32>
    %176 = vector.broadcast %174 : vector<8x1xf32> to vector<8x256xf32>
    %177 = arith.mulf %176, %175 : vector<8x256xf32>
    %178 = arith.addf %158, %177 : vector<8x256xf32>
    %179 = vector.extract_strided_slice %6 {offsets = [0, 33], sizes = [8, 1], strides = [1, 1]} : vector<8x128xf32> to vector<8x1xf32>
    %c0_47 = arith.constant 0 : index
    %c33 = arith.constant 33 : index
    %180 = vector.load %arg4[%c0_47, %c33] : memref<8x384xf32, #tpu.memory_space<vmem>>, vector<8x256xf32>
    %181 = vector.broadcast %179 : vector<8x1xf32> to vector<8x256xf32>
    %182 = arith.mulf %181, %180 : vector<8x256xf32>
    %183 = arith.addf %163, %182 : vector<8x256xf32>
    %184 = vector.extract_strided_slice %6 {offsets = [0, 34], sizes = [8, 1], strides = [1, 1]} : vector<8x128xf32> to vector<8x1xf32>
    %c0_48 = arith.constant 0 : index
    %c34 = arith.constant 34 : index
    %185 = vector.load %arg4[%c0_48, %c34] : memref<8x384xf32, #tpu.memory_space<vmem>>, vector<8x256xf32>
    %186 = vector.broadcast %184 : vector<8x1xf32> to vector<8x256xf32>
    %187 = arith.mulf %186, %185 : vector<8x256xf32>
    %188 = arith.addf %168, %187 : vector<8x256xf32>
    %189 = vector.extract_strided_slice %6 {offsets = [0, 35], sizes = [8, 1], strides = [1, 1]} : vector<8x128xf32> to vector<8x1xf32>
    %c0_49 = arith.constant 0 : index
    %c35 = arith.constant 35 : index
    %190 = vector.load %arg4[%c0_49, %c35] : memref<8x384xf32, #tpu.memory_space<vmem>>, vector<8x256xf32>
    %191 = vector.broadcast %189 : vector<8x1xf32> to vector<8x256xf32>
    %192 = arith.mulf %191, %190 : vector<8x256xf32>
    %193 = arith.addf %173, %192 : vector<8x256xf32>
    %194 = vector.extract_strided_slice %6 {offsets = [0, 36], sizes = [8, 1], strides = [1, 1]} : vector<8x128xf32> to vector<8x1xf32>
    %c0_50 = arith.constant 0 : index
    %c36 = arith.constant 36 : index
    %195 = vector.load %arg4[%c0_50, %c36] : memref<8x384xf32, #tpu.memory_space<vmem>>, vector<8x256xf32>
    %196 = vector.broadcast %194 : vector<8x1xf32> to vector<8x256xf32>
    %197 = arith.mulf %196, %195 : vector<8x256xf32>
    %198 = arith.addf %178, %197 : vector<8x256xf32>
    %199 = vector.extract_strided_slice %6 {offsets = [0, 37], sizes = [8, 1], strides = [1, 1]} : vector<8x128xf32> to vector<8x1xf32>
    %c0_51 = arith.constant 0 : index
    %c37 = arith.constant 37 : index
    %200 = vector.load %arg4[%c0_51, %c37] : memref<8x384xf32, #tpu.memory_space<vmem>>, vector<8x256xf32>
    %201 = vector.broadcast %199 : vector<8x1xf32> to vector<8x256xf32>
    %202 = arith.mulf %201, %200 : vector<8x256xf32>
    %203 = arith.addf %183, %202 : vector<8x256xf32>
    %204 = vector.extract_strided_slice %6 {offsets = [0, 38], sizes = [8, 1], strides = [1, 1]} : vector<8x128xf32> to vector<8x1xf32>
    %c0_52 = arith.constant 0 : index
    %c38 = arith.constant 38 : index
    %205 = vector.load %arg4[%c0_52, %c38] : memref<8x384xf32, #tpu.memory_space<vmem>>, vector<8x256xf32>
    %206 = vector.broadcast %204 : vector<8x1xf32> to vector<8x256xf32>
    %207 = arith.mulf %206, %205 : vector<8x256xf32>
    %208 = arith.addf %188, %207 : vector<8x256xf32>
    %209 = vector.extract_strided_slice %6 {offsets = [0, 39], sizes = [8, 1], strides = [1, 1]} : vector<8x128xf32> to vector<8x1xf32>
    %c0_53 = arith.constant 0 : index
    %c39 = arith.constant 39 : index
    %210 = vector.load %arg4[%c0_53, %c39] : memref<8x384xf32, #tpu.memory_space<vmem>>, vector<8x256xf32>
    %211 = vector.broadcast %209 : vector<8x1xf32> to vector<8x256xf32>
    %212 = arith.mulf %211, %210 : vector<8x256xf32>
    %213 = arith.addf %193, %212 : vector<8x256xf32>
    %214 = vector.extract_strided_slice %6 {offsets = [0, 40], sizes = [8, 1], strides = [1, 1]} : vector<8x128xf32> to vector<8x1xf32>
    %c0_54 = arith.constant 0 : index
    %c40 = arith.constant 40 : index
    %215 = vector.load %arg4[%c0_54, %c40] : memref<8x384xf32, #tpu.memory_space<vmem>>, vector<8x256xf32>
    %216 = vector.broadcast %214 : vector<8x1xf32> to vector<8x256xf32>
    %217 = arith.mulf %216, %215 : vector<8x256xf32>
    %218 = arith.addf %198, %217 : vector<8x256xf32>
    %219 = vector.extract_strided_slice %6 {offsets = [0, 41], sizes = [8, 1], strides = [1, 1]} : vector<8x128xf32> to vector<8x1xf32>
    %c0_55 = arith.constant 0 : index
    %c41 = arith.constant 41 : index
    %220 = vector.load %arg4[%c0_55, %c41] : memref<8x384xf32, #tpu.memory_space<vmem>>, vector<8x256xf32>
    %221 = vector.broadcast %219 : vector<8x1xf32> to vector<8x256xf32>
    %222 = arith.mulf %221, %220 : vector<8x256xf32>
    %223 = arith.addf %203, %222 : vector<8x256xf32>
    %224 = vector.extract_strided_slice %6 {offsets = [0, 42], sizes = [8, 1], strides = [1, 1]} : vector<8x128xf32> to vector<8x1xf32>
    %c0_56 = arith.constant 0 : index
    %c42 = arith.constant 42 : index
    %225 = vector.load %arg4[%c0_56, %c42] : memref<8x384xf32, #tpu.memory_space<vmem>>, vector<8x256xf32>
    %226 = vector.broadcast %224 : vector<8x1xf32> to vector<8x256xf32>
    %227 = arith.mulf %226, %225 : vector<8x256xf32>
    %228 = arith.addf %208, %227 : vector<8x256xf32>
    %229 = vector.extract_strided_slice %6 {offsets = [0, 43], sizes = [8, 1], strides = [1, 1]} : vector<8x128xf32> to vector<8x1xf32>
    %c0_57 = arith.constant 0 : index
    %c43 = arith.constant 43 : index
    %230 = vector.load %arg4[%c0_57, %c43] : memref<8x384xf32, #tpu.memory_space<vmem>>, vector<8x256xf32>
    %231 = vector.broadcast %229 : vector<8x1xf32> to vector<8x256xf32>
    %232 = arith.mulf %231, %230 : vector<8x256xf32>
    %233 = arith.addf %213, %232 : vector<8x256xf32>
    %234 = vector.extract_strided_slice %6 {offsets = [0, 44], sizes = [8, 1], strides = [1, 1]} : vector<8x128xf32> to vector<8x1xf32>
    %c0_58 = arith.constant 0 : index
    %c44 = arith.constant 44 : index
    %235 = vector.load %arg4[%c0_58, %c44] : memref<8x384xf32, #tpu.memory_space<vmem>>, vector<8x256xf32>
    %236 = vector.broadcast %234 : vector<8x1xf32> to vector<8x256xf32>
    %237 = arith.mulf %236, %235 : vector<8x256xf32>
    %238 = arith.addf %218, %237 : vector<8x256xf32>
    %239 = vector.extract_strided_slice %6 {offsets = [0, 45], sizes = [8, 1], strides = [1, 1]} : vector<8x128xf32> to vector<8x1xf32>
    %c0_59 = arith.constant 0 : index
    %c45 = arith.constant 45 : index
    %240 = vector.load %arg4[%c0_59, %c45] : memref<8x384xf32, #tpu.memory_space<vmem>>, vector<8x256xf32>
    %241 = vector.broadcast %239 : vector<8x1xf32> to vector<8x256xf32>
    %242 = arith.mulf %241, %240 : vector<8x256xf32>
    %243 = arith.addf %223, %242 : vector<8x256xf32>
    %244 = vector.extract_strided_slice %6 {offsets = [0, 46], sizes = [8, 1], strides = [1, 1]} : vector<8x128xf32> to vector<8x1xf32>
    %c0_60 = arith.constant 0 : index
    %c46 = arith.constant 46 : index
    %245 = vector.load %arg4[%c0_60, %c46] : memref<8x384xf32, #tpu.memory_space<vmem>>, vector<8x256xf32>
    %246 = vector.broadcast %244 : vector<8x1xf32> to vector<8x256xf32>
    %247 = arith.mulf %246, %245 : vector<8x256xf32>
    %248 = arith.addf %228, %247 : vector<8x256xf32>
    %249 = vector.extract_strided_slice %6 {offsets = [0, 47], sizes = [8, 1], strides = [1, 1]} : vector<8x128xf32> to vector<8x1xf32>
    %c0_61 = arith.constant 0 : index
    %c47 = arith.constant 47 : index
    %250 = vector.load %arg4[%c0_61, %c47] : memref<8x384xf32, #tpu.memory_space<vmem>>, vector<8x256xf32>
    %251 = vector.broadcast %249 : vector<8x1xf32> to vector<8x256xf32>
    %252 = arith.mulf %251, %250 : vector<8x256xf32>
    %253 = arith.addf %233, %252 : vector<8x256xf32>
    %254 = vector.extract_strided_slice %6 {offsets = [0, 48], sizes = [8, 1], strides = [1, 1]} : vector<8x128xf32> to vector<8x1xf32>
    %c0_62 = arith.constant 0 : index
    %c48 = arith.constant 48 : index
    %255 = vector.load %arg4[%c0_62, %c48] : memref<8x384xf32, #tpu.memory_space<vmem>>, vector<8x256xf32>
    %256 = vector.broadcast %254 : vector<8x1xf32> to vector<8x256xf32>
    %257 = arith.mulf %256, %255 : vector<8x256xf32>
    %258 = arith.addf %238, %257 : vector<8x256xf32>
    %259 = vector.extract_strided_slice %6 {offsets = [0, 49], sizes = [8, 1], strides = [1, 1]} : vector<8x128xf32> to vector<8x1xf32>
    %c0_63 = arith.constant 0 : index
    %c49 = arith.constant 49 : index
    %260 = vector.load %arg4[%c0_63, %c49] : memref<8x384xf32, #tpu.memory_space<vmem>>, vector<8x256xf32>
    %261 = vector.broadcast %259 : vector<8x1xf32> to vector<8x256xf32>
    %262 = arith.mulf %261, %260 : vector<8x256xf32>
    %263 = arith.addf %243, %262 : vector<8x256xf32>
    %264 = vector.extract_strided_slice %6 {offsets = [0, 50], sizes = [8, 1], strides = [1, 1]} : vector<8x128xf32> to vector<8x1xf32>
    %c0_64 = arith.constant 0 : index
    %c50 = arith.constant 50 : index
    %265 = vector.load %arg4[%c0_64, %c50] : memref<8x384xf32, #tpu.memory_space<vmem>>, vector<8x256xf32>
    %266 = vector.broadcast %264 : vector<8x1xf32> to vector<8x256xf32>
    %267 = arith.mulf %266, %265 : vector<8x256xf32>
    %268 = arith.addf %248, %267 : vector<8x256xf32>
    %269 = vector.extract_strided_slice %6 {offsets = [0, 51], sizes = [8, 1], strides = [1, 1]} : vector<8x128xf32> to vector<8x1xf32>
    %c0_65 = arith.constant 0 : index
    %c51 = arith.constant 51 : index
    %270 = vector.load %arg4[%c0_65, %c51] : memref<8x384xf32, #tpu.memory_space<vmem>>, vector<8x256xf32>
    %271 = vector.broadcast %269 : vector<8x1xf32> to vector<8x256xf32>
    %272 = arith.mulf %271, %270 : vector<8x256xf32>
    %273 = arith.addf %253, %272 : vector<8x256xf32>
    %274 = vector.extract_strided_slice %6 {offsets = [0, 52], sizes = [8, 1], strides = [1, 1]} : vector<8x128xf32> to vector<8x1xf32>
    %c0_66 = arith.constant 0 : index
    %c52 = arith.constant 52 : index
    %275 = vector.load %arg4[%c0_66, %c52] : memref<8x384xf32, #tpu.memory_space<vmem>>, vector<8x256xf32>
    %276 = vector.broadcast %274 : vector<8x1xf32> to vector<8x256xf32>
    %277 = arith.mulf %276, %275 : vector<8x256xf32>
    %278 = arith.addf %258, %277 : vector<8x256xf32>
    %279 = vector.extract_strided_slice %6 {offsets = [0, 53], sizes = [8, 1], strides = [1, 1]} : vector<8x128xf32> to vector<8x1xf32>
    %c0_67 = arith.constant 0 : index
    %c53 = arith.constant 53 : index
    %280 = vector.load %arg4[%c0_67, %c53] : memref<8x384xf32, #tpu.memory_space<vmem>>, vector<8x256xf32>
    %281 = vector.broadcast %279 : vector<8x1xf32> to vector<8x256xf32>
    %282 = arith.mulf %281, %280 : vector<8x256xf32>
    %283 = arith.addf %263, %282 : vector<8x256xf32>
    %284 = vector.extract_strided_slice %6 {offsets = [0, 54], sizes = [8, 1], strides = [1, 1]} : vector<8x128xf32> to vector<8x1xf32>
    %c0_68 = arith.constant 0 : index
    %c54 = arith.constant 54 : index
    %285 = vector.load %arg4[%c0_68, %c54] : memref<8x384xf32, #tpu.memory_space<vmem>>, vector<8x256xf32>
    %286 = vector.broadcast %284 : vector<8x1xf32> to vector<8x256xf32>
    %287 = arith.mulf %286, %285 : vector<8x256xf32>
    %288 = arith.addf %268, %287 : vector<8x256xf32>
    %289 = vector.extract_strided_slice %6 {offsets = [0, 55], sizes = [8, 1], strides = [1, 1]} : vector<8x128xf32> to vector<8x1xf32>
    %c0_69 = arith.constant 0 : index
    %c55 = arith.constant 55 : index
    %290 = vector.load %arg4[%c0_69, %c55] : memref<8x384xf32, #tpu.memory_space<vmem>>, vector<8x256xf32>
    %291 = vector.broadcast %289 : vector<8x1xf32> to vector<8x256xf32>
    %292 = arith.mulf %291, %290 : vector<8x256xf32>
    %293 = arith.addf %273, %292 : vector<8x256xf32>
    %294 = vector.extract_strided_slice %6 {offsets = [0, 56], sizes = [8, 1], strides = [1, 1]} : vector<8x128xf32> to vector<8x1xf32>
    %c0_70 = arith.constant 0 : index
    %c56 = arith.constant 56 : index
    %295 = vector.load %arg4[%c0_70, %c56] : memref<8x384xf32, #tpu.memory_space<vmem>>, vector<8x256xf32>
    %296 = vector.broadcast %294 : vector<8x1xf32> to vector<8x256xf32>
    %297 = arith.mulf %296, %295 : vector<8x256xf32>
    %298 = arith.addf %278, %297 : vector<8x256xf32>
    %299 = vector.extract_strided_slice %6 {offsets = [0, 57], sizes = [8, 1], strides = [1, 1]} : vector<8x128xf32> to vector<8x1xf32>
    %c0_71 = arith.constant 0 : index
    %c57 = arith.constant 57 : index
    %300 = vector.load %arg4[%c0_71, %c57] : memref<8x384xf32, #tpu.memory_space<vmem>>, vector<8x256xf32>
    %301 = vector.broadcast %299 : vector<8x1xf32> to vector<8x256xf32>
    %302 = arith.mulf %301, %300 : vector<8x256xf32>
    %303 = arith.addf %283, %302 : vector<8x256xf32>
    %304 = vector.extract_strided_slice %6 {offsets = [0, 58], sizes = [8, 1], strides = [1, 1]} : vector<8x128xf32> to vector<8x1xf32>
    %c0_72 = arith.constant 0 : index
    %c58 = arith.constant 58 : index
    %305 = vector.load %arg4[%c0_72, %c58] : memref<8x384xf32, #tpu.memory_space<vmem>>, vector<8x256xf32>
    %306 = vector.broadcast %304 : vector<8x1xf32> to vector<8x256xf32>
    %307 = arith.mulf %306, %305 : vector<8x256xf32>
    %308 = arith.addf %288, %307 : vector<8x256xf32>
    %309 = vector.extract_strided_slice %6 {offsets = [0, 59], sizes = [8, 1], strides = [1, 1]} : vector<8x128xf32> to vector<8x1xf32>
    %c0_73 = arith.constant 0 : index
    %c59 = arith.constant 59 : index
    %310 = vector.load %arg4[%c0_73, %c59] : memref<8x384xf32, #tpu.memory_space<vmem>>, vector<8x256xf32>
    %311 = vector.broadcast %309 : vector<8x1xf32> to vector<8x256xf32>
    %312 = arith.mulf %311, %310 : vector<8x256xf32>
    %313 = arith.addf %293, %312 : vector<8x256xf32>
    %314 = vector.extract_strided_slice %6 {offsets = [0, 60], sizes = [8, 1], strides = [1, 1]} : vector<8x128xf32> to vector<8x1xf32>
    %c0_74 = arith.constant 0 : index
    %c60 = arith.constant 60 : index
    %315 = vector.load %arg4[%c0_74, %c60] : memref<8x384xf32, #tpu.memory_space<vmem>>, vector<8x256xf32>
    %316 = vector.broadcast %314 : vector<8x1xf32> to vector<8x256xf32>
    %317 = arith.mulf %316, %315 : vector<8x256xf32>
    %318 = arith.addf %298, %317 : vector<8x256xf32>
    %319 = vector.extract_strided_slice %6 {offsets = [0, 61], sizes = [8, 1], strides = [1, 1]} : vector<8x128xf32> to vector<8x1xf32>
    %c0_75 = arith.constant 0 : index
    %c61 = arith.constant 61 : index
    %320 = vector.load %arg4[%c0_75, %c61] : memref<8x384xf32, #tpu.memory_space<vmem>>, vector<8x256xf32>
    %321 = vector.broadcast %319 : vector<8x1xf32> to vector<8x256xf32>
    %322 = arith.mulf %321, %320 : vector<8x256xf32>
    %323 = arith.addf %303, %322 : vector<8x256xf32>
    %324 = vector.extract_strided_slice %6 {offsets = [0, 62], sizes = [8, 1], strides = [1, 1]} : vector<8x128xf32> to vector<8x1xf32>
    %c0_76 = arith.constant 0 : index
    %c62 = arith.constant 62 : index
    %325 = vector.load %arg4[%c0_76, %c62] : memref<8x384xf32, #tpu.memory_space<vmem>>, vector<8x256xf32>
    %326 = vector.broadcast %324 : vector<8x1xf32> to vector<8x256xf32>
    %327 = arith.mulf %326, %325 : vector<8x256xf32>
    %328 = arith.addf %308, %327 : vector<8x256xf32>
    %329 = vector.extract_strided_slice %6 {offsets = [0, 63], sizes = [8, 1], strides = [1, 1]} : vector<8x128xf32> to vector<8x1xf32>
    %c0_77 = arith.constant 0 : index
    %c63 = arith.constant 63 : index
    %330 = vector.load %arg4[%c0_77, %c63] : memref<8x384xf32, #tpu.memory_space<vmem>>, vector<8x256xf32>
    %331 = vector.broadcast %329 : vector<8x1xf32> to vector<8x256xf32>
    %332 = arith.mulf %331, %330 : vector<8x256xf32>
    %333 = arith.addf %313, %332 : vector<8x256xf32>
    %334 = vector.extract_strided_slice %6 {offsets = [0, 64], sizes = [8, 1], strides = [1, 1]} : vector<8x128xf32> to vector<8x1xf32>
    %c0_78 = arith.constant 0 : index
    %c64_79 = arith.constant 64 : index
    %335 = vector.load %arg4[%c0_78, %c64_79] : memref<8x384xf32, #tpu.memory_space<vmem>>, vector<8x256xf32>
    %336 = vector.broadcast %334 : vector<8x1xf32> to vector<8x256xf32>
    %337 = arith.mulf %336, %335 : vector<8x256xf32>
    %338 = arith.addf %318, %337 : vector<8x256xf32>
    %339 = vector.extract_strided_slice %6 {offsets = [0, 65], sizes = [8, 1], strides = [1, 1]} : vector<8x128xf32> to vector<8x1xf32>
    %c0_80 = arith.constant 0 : index
    %c65 = arith.constant 65 : index
    %340 = vector.load %arg4[%c0_80, %c65] : memref<8x384xf32, #tpu.memory_space<vmem>>, vector<8x256xf32>
    %341 = vector.broadcast %339 : vector<8x1xf32> to vector<8x256xf32>
    %342 = arith.mulf %341, %340 : vector<8x256xf32>
    %343 = arith.addf %323, %342 : vector<8x256xf32>
    %344 = vector.extract_strided_slice %6 {offsets = [0, 66], sizes = [8, 1], strides = [1, 1]} : vector<8x128xf32> to vector<8x1xf32>
    %c0_81 = arith.constant 0 : index
    %c66 = arith.constant 66 : index
    %345 = vector.load %arg4[%c0_81, %c66] : memref<8x384xf32, #tpu.memory_space<vmem>>, vector<8x256xf32>
    %346 = vector.broadcast %344 : vector<8x1xf32> to vector<8x256xf32>
    %347 = arith.mulf %346, %345 : vector<8x256xf32>
    %348 = arith.addf %328, %347 : vector<8x256xf32>
    %349 = vector.extract_strided_slice %6 {offsets = [0, 67], sizes = [8, 1], strides = [1, 1]} : vector<8x128xf32> to vector<8x1xf32>
    %c0_82 = arith.constant 0 : index
    %c67 = arith.constant 67 : index
    %350 = vector.load %arg4[%c0_82, %c67] : memref<8x384xf32, #tpu.memory_space<vmem>>, vector<8x256xf32>
    %351 = vector.broadcast %349 : vector<8x1xf32> to vector<8x256xf32>
    %352 = arith.mulf %351, %350 : vector<8x256xf32>
    %353 = arith.addf %333, %352 : vector<8x256xf32>
    %354 = vector.extract_strided_slice %6 {offsets = [0, 68], sizes = [8, 1], strides = [1, 1]} : vector<8x128xf32> to vector<8x1xf32>
    %c0_83 = arith.constant 0 : index
    %c68 = arith.constant 68 : index
    %355 = vector.load %arg4[%c0_83, %c68] : memref<8x384xf32, #tpu.memory_space<vmem>>, vector<8x256xf32>
    %356 = vector.broadcast %354 : vector<8x1xf32> to vector<8x256xf32>
    %357 = arith.mulf %356, %355 : vector<8x256xf32>
    %358 = arith.addf %338, %357 : vector<8x256xf32>
    %359 = vector.extract_strided_slice %6 {offsets = [0, 69], sizes = [8, 1], strides = [1, 1]} : vector<8x128xf32> to vector<8x1xf32>
    %c0_84 = arith.constant 0 : index
    %c69 = arith.constant 69 : index
    %360 = vector.load %arg4[%c0_84, %c69] : memref<8x384xf32, #tpu.memory_space<vmem>>, vector<8x256xf32>
    %361 = vector.broadcast %359 : vector<8x1xf32> to vector<8x256xf32>
    %362 = arith.mulf %361, %360 : vector<8x256xf32>
    %363 = arith.addf %343, %362 : vector<8x256xf32>
    %364 = vector.extract_strided_slice %6 {offsets = [0, 70], sizes = [8, 1], strides = [1, 1]} : vector<8x128xf32> to vector<8x1xf32>
    %c0_85 = arith.constant 0 : index
    %c70 = arith.constant 70 : index
    %365 = vector.load %arg4[%c0_85, %c70] : memref<8x384xf32, #tpu.memory_space<vmem>>, vector<8x256xf32>
    %366 = vector.broadcast %364 : vector<8x1xf32> to vector<8x256xf32>
    %367 = arith.mulf %366, %365 : vector<8x256xf32>
    %368 = arith.addf %348, %367 : vector<8x256xf32>
    %369 = vector.extract_strided_slice %6 {offsets = [0, 71], sizes = [8, 1], strides = [1, 1]} : vector<8x128xf32> to vector<8x1xf32>
    %c0_86 = arith.constant 0 : index
    %c71 = arith.constant 71 : index
    %370 = vector.load %arg4[%c0_86, %c71] : memref<8x384xf32, #tpu.memory_space<vmem>>, vector<8x256xf32>
    %371 = vector.broadcast %369 : vector<8x1xf32> to vector<8x256xf32>
    %372 = arith.mulf %371, %370 : vector<8x256xf32>
    %373 = arith.addf %353, %372 : vector<8x256xf32>
    %374 = vector.extract_strided_slice %6 {offsets = [0, 72], sizes = [8, 1], strides = [1, 1]} : vector<8x128xf32> to vector<8x1xf32>
    %c0_87 = arith.constant 0 : index
    %c72 = arith.constant 72 : index
    %375 = vector.load %arg4[%c0_87, %c72] : memref<8x384xf32, #tpu.memory_space<vmem>>, vector<8x256xf32>
    %376 = vector.broadcast %374 : vector<8x1xf32> to vector<8x256xf32>
    %377 = arith.mulf %376, %375 : vector<8x256xf32>
    %378 = arith.addf %358, %377 : vector<8x256xf32>
    %379 = vector.extract_strided_slice %6 {offsets = [0, 73], sizes = [8, 1], strides = [1, 1]} : vector<8x128xf32> to vector<8x1xf32>
    %c0_88 = arith.constant 0 : index
    %c73 = arith.constant 73 : index
    %380 = vector.load %arg4[%c0_88, %c73] : memref<8x384xf32, #tpu.memory_space<vmem>>, vector<8x256xf32>
    %381 = vector.broadcast %379 : vector<8x1xf32> to vector<8x256xf32>
    %382 = arith.mulf %381, %380 : vector<8x256xf32>
    %383 = arith.addf %363, %382 : vector<8x256xf32>
    %384 = vector.extract_strided_slice %6 {offsets = [0, 74], sizes = [8, 1], strides = [1, 1]} : vector<8x128xf32> to vector<8x1xf32>
    %c0_89 = arith.constant 0 : index
    %c74 = arith.constant 74 : index
    %385 = vector.load %arg4[%c0_89, %c74] : memref<8x384xf32, #tpu.memory_space<vmem>>, vector<8x256xf32>
    %386 = vector.broadcast %384 : vector<8x1xf32> to vector<8x256xf32>
    %387 = arith.mulf %386, %385 : vector<8x256xf32>
    %388 = arith.addf %368, %387 : vector<8x256xf32>
    %389 = vector.extract_strided_slice %6 {offsets = [0, 75], sizes = [8, 1], strides = [1, 1]} : vector<8x128xf32> to vector<8x1xf32>
    %c0_90 = arith.constant 0 : index
    %c75 = arith.constant 75 : index
    %390 = vector.load %arg4[%c0_90, %c75] : memref<8x384xf32, #tpu.memory_space<vmem>>, vector<8x256xf32>
    %391 = vector.broadcast %389 : vector<8x1xf32> to vector<8x256xf32>
    %392 = arith.mulf %391, %390 : vector<8x256xf32>
    %393 = arith.addf %373, %392 : vector<8x256xf32>
    %394 = vector.extract_strided_slice %6 {offsets = [0, 76], sizes = [8, 1], strides = [1, 1]} : vector<8x128xf32> to vector<8x1xf32>
    %c0_91 = arith.constant 0 : index
    %c76 = arith.constant 76 : index
    %395 = vector.load %arg4[%c0_91, %c76] : memref<8x384xf32, #tpu.memory_space<vmem>>, vector<8x256xf32>
    %396 = vector.broadcast %394 : vector<8x1xf32> to vector<8x256xf32>
    %397 = arith.mulf %396, %395 : vector<8x256xf32>
    %398 = arith.addf %378, %397 : vector<8x256xf32>
    %399 = vector.extract_strided_slice %6 {offsets = [0, 77], sizes = [8, 1], strides = [1, 1]} : vector<8x128xf32> to vector<8x1xf32>
    %c0_92 = arith.constant 0 : index
    %c77 = arith.constant 77 : index
    %400 = vector.load %arg4[%c0_92, %c77] : memref<8x384xf32, #tpu.memory_space<vmem>>, vector<8x256xf32>
    %401 = vector.broadcast %399 : vector<8x1xf32> to vector<8x256xf32>
    %402 = arith.mulf %401, %400 : vector<8x256xf32>
    %403 = arith.addf %383, %402 : vector<8x256xf32>
    %404 = vector.extract_strided_slice %6 {offsets = [0, 78], sizes = [8, 1], strides = [1, 1]} : vector<8x128xf32> to vector<8x1xf32>
    %c0_93 = arith.constant 0 : index
    %c78 = arith.constant 78 : index
    %405 = vector.load %arg4[%c0_93, %c78] : memref<8x384xf32, #tpu.memory_space<vmem>>, vector<8x256xf32>
    %406 = vector.broadcast %404 : vector<8x1xf32> to vector<8x256xf32>
    %407 = arith.mulf %406, %405 : vector<8x256xf32>
    %408 = arith.addf %388, %407 : vector<8x256xf32>
    %409 = vector.extract_strided_slice %6 {offsets = [0, 79], sizes = [8, 1], strides = [1, 1]} : vector<8x128xf32> to vector<8x1xf32>
    %c0_94 = arith.constant 0 : index
    %c79 = arith.constant 79 : index
    %410 = vector.load %arg4[%c0_94, %c79] : memref<8x384xf32, #tpu.memory_space<vmem>>, vector<8x256xf32>
    %411 = vector.broadcast %409 : vector<8x1xf32> to vector<8x256xf32>
    %412 = arith.mulf %411, %410 : vector<8x256xf32>
    %413 = arith.addf %393, %412 : vector<8x256xf32>
    %414 = vector.extract_strided_slice %6 {offsets = [0, 80], sizes = [8, 1], strides = [1, 1]} : vector<8x128xf32> to vector<8x1xf32>
    %c0_95 = arith.constant 0 : index
    %c80 = arith.constant 80 : index
    %415 = vector.load %arg4[%c0_95, %c80] : memref<8x384xf32, #tpu.memory_space<vmem>>, vector<8x256xf32>
    %416 = vector.broadcast %414 : vector<8x1xf32> to vector<8x256xf32>
    %417 = arith.mulf %416, %415 : vector<8x256xf32>
    %418 = arith.addf %398, %417 : vector<8x256xf32>
    %419 = vector.extract_strided_slice %6 {offsets = [0, 81], sizes = [8, 1], strides = [1, 1]} : vector<8x128xf32> to vector<8x1xf32>
    %c0_96 = arith.constant 0 : index
    %c81 = arith.constant 81 : index
    %420 = vector.load %arg4[%c0_96, %c81] : memref<8x384xf32, #tpu.memory_space<vmem>>, vector<8x256xf32>
    %421 = vector.broadcast %419 : vector<8x1xf32> to vector<8x256xf32>
    %422 = arith.mulf %421, %420 : vector<8x256xf32>
    %423 = arith.addf %403, %422 : vector<8x256xf32>
    %424 = vector.extract_strided_slice %6 {offsets = [0, 82], sizes = [8, 1], strides = [1, 1]} : vector<8x128xf32> to vector<8x1xf32>
    %c0_97 = arith.constant 0 : index
    %c82 = arith.constant 82 : index
    %425 = vector.load %arg4[%c0_97, %c82] : memref<8x384xf32, #tpu.memory_space<vmem>>, vector<8x256xf32>
    %426 = vector.broadcast %424 : vector<8x1xf32> to vector<8x256xf32>
    %427 = arith.mulf %426, %425 : vector<8x256xf32>
    %428 = arith.addf %408, %427 : vector<8x256xf32>
    %429 = vector.extract_strided_slice %6 {offsets = [0, 83], sizes = [8, 1], strides = [1, 1]} : vector<8x128xf32> to vector<8x1xf32>
    %c0_98 = arith.constant 0 : index
    %c83 = arith.constant 83 : index
    %430 = vector.load %arg4[%c0_98, %c83] : memref<8x384xf32, #tpu.memory_space<vmem>>, vector<8x256xf32>
    %431 = vector.broadcast %429 : vector<8x1xf32> to vector<8x256xf32>
    %432 = arith.mulf %431, %430 : vector<8x256xf32>
    %433 = arith.addf %413, %432 : vector<8x256xf32>
    %434 = vector.extract_strided_slice %6 {offsets = [0, 84], sizes = [8, 1], strides = [1, 1]} : vector<8x128xf32> to vector<8x1xf32>
    %c0_99 = arith.constant 0 : index
    %c84 = arith.constant 84 : index
    %435 = vector.load %arg4[%c0_99, %c84] : memref<8x384xf32, #tpu.memory_space<vmem>>, vector<8x256xf32>
    %436 = vector.broadcast %434 : vector<8x1xf32> to vector<8x256xf32>
    %437 = arith.mulf %436, %435 : vector<8x256xf32>
    %438 = arith.addf %418, %437 : vector<8x256xf32>
    %439 = vector.extract_strided_slice %6 {offsets = [0, 85], sizes = [8, 1], strides = [1, 1]} : vector<8x128xf32> to vector<8x1xf32>
    %c0_100 = arith.constant 0 : index
    %c85 = arith.constant 85 : index
    %440 = vector.load %arg4[%c0_100, %c85] : memref<8x384xf32, #tpu.memory_space<vmem>>, vector<8x256xf32>
    %441 = vector.broadcast %439 : vector<8x1xf32> to vector<8x256xf32>
    %442 = arith.mulf %441, %440 : vector<8x256xf32>
    %443 = arith.addf %423, %442 : vector<8x256xf32>
    %444 = vector.extract_strided_slice %6 {offsets = [0, 86], sizes = [8, 1], strides = [1, 1]} : vector<8x128xf32> to vector<8x1xf32>
    %c0_101 = arith.constant 0 : index
    %c86 = arith.constant 86 : index
    %445 = vector.load %arg4[%c0_101, %c86] : memref<8x384xf32, #tpu.memory_space<vmem>>, vector<8x256xf32>
    %446 = vector.broadcast %444 : vector<8x1xf32> to vector<8x256xf32>
    %447 = arith.mulf %446, %445 : vector<8x256xf32>
    %448 = arith.addf %428, %447 : vector<8x256xf32>
    %449 = vector.extract_strided_slice %6 {offsets = [0, 87], sizes = [8, 1], strides = [1, 1]} : vector<8x128xf32> to vector<8x1xf32>
    %c0_102 = arith.constant 0 : index
    %c87 = arith.constant 87 : index
    %450 = vector.load %arg4[%c0_102, %c87] : memref<8x384xf32, #tpu.memory_space<vmem>>, vector<8x256xf32>
    %451 = vector.broadcast %449 : vector<8x1xf32> to vector<8x256xf32>
    %452 = arith.mulf %451, %450 : vector<8x256xf32>
    %453 = arith.addf %433, %452 : vector<8x256xf32>
    %454 = vector.extract_strided_slice %6 {offsets = [0, 88], sizes = [8, 1], strides = [1, 1]} : vector<8x128xf32> to vector<8x1xf32>
    %c0_103 = arith.constant 0 : index
    %c88 = arith.constant 88 : index
    %455 = vector.load %arg4[%c0_103, %c88] : memref<8x384xf32, #tpu.memory_space<vmem>>, vector<8x256xf32>
    %456 = vector.broadcast %454 : vector<8x1xf32> to vector<8x256xf32>
    %457 = arith.mulf %456, %455 : vector<8x256xf32>
    %458 = arith.addf %438, %457 : vector<8x256xf32>
    %459 = vector.extract_strided_slice %6 {offsets = [0, 89], sizes = [8, 1], strides = [1, 1]} : vector<8x128xf32> to vector<8x1xf32>
    %c0_104 = arith.constant 0 : index
    %c89 = arith.constant 89 : index
    %460 = vector.load %arg4[%c0_104, %c89] : memref<8x384xf32, #tpu.memory_space<vmem>>, vector<8x256xf32>
    %461 = vector.broadcast %459 : vector<8x1xf32> to vector<8x256xf32>
    %462 = arith.mulf %461, %460 : vector<8x256xf32>
    %463 = arith.addf %443, %462 : vector<8x256xf32>
    %464 = vector.extract_strided_slice %6 {offsets = [0, 90], sizes = [8, 1], strides = [1, 1]} : vector<8x128xf32> to vector<8x1xf32>
    %c0_105 = arith.constant 0 : index
    %c90 = arith.constant 90 : index
    %465 = vector.load %arg4[%c0_105, %c90] : memref<8x384xf32, #tpu.memory_space<vmem>>, vector<8x256xf32>
    %466 = vector.broadcast %464 : vector<8x1xf32> to vector<8x256xf32>
    %467 = arith.mulf %466, %465 : vector<8x256xf32>
    %468 = arith.addf %448, %467 : vector<8x256xf32>
    %469 = vector.extract_strided_slice %6 {offsets = [0, 91], sizes = [8, 1], strides = [1, 1]} : vector<8x128xf32> to vector<8x1xf32>
    %c0_106 = arith.constant 0 : index
    %c91 = arith.constant 91 : index
    %470 = vector.load %arg4[%c0_106, %c91] : memref<8x384xf32, #tpu.memory_space<vmem>>, vector<8x256xf32>
    %471 = vector.broadcast %469 : vector<8x1xf32> to vector<8x256xf32>
    %472 = arith.mulf %471, %470 : vector<8x256xf32>
    %473 = arith.addf %453, %472 : vector<8x256xf32>
    %474 = vector.extract_strided_slice %6 {offsets = [0, 92], sizes = [8, 1], strides = [1, 1]} : vector<8x128xf32> to vector<8x1xf32>
    %c0_107 = arith.constant 0 : index
    %c92 = arith.constant 92 : index
    %475 = vector.load %arg4[%c0_107, %c92] : memref<8x384xf32, #tpu.memory_space<vmem>>, vector<8x256xf32>
    %476 = vector.broadcast %474 : vector<8x1xf32> to vector<8x256xf32>
    %477 = arith.mulf %476, %475 : vector<8x256xf32>
    %478 = arith.addf %458, %477 : vector<8x256xf32>
    %479 = vector.extract_strided_slice %6 {offsets = [0, 93], sizes = [8, 1], strides = [1, 1]} : vector<8x128xf32> to vector<8x1xf32>
    %c0_108 = arith.constant 0 : index
    %c93 = arith.constant 93 : index
    %480 = vector.load %arg4[%c0_108, %c93] : memref<8x384xf32, #tpu.memory_space<vmem>>, vector<8x256xf32>
    %481 = vector.broadcast %479 : vector<8x1xf32> to vector<8x256xf32>
    %482 = arith.mulf %481, %480 : vector<8x256xf32>
    %483 = arith.addf %463, %482 : vector<8x256xf32>
    %484 = vector.extract_strided_slice %6 {offsets = [0, 94], sizes = [8, 1], strides = [1, 1]} : vector<8x128xf32> to vector<8x1xf32>
    %c0_109 = arith.constant 0 : index
    %c94 = arith.constant 94 : index
    %485 = vector.load %arg4[%c0_109, %c94] : memref<8x384xf32, #tpu.memory_space<vmem>>, vector<8x256xf32>
    %486 = vector.broadcast %484 : vector<8x1xf32> to vector<8x256xf32>
    %487 = arith.mulf %486, %485 : vector<8x256xf32>
    %488 = arith.addf %468, %487 : vector<8x256xf32>
    %489 = vector.extract_strided_slice %6 {offsets = [0, 95], sizes = [8, 1], strides = [1, 1]} : vector<8x128xf32> to vector<8x1xf32>
    %c0_110 = arith.constant 0 : index
    %c95 = arith.constant 95 : index
    %490 = vector.load %arg4[%c0_110, %c95] : memref<8x384xf32, #tpu.memory_space<vmem>>, vector<8x256xf32>
    %491 = vector.broadcast %489 : vector<8x1xf32> to vector<8x256xf32>
    %492 = arith.mulf %491, %490 : vector<8x256xf32>
    %493 = arith.addf %473, %492 : vector<8x256xf32>
    %494 = vector.extract_strided_slice %6 {offsets = [0, 96], sizes = [8, 1], strides = [1, 1]} : vector<8x128xf32> to vector<8x1xf32>
    %c0_111 = arith.constant 0 : index
    %c96 = arith.constant 96 : index
    %495 = vector.load %arg4[%c0_111, %c96] : memref<8x384xf32, #tpu.memory_space<vmem>>, vector<8x256xf32>
    %496 = vector.broadcast %494 : vector<8x1xf32> to vector<8x256xf32>
    %497 = arith.mulf %496, %495 : vector<8x256xf32>
    %498 = arith.addf %478, %497 : vector<8x256xf32>
    %499 = vector.extract_strided_slice %6 {offsets = [0, 97], sizes = [8, 1], strides = [1, 1]} : vector<8x128xf32> to vector<8x1xf32>
    %c0_112 = arith.constant 0 : index
    %c97 = arith.constant 97 : index
    %500 = vector.load %arg4[%c0_112, %c97] : memref<8x384xf32, #tpu.memory_space<vmem>>, vector<8x256xf32>
    %501 = vector.broadcast %499 : vector<8x1xf32> to vector<8x256xf32>
    %502 = arith.mulf %501, %500 : vector<8x256xf32>
    %503 = arith.addf %483, %502 : vector<8x256xf32>
    %504 = vector.extract_strided_slice %6 {offsets = [0, 98], sizes = [8, 1], strides = [1, 1]} : vector<8x128xf32> to vector<8x1xf32>
    %c0_113 = arith.constant 0 : index
    %c98 = arith.constant 98 : index
    %505 = vector.load %arg4[%c0_113, %c98] : memref<8x384xf32, #tpu.memory_space<vmem>>, vector<8x256xf32>
    %506 = vector.broadcast %504 : vector<8x1xf32> to vector<8x256xf32>
    %507 = arith.mulf %506, %505 : vector<8x256xf32>
    %508 = arith.addf %488, %507 : vector<8x256xf32>
    %509 = vector.extract_strided_slice %6 {offsets = [0, 99], sizes = [8, 1], strides = [1, 1]} : vector<8x128xf32> to vector<8x1xf32>
    %c0_114 = arith.constant 0 : index
    %c99 = arith.constant 99 : index
    %510 = vector.load %arg4[%c0_114, %c99] : memref<8x384xf32, #tpu.memory_space<vmem>>, vector<8x256xf32>
    %511 = vector.broadcast %509 : vector<8x1xf32> to vector<8x256xf32>
    %512 = arith.mulf %511, %510 : vector<8x256xf32>
    %513 = arith.addf %493, %512 : vector<8x256xf32>
    %514 = vector.extract_strided_slice %6 {offsets = [0, 100], sizes = [8, 1], strides = [1, 1]} : vector<8x128xf32> to vector<8x1xf32>
    %c0_115 = arith.constant 0 : index
    %c100 = arith.constant 100 : index
    %515 = vector.load %arg4[%c0_115, %c100] : memref<8x384xf32, #tpu.memory_space<vmem>>, vector<8x256xf32>
    %516 = vector.broadcast %514 : vector<8x1xf32> to vector<8x256xf32>
    %517 = arith.mulf %516, %515 : vector<8x256xf32>
    %518 = arith.addf %498, %517 : vector<8x256xf32>
    %519 = vector.extract_strided_slice %6 {offsets = [0, 101], sizes = [8, 1], strides = [1, 1]} : vector<8x128xf32> to vector<8x1xf32>
    %c0_116 = arith.constant 0 : index
    %c101 = arith.constant 101 : index
    %520 = vector.load %arg4[%c0_116, %c101] : memref<8x384xf32, #tpu.memory_space<vmem>>, vector<8x256xf32>
    %521 = vector.broadcast %519 : vector<8x1xf32> to vector<8x256xf32>
    %522 = arith.mulf %521, %520 : vector<8x256xf32>
    %523 = arith.addf %503, %522 : vector<8x256xf32>
    %524 = vector.extract_strided_slice %6 {offsets = [0, 102], sizes = [8, 1], strides = [1, 1]} : vector<8x128xf32> to vector<8x1xf32>
    %c0_117 = arith.constant 0 : index
    %c102 = arith.constant 102 : index
    %525 = vector.load %arg4[%c0_117, %c102] : memref<8x384xf32, #tpu.memory_space<vmem>>, vector<8x256xf32>
    %526 = vector.broadcast %524 : vector<8x1xf32> to vector<8x256xf32>
    %527 = arith.mulf %526, %525 : vector<8x256xf32>
    %528 = arith.addf %508, %527 : vector<8x256xf32>
    %529 = vector.extract_strided_slice %6 {offsets = [0, 103], sizes = [8, 1], strides = [1, 1]} : vector<8x128xf32> to vector<8x1xf32>
    %c0_118 = arith.constant 0 : index
    %c103 = arith.constant 103 : index
    %530 = vector.load %arg4[%c0_118, %c103] : memref<8x384xf32, #tpu.memory_space<vmem>>, vector<8x256xf32>
    %531 = vector.broadcast %529 : vector<8x1xf32> to vector<8x256xf32>
    %532 = arith.mulf %531, %530 : vector<8x256xf32>
    %533 = arith.addf %513, %532 : vector<8x256xf32>
    %534 = vector.extract_strided_slice %6 {offsets = [0, 104], sizes = [8, 1], strides = [1, 1]} : vector<8x128xf32> to vector<8x1xf32>
    %c0_119 = arith.constant 0 : index
    %c104 = arith.constant 104 : index
    %535 = vector.load %arg4[%c0_119, %c104] : memref<8x384xf32, #tpu.memory_space<vmem>>, vector<8x256xf32>
    %536 = vector.broadcast %534 : vector<8x1xf32> to vector<8x256xf32>
    %537 = arith.mulf %536, %535 : vector<8x256xf32>
    %538 = arith.addf %518, %537 : vector<8x256xf32>
    %539 = vector.extract_strided_slice %6 {offsets = [0, 105], sizes = [8, 1], strides = [1, 1]} : vector<8x128xf32> to vector<8x1xf32>
    %c0_120 = arith.constant 0 : index
    %c105 = arith.constant 105 : index
    %540 = vector.load %arg4[%c0_120, %c105] : memref<8x384xf32, #tpu.memory_space<vmem>>, vector<8x256xf32>
    %541 = vector.broadcast %539 : vector<8x1xf32> to vector<8x256xf32>
    %542 = arith.mulf %541, %540 : vector<8x256xf32>
    %543 = arith.addf %523, %542 : vector<8x256xf32>
    %544 = vector.extract_strided_slice %6 {offsets = [0, 106], sizes = [8, 1], strides = [1, 1]} : vector<8x128xf32> to vector<8x1xf32>
    %c0_121 = arith.constant 0 : index
    %c106 = arith.constant 106 : index
    %545 = vector.load %arg4[%c0_121, %c106] : memref<8x384xf32, #tpu.memory_space<vmem>>, vector<8x256xf32>
    %546 = vector.broadcast %544 : vector<8x1xf32> to vector<8x256xf32>
    %547 = arith.mulf %546, %545 : vector<8x256xf32>
    %548 = arith.addf %528, %547 : vector<8x256xf32>
    %549 = vector.extract_strided_slice %6 {offsets = [0, 107], sizes = [8, 1], strides = [1, 1]} : vector<8x128xf32> to vector<8x1xf32>
    %c0_122 = arith.constant 0 : index
    %c107 = arith.constant 107 : index
    %550 = vector.load %arg4[%c0_122, %c107] : memref<8x384xf32, #tpu.memory_space<vmem>>, vector<8x256xf32>
    %551 = vector.broadcast %549 : vector<8x1xf32> to vector<8x256xf32>
    %552 = arith.mulf %551, %550 : vector<8x256xf32>
    %553 = arith.addf %533, %552 : vector<8x256xf32>
    %554 = vector.extract_strided_slice %6 {offsets = [0, 108], sizes = [8, 1], strides = [1, 1]} : vector<8x128xf32> to vector<8x1xf32>
    %c0_123 = arith.constant 0 : index
    %c108 = arith.constant 108 : index
    %555 = vector.load %arg4[%c0_123, %c108] : memref<8x384xf32, #tpu.memory_space<vmem>>, vector<8x256xf32>
    %556 = vector.broadcast %554 : vector<8x1xf32> to vector<8x256xf32>
    %557 = arith.mulf %556, %555 : vector<8x256xf32>
    %558 = arith.addf %538, %557 : vector<8x256xf32>
    %559 = vector.extract_strided_slice %6 {offsets = [0, 109], sizes = [8, 1], strides = [1, 1]} : vector<8x128xf32> to vector<8x1xf32>
    %c0_124 = arith.constant 0 : index
    %c109 = arith.constant 109 : index
    %560 = vector.load %arg4[%c0_124, %c109] : memref<8x384xf32, #tpu.memory_space<vmem>>, vector<8x256xf32>
    %561 = vector.broadcast %559 : vector<8x1xf32> to vector<8x256xf32>
    %562 = arith.mulf %561, %560 : vector<8x256xf32>
    %563 = arith.addf %543, %562 : vector<8x256xf32>
    %564 = vector.extract_strided_slice %6 {offsets = [0, 110], sizes = [8, 1], strides = [1, 1]} : vector<8x128xf32> to vector<8x1xf32>
    %c0_125 = arith.constant 0 : index
    %c110 = arith.constant 110 : index
    %565 = vector.load %arg4[%c0_125, %c110] : memref<8x384xf32, #tpu.memory_space<vmem>>, vector<8x256xf32>
    %566 = vector.broadcast %564 : vector<8x1xf32> to vector<8x256xf32>
    %567 = arith.mulf %566, %565 : vector<8x256xf32>
    %568 = arith.addf %548, %567 : vector<8x256xf32>
    %569 = vector.extract_strided_slice %6 {offsets = [0, 111], sizes = [8, 1], strides = [1, 1]} : vector<8x128xf32> to vector<8x1xf32>
    %c0_126 = arith.constant 0 : index
    %c111 = arith.constant 111 : index
    %570 = vector.load %arg4[%c0_126, %c111] : memref<8x384xf32, #tpu.memory_space<vmem>>, vector<8x256xf32>
    %571 = vector.broadcast %569 : vector<8x1xf32> to vector<8x256xf32>
    %572 = arith.mulf %571, %570 : vector<8x256xf32>
    %573 = arith.addf %553, %572 : vector<8x256xf32>
    %574 = vector.extract_strided_slice %6 {offsets = [0, 112], sizes = [8, 1], strides = [1, 1]} : vector<8x128xf32> to vector<8x1xf32>
    %c0_127 = arith.constant 0 : index
    %c112 = arith.constant 112 : index
    %575 = vector.load %arg4[%c0_127, %c112] : memref<8x384xf32, #tpu.memory_space<vmem>>, vector<8x256xf32>
    %576 = vector.broadcast %574 : vector<8x1xf32> to vector<8x256xf32>
    %577 = arith.mulf %576, %575 : vector<8x256xf32>
    %578 = arith.addf %558, %577 : vector<8x256xf32>
    %579 = vector.extract_strided_slice %6 {offsets = [0, 113], sizes = [8, 1], strides = [1, 1]} : vector<8x128xf32> to vector<8x1xf32>
    %c0_128 = arith.constant 0 : index
    %c113 = arith.constant 113 : index
    %580 = vector.load %arg4[%c0_128, %c113] : memref<8x384xf32, #tpu.memory_space<vmem>>, vector<8x256xf32>
    %581 = vector.broadcast %579 : vector<8x1xf32> to vector<8x256xf32>
    %582 = arith.mulf %581, %580 : vector<8x256xf32>
    %583 = arith.addf %563, %582 : vector<8x256xf32>
    %584 = vector.extract_strided_slice %6 {offsets = [0, 114], sizes = [8, 1], strides = [1, 1]} : vector<8x128xf32> to vector<8x1xf32>
    %c0_129 = arith.constant 0 : index
    %c114 = arith.constant 114 : index
    %585 = vector.load %arg4[%c0_129, %c114] : memref<8x384xf32, #tpu.memory_space<vmem>>, vector<8x256xf32>
    %586 = vector.broadcast %584 : vector<8x1xf32> to vector<8x256xf32>
    %587 = arith.mulf %586, %585 : vector<8x256xf32>
    %588 = arith.addf %568, %587 : vector<8x256xf32>
    %589 = vector.extract_strided_slice %6 {offsets = [0, 115], sizes = [8, 1], strides = [1, 1]} : vector<8x128xf32> to vector<8x1xf32>
    %c0_130 = arith.constant 0 : index
    %c115 = arith.constant 115 : index
    %590 = vector.load %arg4[%c0_130, %c115] : memref<8x384xf32, #tpu.memory_space<vmem>>, vector<8x256xf32>
    %591 = vector.broadcast %589 : vector<8x1xf32> to vector<8x256xf32>
    %592 = arith.mulf %591, %590 : vector<8x256xf32>
    %593 = arith.addf %573, %592 : vector<8x256xf32>
    %594 = vector.extract_strided_slice %6 {offsets = [0, 116], sizes = [8, 1], strides = [1, 1]} : vector<8x128xf32> to vector<8x1xf32>
    %c0_131 = arith.constant 0 : index
    %c116 = arith.constant 116 : index
    %595 = vector.load %arg4[%c0_131, %c116] : memref<8x384xf32, #tpu.memory_space<vmem>>, vector<8x256xf32>
    %596 = vector.broadcast %594 : vector<8x1xf32> to vector<8x256xf32>
    %597 = arith.mulf %596, %595 : vector<8x256xf32>
    %598 = arith.addf %578, %597 : vector<8x256xf32>
    %599 = vector.extract_strided_slice %6 {offsets = [0, 117], sizes = [8, 1], strides = [1, 1]} : vector<8x128xf32> to vector<8x1xf32>
    %c0_132 = arith.constant 0 : index
    %c117 = arith.constant 117 : index
    %600 = vector.load %arg4[%c0_132, %c117] : memref<8x384xf32, #tpu.memory_space<vmem>>, vector<8x256xf32>
    %601 = vector.broadcast %599 : vector<8x1xf32> to vector<8x256xf32>
    %602 = arith.mulf %601, %600 : vector<8x256xf32>
    %603 = arith.addf %583, %602 : vector<8x256xf32>
    %604 = vector.extract_strided_slice %6 {offsets = [0, 118], sizes = [8, 1], strides = [1, 1]} : vector<8x128xf32> to vector<8x1xf32>
    %c0_133 = arith.constant 0 : index
    %c118 = arith.constant 118 : index
    %605 = vector.load %arg4[%c0_133, %c118] : memref<8x384xf32, #tpu.memory_space<vmem>>, vector<8x256xf32>
    %606 = vector.broadcast %604 : vector<8x1xf32> to vector<8x256xf32>
    %607 = arith.mulf %606, %605 : vector<8x256xf32>
    %608 = arith.addf %588, %607 : vector<8x256xf32>
    %609 = vector.extract_strided_slice %6 {offsets = [0, 119], sizes = [8, 1], strides = [1, 1]} : vector<8x128xf32> to vector<8x1xf32>
    %c0_134 = arith.constant 0 : index
    %c119 = arith.constant 119 : index
    %610 = vector.load %arg4[%c0_134, %c119] : memref<8x384xf32, #tpu.memory_space<vmem>>, vector<8x256xf32>
    %611 = vector.broadcast %609 : vector<8x1xf32> to vector<8x256xf32>
    %612 = arith.mulf %611, %610 : vector<8x256xf32>
    %613 = arith.addf %593, %612 : vector<8x256xf32>
    %614 = vector.extract_strided_slice %6 {offsets = [0, 120], sizes = [8, 1], strides = [1, 1]} : vector<8x128xf32> to vector<8x1xf32>
    %c0_135 = arith.constant 0 : index
    %c120 = arith.constant 120 : index
    %615 = vector.load %arg4[%c0_135, %c120] : memref<8x384xf32, #tpu.memory_space<vmem>>, vector<8x256xf32>
    %616 = vector.broadcast %614 : vector<8x1xf32> to vector<8x256xf32>
    %617 = arith.mulf %616, %615 : vector<8x256xf32>
    %618 = arith.addf %598, %617 : vector<8x256xf32>
    %619 = vector.extract_strided_slice %6 {offsets = [0, 121], sizes = [8, 1], strides = [1, 1]} : vector<8x128xf32> to vector<8x1xf32>
    %c0_136 = arith.constant 0 : index
    %c121 = arith.constant 121 : index
    %620 = vector.load %arg4[%c0_136, %c121] : memref<8x384xf32, #tpu.memory_space<vmem>>, vector<8x256xf32>
    %621 = vector.broadcast %619 : vector<8x1xf32> to vector<8x256xf32>
    %622 = arith.mulf %621, %620 : vector<8x256xf32>
    %623 = arith.addf %603, %622 : vector<8x256xf32>
    %624 = vector.extract_strided_slice %6 {offsets = [0, 122], sizes = [8, 1], strides = [1, 1]} : vector<8x128xf32> to vector<8x1xf32>
    %c0_137 = arith.constant 0 : index
    %c122 = arith.constant 122 : index
    %625 = vector.load %arg4[%c0_137, %c122] : memref<8x384xf32, #tpu.memory_space<vmem>>, vector<8x256xf32>
    %626 = vector.broadcast %624 : vector<8x1xf32> to vector<8x256xf32>
    %627 = arith.mulf %626, %625 : vector<8x256xf32>
    %628 = arith.addf %608, %627 : vector<8x256xf32>
    %629 = vector.extract_strided_slice %6 {offsets = [0, 123], sizes = [8, 1], strides = [1, 1]} : vector<8x128xf32> to vector<8x1xf32>
    %c0_138 = arith.constant 0 : index
    %c123 = arith.constant 123 : index
    %630 = vector.load %arg4[%c0_138, %c123] : memref<8x384xf32, #tpu.memory_space<vmem>>, vector<8x256xf32>
    %631 = vector.broadcast %629 : vector<8x1xf32> to vector<8x256xf32>
    %632 = arith.mulf %631, %630 : vector<8x256xf32>
    %633 = arith.addf %613, %632 : vector<8x256xf32>
    %634 = vector.extract_strided_slice %6 {offsets = [0, 124], sizes = [8, 1], strides = [1, 1]} : vector<8x128xf32> to vector<8x1xf32>
    %c0_139 = arith.constant 0 : index
    %c124 = arith.constant 124 : index
    %635 = vector.load %arg4[%c0_139, %c124] : memref<8x384xf32, #tpu.memory_space<vmem>>, vector<8x256xf32>
    %636 = vector.broadcast %634 : vector<8x1xf32> to vector<8x256xf32>
    %637 = arith.mulf %636, %635 : vector<8x256xf32>
    %638 = arith.addf %618, %637 : vector<8x256xf32>
    %639 = vector.extract_strided_slice %6 {offsets = [0, 125], sizes = [8, 1], strides = [1, 1]} : vector<8x128xf32> to vector<8x1xf32>
    %c0_140 = arith.constant 0 : index
    %c125 = arith.constant 125 : index
    %640 = vector.load %arg4[%c0_140, %c125] : memref<8x384xf32, #tpu.memory_space<vmem>>, vector<8x256xf32>
    %641 = vector.broadcast %639 : vector<8x1xf32> to vector<8x256xf32>
    %642 = arith.mulf %641, %640 : vector<8x256xf32>
    %643 = arith.addf %623, %642 : vector<8x256xf32>
    %644 = vector.extract_strided_slice %6 {offsets = [0, 126], sizes = [8, 1], strides = [1, 1]} : vector<8x128xf32> to vector<8x1xf32>
    %c0_141 = arith.constant 0 : index
    %c126 = arith.constant 126 : index
    %645 = vector.load %arg4[%c0_141, %c126] : memref<8x384xf32, #tpu.memory_space<vmem>>, vector<8x256xf32>
    %646 = vector.broadcast %644 : vector<8x1xf32> to vector<8x256xf32>
    %647 = arith.mulf %646, %645 : vector<8x256xf32>
    %648 = arith.addf %628, %647 : vector<8x256xf32>
    %649 = vector.extract_strided_slice %6 {offsets = [0, 127], sizes = [8, 1], strides = [1, 1]} : vector<8x128xf32> to vector<8x1xf32>
    %c0_142 = arith.constant 0 : index
    %c127 = arith.constant 127 : index
    %650 = vector.load %arg4[%c0_142, %c127] : memref<8x384xf32, #tpu.memory_space<vmem>>, vector<8x256xf32>
    %651 = vector.broadcast %649 : vector<8x1xf32> to vector<8x256xf32>
    %652 = arith.mulf %651, %650 : vector<8x256xf32>
    %653 = arith.addf %633, %652 : vector<8x256xf32>
    %654 = arith.addf %638, %643 : vector<8x256xf32>
    %655 = arith.addf %648, %653 : vector<8x256xf32>
    %656 = arith.addf %654, %655 : vector<8x256xf32>
    %c0_143 = arith.constant 0 : index
    %c0_144 = arith.constant 0 : index
    %c0_145 = arith.constant 0 : index
    %657 = vector.load %arg3[%c0_143, %c0_144, %c0_145] : memref<1x8x256xf32, #tpu.memory_space<vmem>>, vector<1x8x256xf32>
    %658 = vector.shape_cast %657 : vector<1x8x256xf32> to vector<8x256xf32>
    %659 = vector.shape_cast %656 : vector<8x256xf32> to vector<1x8x256xf32>
    tpu.vector_store %arg3[%c0_143, %c0_144, %c0_145], %659 {strides = array<i32>} : memref<1x8x256xf32, #tpu.memory_space<vmem>>, vector<1x8x256xf32>,
    return
  }
  func.func @transform_0(%arg0: i32) -> (i32, i32, i32) {
    %c0_i32 = arith.constant 0 : i32
    %c0_i32_0 = arith.constant 0 : i32
    %c0_i32_1 = arith.constant 0 : i32
    return %arg0, %c0_i32, %c0_i32_0 : i32, i32, i32
  }
  func.func @transform_1(%arg0: i32) -> (i32, i32) {
    %c0_i32 = arith.constant 0 : i32
    %c0_i32_0 = arith.constant 0 : i32
    %c0_i32_1 = arith.constant 0 : i32
    return %c0_i32, %c0_i32_0 : i32, i32
  }
  func.func @transform_2(%arg0: i32) -> (i32, i32, i32) {
    %c0_i32 = arith.constant 0 : i32
    %c0_i32_0 = arith.constant 0 : i32
    %c0_i32_1 = arith.constant 0 : i32
    return %arg0, %c0_i32, %c0_i32_0 : i32, i32, i32
  }
}

</mosaic_0001>

<bundles_post_ra>
// kernel: _run_windows.1
= control target key start
LH: loop header
LB: loop body
LE: loop exit
PB: predicated region body
PF: predicated region fallthrough
CT: control target
= control target key end

     0   :  { %v3509_v2 = vmov 0.0|0.0   ;;  %v3510_v4 = vmov 0.0   ;;  %vm3511_vm0 = vmmov 0   ;;  %s6172_s0 = inlined_call_operand.vmem [shape: f32[1,24,128], index: 0, kind: input, shape index: {}]   ;;  %s6173_s1 = inlined_call_operand.vmem [shape: f32[8,24], index: 1, kind: input, shape index: {}]   ;;  %s6174_s2 = inlined_call_operand.hbm [shape: f32[1,8,256], index: 2, kind: output, shape index: {}]  }
   0x1   :  { %v13_v0 = vld [vmem:[%s6172_s0] sm:$0xff]  ;;  %v14_v1 = vld [vmem:[%s6172_s0 + $0x8] sm:$0xff]  ;;  %3176 = vmatprep.subr.bf16.mxu0 %v3509_v2  ;;  %102 = vst [vmem:[#allocation2 + $0x10] sm:$0xff] %v3510_v4  ;;  %100 = vst [vmem:[#allocation2] sm:$0xff] %v3510_v4  ;;  %3173 = vmatprep.mubr.msk.f32.mxu0 %vm3511_vm0, %v3510_v4 }
   0x2   :  { %v3177_v3 = vpack.c.bf16 %v14_v1, %v13_v0  ;;  %101 = vst [vmem:[#allocation2 + $0x8] sm:$0xff] %v3510_v4 }
   0x3   :  { %7 = vsyncpa [#allocation4], 0  ;;  %v15_v5 = vld [vmem:[%s6172_s0 + $0x10] sm:$0xff]  ;;  %v12_v6 = vld [vmem:[%s6173_s1] sm:$0xff]  ;;  %vm6317_vm1 = vcmask 195584   ;;  %v3512_v7 = vmov 1  }
   0x4   :  { %3178 = vmatpush3.bf16.msra.mxu0 %v3177_v3  ;;  %3345 = vset.pattern.permute.xlu1 %v3512_v7  ;;  %v3513_v8 = vmov 0   ;;  %s3514_s0 = smov 64   ;;  %v3515_v20 = vmov 2   ;;  %v3516_v21 = vmov 4   ;;  %v3517_v22 = vmov 3   ;;  %s3544_s1 = smov 124  }
   0x5   :  { %3171 = vmatprep.subr.mxu0 %v3510_v4  ;;  %3344 = vset.pattern.permute.xlu0 %v3513_v8  ;;  %v3518_v23 = vmov 5   ;;  %v3519_v24 = vmov 6   ;;  %v3520_v25 = vmov 7   ;;  %v3521_v26 = vmov 8   ;;  %s3551_s17 = smov 120   ;;  %s3558_s18 = smov 116  }
   0x6   :  { %v3522_v27 = vmov 9   ;;  %v3523_v28 = vmov 10   ;;  %v3524_v29 = vmov 11   ;;  %v3525_v30 = vmov 12   ;;  %s3565_s19 = smov 112   ;;  %s3566_s20 = smov 108  }
   0x7   :  { %v3526_v31 = vmov 13   ;;  %v3527_v32 = vmov 14   ;;  %v3528_v33 = vmov 15   ;;  %v3529_v34 = vmov 16   ;;  %s3568_s21 = smov 104   ;;  %s3569_s22 = smov 100  }
   0x8   :  { %3172 = vmatpush3.msra.mxu0 %v15_v5  ;;  %v3530_v35 = vmov 17   ;;  %v3531_v36 = vmov 18   ;;  %v3532_v37 = vmov 19   ;;  %v3533_v38 = vmov 20   ;;  %s3570_s23 = smov 96   ;;  %s3571_s24 = smov 92  }
   0x9   :  { %3174 = vmatmul.mubr.msk.f32.vlgmr.msra.gmra.mrb[0].mxu0 %vm6317_vm1, %v12_v6  ;;  %v3534_v39 = vmov 21   ;;  %v3535_v40 = vmov 22   ;;  %v3536_v41 = vmov 23   ;;  %v3537_v42 = vmov 24   ;;  %s3572_s25 = smov 88   ;;  %s3573_s26 = smov 84  }
   0xa   :  { %vm107_vm3 = vcmask 1048064   ;;  %vm109_vm4 = vcmask 523264   ;;  %v3538_v43 = vmov 25   ;;  %v3539_v45 = vmov 26   ;;  %s3574_s27 = smov 80   ;;  %s3579_s28 = smov 76  }
   0xb   :  { %v3540_v46 = vmov 27   ;;  %v3541_v48 = vmov 28   ;;  %v3542_v51 = vmov 29   ;;  %v3543_v55 = vmov 30   ;;  %s3584_s29 = smov 72   ;;  %s3589_s30 = smov 68  }
   0xc   :  { %v3545_v59 = vmov 31   ;;  %v3546_v62 = vmov 32   ;;  %v3547_v1 = vmov 33   ;;  %v3548_v4 = vmov 34   ;;  %s3598_s3 = smov 60   ;;  %s3603_s4 = smov 56  }
   0xd   :  { %v3549_v8 = vmov 35   ;;  %vm170_vm5 = vcmask 1014784   ;;  %vm6308_vm6 = vcmask 982016   ;;  %vm6307_vm7 = vcmask 949248   ;;  %s3608_s5 = smov 52   ;;  %s3613_s6 = smov 48  }
   0xe   :  { %vm6306_vm8 = vcmask 916480   ;;  %vm6305_vm9 = vcmask 883712   ;;  %vm6304_vm10 = vcmask 850944   ;;  %vm6303_vm11 = vcmask 818176   ;;  %s3618_s7 = smov 44   ;;  %s3623_s8 = smov 40  }
   0xf   :  { %vm6302_vm12 = vcmask 785408   ;;  %vm6301_vm13 = vcmask 752640   ;;  %vm6299_vm14 = vcmask 719872   ;;  %vm6296_vm15 = vcmask 687104   ;;  %s3628_s9 = smov 36   ;;  %s3633_s10 = smov 32  }
  0x10   :  { %s3638_s11 = smov 28   ;;  %s3649_s12 = smov 24   ;;  %vm1215_vm0 = vcmask 654336  }
  0x11   :  { %s3658_s13 = smov 20   ;;  %s3661_s14 = smov 16  }
  0x12   :  { %s3664_s15 = smov 12   ;;  %s3665_s16 = smov 8  }
  0xdc   :  { %v86_v9 = vpop.f32.mrb[0].mxu0 }
  0xdd   :  { %v90_v10 = vmax.f32 %v86_v9, 0.0  ;;  %v3175_v11 = vpop.f32.mrb[1].mxu0 }
  0xde   :  { %v3550_v11 = vmov 36  }
  0xdf   :  { %v91_v12 = vadd.f32 1.0, %v90_v10  ;;  %v94_v13 = vmul.f32 -0.5, %v90_v10  ;;  %v97_v15 = vand.u32 2147483647, %v90_v10 }
  0xe1   :  { %3473 = vlog2.f32 %v91_v12  ;;  %v95_v14 = vadd.f32 1.0, %v94_v13  ;;  %vm98_vm2 = vcmp.lt.f32.partialorder %v97_v15, 0.0004427343 }
  0xe3   :  { %v96_v18 = vmul.f32 %v95_v14, %v90_v10  ;;  %v3552_v14 = vmov 37  }
  0xeb   :  { %v3474_v16 = vpop.eup %3473 }
  0xec   :  { %v93_v17 = vmul.f32 0.6931472, %v3474_v16 }
  0xee   :  { %v3702_v19 = vsel %vm98_vm2, %v96_v18, %v93_v17  ;;  %v3553_v17 = vmov 38   ;;  %vm1310_vm2 = vcmask 621568  }
  0xef   :  { %125 = vperm.xlu1 %3345, %v3702_v19   ;;  %104 = vrot.lane.b32.xlu0 %v3702_v19, %s3514_s0 }
  0xf3   :  { %3346 = vset.pattern.permute.xlu1 %v3515_v20  ;;  %114 = vperm.xlu0 %3344, %v3702_v19  }
  0xf4   :  { %135 = vperm.xlu1 %3346, %v3702_v19  }
  0xf7   :  { %3348 = vset.pattern.permute.xlu0 %v3516_v21 }
  0xf8   :  { %3347 = vset.pattern.permute.xlu1 %v3517_v22  ;;  %155 = vperm.xlu0 %3348, %v3702_v19   ;;  %v3554_v22 = vmov 39  }
  0xf9   :  { %145 = vperm.xlu1 %3347, %v3702_v19  }
  0xfd   :  { %3349 = vset.pattern.permute.xlu1 %v3518_v23 }
  0xfe   :  { %178 = vperm.xlu1 %3349, %v3702_v19  }
 0x102   :  { %3350 = vset.pattern.permute.xlu1 %v3519_v24 }
 0x103   :  { %202 = vperm.xlu1 %3350, %v3702_v19  }
 0x107   :  { %3351 = vset.pattern.permute.xlu1 %v3520_v25  ;;  %v3555_v25 = vmov 40  }
 0x108   :  { %226 = vperm.xlu1 %3351, %v3702_v19  }
 0x10c   :  { %3352 = vset.pattern.permute.xlu1 %v3521_v26 }
 0x10d   :  { %250 = vperm.xlu1 %3352, %v3702_v19  }
 0x111   :  { %3353 = vset.pattern.permute.xlu1 %v3522_v27 }
 0x112   :  { %273 = vperm.xlu1 %3353, %v3702_v19  }
 0x116   :  { %3354 = vset.pattern.permute.xlu1 %v3523_v28  ;;  %v3556_v28 = vmov 41  }
 0x117   :  { %297 = vperm.xlu1 %3354, %v3702_v19  }
 0x11b   :  { %3355 = vset.pattern.permute.xlu1 %v3524_v29 }
 0x11c   :  { %321 = vperm.xlu1 %3355, %v3702_v19  }
 0x120   :  { %3356 = vset.pattern.permute.xlu1 %v3525_v30 }
 0x121   :  { %345 = vperm.xlu1 %3356, %v3702_v19  }
 0x125   :  { %3357 = vset.pattern.permute.xlu1 %v3526_v31  ;;  %v3557_v31 = vmov 42  }
 0x126   :  { %368 = vperm.xlu1 %3357, %v3702_v19  }
 0x12a   :  { %3358 = vset.pattern.permute.xlu1 %v3527_v32 }
 0x12b   :  { %392 = vperm.xlu1 %3358, %v3702_v19  }
 0x12f   :  { %3359 = vset.pattern.permute.xlu1 %v3528_v33 }
 0x130   :  { %416 = vperm.xlu1 %3359, %v3702_v19  }
 0x134   :  { %3360 = vset.pattern.permute.xlu1 %v3529_v34 }
 0x135   :  { %440 = vperm.xlu1 %3360, %v3702_v19  }
 0x139   :  { %3361 = vset.pattern.permute.xlu1 %v3530_v35  ;;  %v3559_v35 = vmov 43  }
 0x13a   :  { %463 = vperm.xlu1 %3361, %v3702_v19  }
 0x13e   :  { %3362 = vset.pattern.permute.xlu1 %v3531_v36 }
 0x13f   :  { %487 = vperm.xlu1 %3362, %v3702_v19  }
 0x143   :  { %3363 = vset.pattern.permute.xlu1 %v3532_v37 }
 0x144   :  { %511 = vperm.xlu1 %3363, %v3702_v19  }
 0x148   :  { %3364 = vset.pattern.permute.xlu1 %v3533_v38  ;;  %v3560_v38 = vmov 44  }
 0x149   :  { %535 = vperm.xlu1 %3364, %v3702_v19  }
 0x14d   :  { %3365 = vset.pattern.permute.xlu1 %v3534_v39 }
 0x14e   :  { %558 = vperm.xlu1 %3365, %v3702_v19  }
 0x152   :  { %3366 = vset.pattern.permute.xlu1 %v3535_v40 }
 0x153   :  { %582 = vperm.xlu1 %3366, %v3702_v19  }
 0x157   :  { %3367 = vset.pattern.permute.xlu1 %v3536_v41  ;;  %v3561_v41 = vmov 45  }
 0x158   :  { %606 = vperm.xlu1 %3367, %v3702_v19  }
 0x15c   :  { %3368 = vset.pattern.permute.xlu1 %v3537_v42 }
 0x15d   :  { %630 = vperm.xlu1 %3368, %v3702_v19  }
 0x161   :  { %3369 = vset.pattern.permute.xlu1 %v3538_v43  ;;  %v105_v44 = vpop.permute.xlu0 %104 }
 0x162   :  { %108 = vst.msk [vmem:[#allocation2] sm:$0xff] %vm107_vm3, %v105_v44  ;;  %653 = vperm.xlu1 %3369, %v3702_v19   ;;  %vm1405_vm3 = vcmask 588800  }
 0x163   :  { %110 = vst.msk [vmem:[#allocation2 + $0x8] sm:$0xff] %vm109_vm4, %v105_v44  ;;  %v3562_v44 = vmov 46  }
 0x166   :  { %3370 = vset.pattern.permute.xlu1 %v3539_v45 }
 0x167   :  { %677 = vperm.xlu1 %3370, %v3702_v19  }
 0x169   :  { %v3750_v56 = vld [vmem:[#allocation2] sm:$0xff] }
 0x16b   :  { %3371 = vset.pattern.permute.xlu1 %v3540_v46 }
 0x16c   :  { %701 = vperm.xlu1 %3371, %v3702_v19  }
 0x16e   :  { %v3735_v47 = vpop.permute.xlu1 %125 }
 0x16f   :  { %6332 = vst [vmem:[#allocation6_spill] sm:$0xff] %v3735_v47 }
 0x170   :  { %3372 = vset.pattern.permute.xlu1 %v3541_v48 }
 0x171   :  { %725 = vperm.xlu1 %3372, %v3702_v19  }
 0x172   :  { %v3738_v49 = vpop.permute.xlu0 %114 }
 0x173   :  { %v3740_v50 = vpop.permute.xlu1 %135 }
 0x174   :  { %6333 = vst [vmem:[#allocation7_spill] sm:$0xff] %v3740_v50 }
 0x175   :  { %3373 = vset.pattern.permute.xlu1 %v3542_v51  ;;  %v3563_v51 = vmov 47  }
 0x176   :  { %748 = vperm.xlu1 %3373, %v3702_v19  }
 0x177   :  { %v3743_v52 = vpop.permute.xlu0 %155 }
 0x178   :  { %v3745_v53 = vpop.permute.xlu1 %145  ;;  %v160_v54 = vmul.f32 0.0, %v3743_v52 }
 0x179   :  { %6334 = vst [vmem:[#allocation8_spill] sm:$0xff] %v3745_v53 }
 0x17a   :  { %3374 = vset.pattern.permute.xlu1 %v3543_v55  ;;  %168 = vrot.lane.b32.xlu0 %v160_v54, %s3544_s1 }
 0x17b   :  { %772 = vperm.xlu1 %3374, %v3702_v19  }
 0x17d   :  { %v3752_v57 = vpop.permute.xlu1 %178 }
 0x17e   :  { %v181_v58 = vmul.f32 %v3752_v57, %v3750_v56  ;;  %v183_v61 = vmul.f32 0.0, %v3752_v57 }
 0x17f   :  { %3375 = vset.pattern.permute.xlu1 %v3545_v59 }
 0x180   :  { %796 = vperm.xlu1 %3375, %v3702_v19   ;;  %187 = vrot.lane.b32.xlu0 %v181_v58, %s3544_s1  ;;  %v3564_v58 = vmov 48  }
 0x182   :  { %v3758_v60 = vpop.permute.xlu1 %202 }
 0x183   :  { %v205_v63 = vmul.f32 %v3758_v60, %v3750_v56  ;;  %v207_v2 = vmul.f32 0.0, %v3758_v60 }
 0x184   :  { %3376 = vset.pattern.permute.xlu1 %v3546_v62  ;;  %191 = vrot.lane.b32.xlu0 %v183_v61, %s3544_s1  ;;  %v158_v62 = vmul.f32 %v3743_v52, %v3750_v56 }
 0x185   :  { %820 = vperm.xlu1 %3376, %v3702_v19  }
 0x187   :  { %v3765_v0 = vpop.permute.xlu1 %226 }
 0x188   :  { %211 = vrot.lane.b32.xlu0 %v205_v63, %s3544_s1  ;;  %v229_v5 = vmul.f32 %v3765_v0, %v3750_v56  ;;  %v231_v7 = vmul.f32 0.0, %v3765_v0  ;;  %v3869_v63 = vld [vmem:[#allocation2 + $0x8] sm:$0xff] }
 0x189   :  { %3377 = vset.pattern.permute.xlu1 %v3547_v1 }
 0x18a   :  { %843 = vperm.xlu1 %3377, %v3702_v19  }
 0x18c   :  { %v3770_v3 = vpop.permute.xlu1 %250  ;;  %215 = vrot.lane.b32.xlu0 %v207_v2, %s3544_s1  ;;  %v159_v2 = vmul.f32 %v3743_v52, %v3869_v63 }
 0x18d   :  { %v253_v10 = vmul.f32 %v3770_v3, %v3750_v56  ;;  %v255_v12 = vmul.f32 0.0, %v3770_v3 }
 0x18e   :  { %3378 = vset.pattern.permute.xlu1 %v3548_v4 }
 0x18f   :  { %867 = vperm.xlu1 %3378, %v3702_v19  }
 0x190   :  { %235 = vrot.lane.b32.xlu0 %v229_v5, %s3544_s1 }
 0x191   :  { %v3777_v6 = vpop.permute.xlu1 %273 }
 0x192   :  { %v276_v15 = vmul.f32 %v3777_v6, %v3750_v56  ;;  %v278_v18 = vmul.f32 0.0, %v3777_v6 }
 0x193   :  { %3379 = vset.pattern.permute.xlu1 %v3549_v8 }
 0x194   :  { %891 = vperm.xlu1 %3379, %v3702_v19   ;;  %239 = vrot.lane.b32.xlu0 %v231_v7, %s3544_s1  ;;  %v182_v7 = vmul.f32 %v3752_v57, %v3869_v63 }
 0x196   :  { %v3782_v9 = vpop.permute.xlu1 %297 }
 0x197   :  { %v300_v21 = vmul.f32 %v3782_v9, %v3750_v56  ;;  %v302_v24 = vmul.f32 0.0, %v3782_v9 }
 0x198   :  { %3380 = vset.pattern.permute.xlu1 %v3550_v11  ;;  %259 = vrot.lane.b32.xlu0 %v253_v10, %s3551_s17  ;;  %v206_v10 = vmul.f32 %v3758_v60, %v3869_v63  ;;  %v254_v60 = vmul.f32 %v3770_v3, %v3869_v63 }
 0x199   :  { %915 = vperm.xlu1 %3380, %v3702_v19  }
 0x19b   :  { %v3789_v13 = vpop.permute.xlu1 %321 }
 0x19c   :  { %263 = vrot.lane.b32.xlu0 %v255_v12, %s3551_s17  ;;  %v324_v26 = vmul.f32 %v3789_v13, %v3750_v56  ;;  %v326_v29 = vmul.f32 0.0, %v3789_v13  ;;  %v230_v12 = vmul.f32 %v3765_v0, %v3869_v63 }
 0x19d   :  { %3381 = vset.pattern.permute.xlu1 %v3552_v14 }
 0x19e   :  { %938 = vperm.xlu1 %3381, %v3702_v19  }
 0x1a0   :  { %v3795_v16 = vpop.permute.xlu1 %345  ;;  %282 = vrot.lane.b32.xlu0 %v276_v15, %s3551_s17 }
 0x1a1   :  { %v348_v32 = vmul.f32 %v3795_v16, %v3750_v56  ;;  %v350_v34 = vmul.f32 0.0, %v3795_v16 }
 0x1a2   :  { %3382 = vset.pattern.permute.xlu1 %v3553_v17 }
 0x1a3   :  { %962 = vperm.xlu1 %3382, %v3702_v19  }
 0x1a4   :  { %286 = vrot.lane.b32.xlu0 %v278_v18, %s3551_s17  ;;  %v277_v18 = vmul.f32 %v3777_v6, %v3869_v63 }
 0x1a5   :  { %v3801_v20 = vpop.permute.xlu1 %368 }
 0x1a6   :  { %v371_v37 = vmul.f32 %v3801_v20, %v3750_v56  ;;  %v373_v39 = vmul.f32 0.0, %v3801_v20 }
 0x1a7   :  { %3383 = vset.pattern.permute.xlu1 %v3554_v22 }
 0x1a8   :  { %986 = vperm.xlu1 %3383, %v3702_v19   ;;  %306 = vrot.lane.b32.xlu0 %v300_v21, %s3551_s17 }
 0x1aa   :  { %v3807_v23 = vpop.permute.xlu1 %392 }
 0x1ab   :  { %v395_v42 = vmul.f32 %v3807_v23, %v3750_v56  ;;  %v397_v45 = vmul.f32 0.0, %v3807_v23 }
 0x1ac   :  { %3384 = vset.pattern.permute.xlu1 %v3555_v25  ;;  %310 = vrot.lane.b32.xlu0 %v302_v24, %s3551_s17  ;;  %v301_v24 = vmul.f32 %v3782_v9, %v3869_v63 }
 0x1ad   :  { %1010 = vperm.xlu1 %3384, %v3702_v19  }
 0x1af   :  { %v3814_v27 = vpop.permute.xlu1 %416 }
 0x1b0   :  { %330 = vrot.lane.b32.xlu0 %v324_v26, %s3551_s17  ;;  %v419_v48 = vmul.f32 %v3814_v27, %v3750_v56  ;;  %v421_v55 = vmul.f32 0.0, %v3814_v27 }
 0x1b1   :  { %3385 = vset.pattern.permute.xlu1 %v3556_v28  ;;  %v325_v28 = vmul.f32 %v3789_v13, %v3869_v63 }
 0x1b2   :  { %1033 = vperm.xlu1 %3385, %v3702_v19  }
 0x1b4   :  { %v3819_v30 = vpop.permute.xlu1 %440  ;;  %334 = vrot.lane.b32.xlu0 %v326_v29, %s3551_s17 }
 0x1b5   :  { %v443_v59 = vmul.f32 %v3819_v30, %v3750_v56  ;;  %v445_v1 = vmul.f32 0.0, %v3819_v30 }
 0x1b6   :  { %3386 = vset.pattern.permute.xlu1 %v3557_v31 }
 0x1b7   :  { %1057 = vperm.xlu1 %3386, %v3702_v19  }
 0x1b8   :  { %354 = vrot.lane.b32.xlu0 %v348_v32, %s3558_s18  ;;  %v349_v32 = vmul.f32 %v3795_v16, %v3869_v63 }
 0x1b9   :  { %v3826_v33 = vpop.permute.xlu1 %463 }
 0x1ba   :  { %v466_v5 = vmul.f32 %v3826_v33, %v3750_v56  ;;  %v468_v52 = vmul.f32 0.0, %v3826_v33 }
 0x1bb   :  { %3387 = vset.pattern.permute.xlu1 %v3559_v35  ;;  %v372_v35 = vmul.f32 %v3801_v20, %v3869_v63 }
 0x1bc   :  { %1081 = vperm.xlu1 %3387, %v3702_v19   ;;  %358 = vrot.lane.b32.xlu0 %v350_v34, %s3558_s18 }
 0x1be   :  { %v3831_v36 = vpop.permute.xlu1 %487 }
 0x1bf   :  { %v490_v57 = vmul.f32 %v3831_v36, %v3750_v56  ;;  %v492_v14 = vmul.f32 0.0, %v3831_v36 }
 0x1c0   :  { %3388 = vset.pattern.permute.xlu1 %v3560_v38  ;;  %377 = vrot.lane.b32.xlu0 %v371_v37, %s3558_s18 }
 0x1c1   :  { %1105 = vperm.xlu1 %3388, %v3702_v19  }
 0x1c3   :  { %v3838_v40 = vpop.permute.xlu1 %511 }
 0x1c4   :  { %381 = vrot.lane.b32.xlu0 %v373_v39, %s3558_s18  ;;  %v514_v0 = vmul.f32 %v3838_v40, %v3750_v56  ;;  %v516_v22 = vmul.f32 0.0, %v3838_v40  ;;  %v396_v39 = vmul.f32 %v3807_v23, %v3869_v63 }
 0x1c5   :  { %3389 = vset.pattern.permute.xlu1 %v3561_v41 }
 0x1c6   :  { %1128 = vperm.xlu1 %3389, %v3702_v19  }
 0x1c8   :  { %v3844_v43 = vpop.permute.xlu1 %535  ;;  %401 = vrot.lane.b32.xlu0 %v395_v42, %s3558_s18 }
 0x1c9   :  { %v538_v26 = vmul.f32 %v3844_v43, %v3750_v56  ;;  %v540_v31 = vmul.f32 0.0, %v3844_v43 }
 0x1ca   :  { %3390 = vset.pattern.permute.xlu1 %v3562_v44  ;;  %v420_v44 = vmul.f32 %v3814_v27, %v3869_v63 }
 0x1cb   :  { %1152 = vperm.xlu1 %3390, %v3702_v19  }
 0x1cc   :  { %405 = vrot.lane.b32.xlu0 %v397_v45, %s3558_s18 }
 0x1cd   :  { %v3850_v46 = vpop.permute.xlu1 %558 }
 0x1ce   :  { %v561_v13 = vmul.f32 %v3850_v46, %v3750_v56  ;;  %v563_v16 = vmul.f32 0.0, %v3850_v46 }
 0x1cf   :  { %3391 = vset.pattern.permute.xlu1 %v3563_v51  ;;  %v444_v51 = vmul.f32 %v3819_v30, %v3869_v63 }
 0x1d0   :  { %1176 = vperm.xlu1 %3391, %v3702_v19   ;;  %425 = vrot.lane.b32.xlu0 %v419_v48, %s3558_s18 }
 0x1d2   :  { %v3856_v54 = vpop.permute.xlu1 %582 }
 0x1d3   :  { %v585_v42 = vmul.f32 %v3856_v54, %v3750_v56  ;;  %v587_v48 = vmul.f32 0.0, %v3856_v54 }
 0x1d4   :  { %3392 = vset.pattern.permute.xlu1 %v3564_v58  ;;  %429 = vrot.lane.b32.xlu0 %v421_v55, %s3558_s18 }
 0x1d5   :  { %1200 = vperm.xlu1 %3392, %v3702_v19  }
 0x1d7   :  { %v3863_v61 = vpop.permute.xlu1 %606 }
 0x1d8   :  { %449 = vrot.lane.b32.xlu0 %v443_v59, %s3565_s19  ;;  %v609_v58 = vmul.f32 %v3863_v61, %v3750_v56  ;;  %v467_v59 = vmul.f32 %v3826_v33, %v3869_v63 }
 0x1d9   :  { %164 = vrot.lane.b32.xlu1 %v158_v62, %s3544_s1  ;;  %v3567_v62 = vmov 49  }
 0x1da   :  { %3393 = vset.pattern.permute.xlu1 %v3567_v62 }
 0x1dc   :  { %v3874_v4 = vpop.permute.xlu1 %630  ;;  %453 = vrot.lane.b32.xlu0 %v445_v1, %s3565_s19  ;;  %v611_v1 = vmul.f32 0.0, %v3863_v61 }
 0x1dd   :  { %166 = vrot.lane.b32.xlu1 %v159_v2, %s3544_s1  ;;  %v491_v2 = vmul.f32 %v3831_v36, %v3869_v63 }
 0x1e0   :  { %472 = vrot.lane.b32.xlu0 %v466_v5, %s3565_s19 }
 0x1e1   :  { %v3883_v8 = vpop.permute.xlu1 %653  ;;  %189 = vrot.lane.b32.xlu1 %v182_v7, %s3544_s1  ;;  %v633_v7 = vmul.f32 %v3874_v4, %v3750_v56 }
 0x1e4   :  { %476 = vrot.lane.b32.xlu0 %v468_v52, %s3565_s19  ;;  %v515_v52 = vmul.f32 %v3838_v40, %v3869_v63 }
 0x1e5   :  { %213 = vrot.lane.b32.xlu1 %v206_v10, %s3544_s1 }
 0x1e6   :  { %v3891_v11 = vpop.permute.xlu1 %677 }
 0x1e8   :  { %496 = vrot.lane.b32.xlu0 %v490_v57, %s3565_s19  ;;  %v635_v57 = vmul.f32 0.0, %v3874_v4 }
 0x1e9   :  { %237 = vrot.lane.b32.xlu1 %v230_v12, %s3544_s1  ;;  %v539_v12 = vmul.f32 %v3844_v43, %v3869_v63  ;;  %s3671_s1 = smov 127  }
 0x1eb   :  { %v3902_v15 = vpop.permute.xlu1 %701 }
 0x1ec   :  { %500 = vrot.lane.b32.xlu0 %v492_v14, %s3565_s19  ;;  %v3906_v17 = vpop.permute.xlu0 %168 }
 0x1ed   :  { %261 = vrot.lane.b32.xlu1 %v254_v60, %s3551_s17  ;;  %v656_v60 = vmul.f32 %v3883_v8, %v3750_v56 }
 0x1f0   :  { %v3912_v21 = vpop.permute.xlu1 %725  ;;  %520 = vrot.lane.b32.xlu0 %v514_v0, %s3565_s19  ;;  %v562_v0 = vmul.f32 %v3850_v46, %v3869_v63  ;;  %v680_v46 = vmul.f32 %v3891_v11, %v3750_v56 }
 0x1f1   :  { %284 = vrot.lane.b32.xlu1 %v277_v18, %s3551_s17 }
 0x1f2   :  { %v3916_v3 = vpop.permute.xlu0 %187 }
 0x1f4   :  { %524 = vrot.lane.b32.xlu0 %v516_v22, %s3565_s19  ;;  %v658_v22 = vmul.f32 0.0, %v3883_v8 }
 0x1f5   :  { %v3922_v25 = vpop.permute.xlu1 %748  ;;  %308 = vrot.lane.b32.xlu1 %v301_v24, %s3551_s17  ;;  %v586_v24 = vmul.f32 %v3856_v54, %v3869_v63  ;;  %v682_v54 = vmul.f32 0.0, %v3891_v11 }
 0x1f6   :  { %v3925_v6 = vpop.permute.xlu0 %191 }
 0x1f7   :  { %6335 = vst [vmem:[#allocation9_spill] sm:$0xff] %v3925_v6 }
 0x1f8   :  { %544 = vrot.lane.b32.xlu0 %v538_v26, %s3566_s20 }
 0x1f9   :  { %332 = vrot.lane.b32.xlu1 %v325_v28, %s3551_s17  ;;  %v610_v28 = vmul.f32 %v3863_v61, %v3869_v63  ;;  %s3672_s17 = smov 126  }
 0x1fa   :  { %v3933_v9 = vpop.permute.xlu1 %772  ;;  %v3935_v29 = vpop.permute.xlu0 %211 }
 0x1fc   :  { %548 = vrot.lane.b32.xlu0 %v540_v31, %s3566_s20 }
 0x1fd   :  { %356 = vrot.lane.b32.xlu1 %v349_v32, %s3558_s18 }
 0x1fe   :  { %v3942_v34 = vpop.permute.xlu0 %215 }
 0x1ff   :  { %6336 = vst [vmem:[#allocation10_spill] sm:$0xff] %v3942_v34  ;;  %v3948_v37 = vpop.permute.xlu1 %796 }
 0x200   :  { %567 = vrot.lane.b32.xlu0 %v561_v13, %s3566_s20  ;;  %v634_v13 = vmul.f32 %v3874_v4, %v3869_v63  ;;  %v706_v4 = vmul.f32 0.0, %v3902_v15 }
 0x201   :  { %379 = vrot.lane.b32.xlu1 %v372_v35, %s3558_s18 }
 0x202   :  { %v3952_v38 = vpop.permute.xlu0 %235 }
 0x203   :  { %6337 = vst [vmem:[#allocation11_spill] sm:$0xff] %v3952_v38 }
 0x204   :  { %v3957_v41 = vpop.permute.xlu1 %820  ;;  %571 = vrot.lane.b32.xlu0 %v563_v16, %s3566_s20  ;;  %v704_v16 = vmul.f32 %v3902_v15, %v3750_v56 }
 0x205   :  { %403 = vrot.lane.b32.xlu1 %v396_v39, %s3558_s18  ;;  %v657_v39 = vmul.f32 %v3883_v8, %v3869_v63  ;;  %v728_v8 = vmul.f32 %v3912_v21, %v3750_v56 }
 0x206   :  { %v3961_v20 = vpop.permute.xlu0 %239 }
 0x207   :  { %6338 = vst [vmem:[#allocation12_spill] sm:$0xff] %v3961_v20 }
 0x208   :  { %591 = vrot.lane.b32.xlu0 %v585_v42, %s3566_s20 }
 0x209   :  { %v3968_v45 = vpop.permute.xlu1 %843  ;;  %427 = vrot.lane.b32.xlu1 %v420_v44, %s3558_s18  ;;  %s3673_s18 = smov [#allocation3]  }
 0x20a   :  { %v3971_v23 = vpop.permute.xlu0 %259 }
 0x20c   :  { %595 = vrot.lane.b32.xlu0 %v587_v48, %s3566_s20  ;;  %v681_v48 = vmul.f32 %v3891_v11, %v3869_v63  ;;  %v730_v11 = vmul.f32 0.0, %v3912_v21 }
 0x20d   :  { %451 = vrot.lane.b32.xlu1 %v444_v51, %s3565_s19 }
 0x20e   :  { %v3978_v55 = vpop.permute.xlu1 %867  ;;  %v3980_v27 = vpop.permute.xlu0 %263 }
 0x210   :  { %615 = vrot.lane.b32.xlu0 %v609_v58, %s3566_s20 }
 0x211   :  { %474 = vrot.lane.b32.xlu1 %v467_v59, %s3565_s19  ;;  %v705_v59 = vmul.f32 %v3902_v15, %v3869_v63  ;;  %v751_v15 = vmul.f32 %v3922_v25, %v3750_v56 }
 0x212   :  { %v3988_v30 = vpop.permute.xlu0 %282 }
 0x213   :  { %v3993_v5 = vpop.permute.xlu1 %891 }
 0x214   :  { %619 = vrot.lane.b32.xlu0 %v611_v1, %s3566_s20  ;;  %v729_v1 = vmul.f32 %v3912_v21, %v3869_v63  ;;  %v753_v21 = vmul.f32 0.0, %v3922_v25 }
 0x215   :  { %498 = vrot.lane.b32.xlu1 %v491_v2, %s3565_s19 }
 0x216   :  { %v3997_v33 = vpop.permute.xlu0 %286 }
 0x217   :  { %6339 = vst [vmem:[#allocation13_spill] sm:$0xff] %v3997_v33 }
 0x218   :  { %v4003_v10 = vpop.permute.xlu1 %915  ;;  %639 = vrot.lane.b32.xlu0 %v633_v7, %s3568_s21 }
 0x219   :  { %522 = vrot.lane.b32.xlu1 %v515_v52, %s3565_s19  ;;  %v752_v52 = vmul.f32 %v3922_v25, %v3869_v63  ;;  %v777_v25 = vmul.f32 0.0, %v3933_v9  ;;  %s3154_s19 = sshll.u32 %s3673_s18, 4  ;;  %s3155_s19 = int_to_ptr.vmem [resolvable:$true] %s3154_s19 }
 0x21a   :  { %v4007_v36 = vpop.permute.xlu0 %306  ;;  %p3490_p1 = scmp.lt.s32.totalorder %s3155_s19, %s3155_s19 }
 0x21c   :  { %643 = vrot.lane.b32.xlu0 %v635_v57, %s3568_s21 }
 0x21d   :  { %v4013_v14 = vpop.permute.xlu1 %938  ;;  %546 = vrot.lane.b32.xlu1 %v539_v12, %s3566_s20 }
 0x21e   :  { %v4016_v40 = vpop.permute.xlu0 %310 }
 0x21f   :  { %6340 = vst [vmem:[#allocation14_spill] sm:$0xff] %v4016_v40 }
 0x220   :  { %662 = vrot.lane.b32.xlu0 %v656_v60, %s3568_s21  ;;  %v776_v60 = vmul.f32 %v3933_v9, %v3869_v63 }
 0x221   :  { %569 = vrot.lane.b32.xlu1 %v562_v0, %s3566_s20 }
 0x222   :  { %v4024_v18 = vpop.permute.xlu1 %962  ;;  %v4026_v43 = vpop.permute.xlu0 %330 }
 0x223   :  { %6341 = vst [vmem:[#allocation15_spill] sm:$0xff] %v4026_v43 }
 0x224   :  { %666 = vrot.lane.b32.xlu0 %v658_v22, %s3568_s21  ;;  %v775_v22 = vmul.f32 %v3933_v9, %v3750_v56  ;;  %v847_v9 = vmul.f32 %v3968_v45, %v3869_v63 }
 0x225   :  { %593 = vrot.lane.b32.xlu1 %v586_v24, %s3566_s20 }
 0x226   :  { %v4033_v26 = vpop.permute.xlu0 %334 }
 0x227   :  { %6342 = vst [vmem:[#allocation16_spill] sm:$0xff] %v4033_v26  ;;  %v4039_v31 = vpop.permute.xlu1 %986 }
 0x228   :  { %686 = vrot.lane.b32.xlu0 %v680_v46, %s3568_s21  ;;  %v800_v46 = vmul.f32 %v3948_v37, %v3869_v63 }
 0x229   :  { %617 = vrot.lane.b32.xlu1 %v610_v28, %s3566_s20  ;;  %s3485_s20 = scalar_lea.vmem %s3155_s19, 256 }
 0x22a   :  { %v4043_v32 = vpop.permute.xlu0 %354  ;;  %p3486_p0 = scmp.ne.s32.totalorder %s3155_s19, %s3485_s20  ;;  %p3491_p2 = scmp.lt.s32.totalorder %s3485_s20, %s3485_s20 }
 0x22c   :  { %v4048_v35 = vpop.permute.xlu1 %1010  ;;  %690 = vrot.lane.b32.xlu0 %v682_v54, %s3568_s21  ;;  %p3492_p3 = por %p3491_p2, %p3490_p1 }
 0x22d   :  { %641 = vrot.lane.b32.xlu1 %v634_v13, %s3568_s21  ;;  %v824_v13 = vmul.f32 %v3957_v41, %v3869_v63 }
 0x22e   :  { %v4052_v61 = vpop.permute.xlu0 %358  ;;  %p3493_p4 = pnand %p3492_p3, %p3486_p0 }
 0x230   :  { %710 = vrot.lane.b32.xlu0 %v704_v16, %s3568_s21  ;;  %v799_v16 = vmul.f32 %v3948_v37, %v3750_v56 }
 0x231   :  { %v4059_v42 = vpop.permute.xlu1 %1033  ;;  %664 = vrot.lane.b32.xlu1 %v657_v39, %s3568_s21 }
 0x232   :  { %v4063_v44 = vpop.permute.xlu0 %377 }
 0x234   :  { %714 = vrot.lane.b32.xlu0 %v706_v4, %s3568_s21 }
 0x235   :  { %688 = vrot.lane.b32.xlu1 %v681_v48, %s3568_s21  ;;  %v801_v48 = vmul.f32 0.0, %v3948_v37 }
 0x236   :  { %v4071_v51 = vpop.permute.xlu1 %1057  ;;  %v4073_v58 = vpop.permute.xlu0 %381 }
 0x237   :  { %6343 = vst [vmem:[#allocation17_spill] sm:$0xff] %v4073_v58 }
 0x238   :  { %734 = vrot.lane.b32.xlu0 %v728_v8, %s3569_s22 }
 0x239   :  { %712 = vrot.lane.b32.xlu1 %v705_v59, %s3568_s21  ;;  %v871_v59 = vmul.f32 %v3978_v55, %v3869_v63 }
 0x23a   :  { %v4080_v62 = vpop.permute.xlu0 %401 }
 0x23b   :  { %v4084_v2 = vpop.permute.xlu1 %1081 }
 0x23c   :  { %738 = vrot.lane.b32.xlu0 %v730_v11, %s3569_s22 }
 0x23d   :  { %736 = vrot.lane.b32.xlu1 %v729_v1, %s3569_s22  ;;  %v823_v1 = vmul.f32 %v3957_v41, %v3750_v56 }
 0x23e   :  { %v4090_v7 = vpop.permute.xlu0 %405 }
 0x23f   :  { %6344 = vst [vmem:[#allocation18_spill] sm:$0xff] %v4090_v7 }
 0x240   :  { %v4094_v57 = vpop.permute.xlu1 %1105  ;;  %757 = vrot.lane.b32.xlu0 %v751_v15, %s3569_s22 }
 0x241   :  { %759 = vrot.lane.b32.xlu1 %v752_v52, %s3569_s22  ;;  %v895_v52 = vmul.f32 %v3993_v5, %v3869_v63 }
 0x242   :  { %v4099_v12 = vpop.permute.xlu0 %425 }
 0x243   :  { %6345 = vst [vmem:[#allocation19_spill] sm:$0xff] %v4099_v12 }
 0x244   :  { %761 = vrot.lane.b32.xlu0 %v753_v21, %s3569_s22  ;;  %v825_v21 = vmul.f32 0.0, %v3957_v41 }
 0x245   :  { %v4104_v0 = vpop.permute.xlu1 %1128  ;;  %783 = vrot.lane.b32.xlu1 %v776_v60, %s3569_s22 }
 0x246   :  { %v4109_v24 = vpop.permute.xlu0 %429 }
 0x247   :  { %6346 = vst [vmem:[#allocation20_spill] sm:$0xff] %v4109_v24 }
 0x248   :  { %781 = vrot.lane.b32.xlu0 %v775_v22, %s3569_s22  ;;  %v919_v22 = vmul.f32 %v4003_v10, %v3869_v63 }
 0x249   :  { %807 = vrot.lane.b32.xlu1 %v800_v46, %s3569_s22 }
 0x24a   :  { %v4116_v28 = vpop.permute.xlu1 %1152  ;;  %v4118_v54 = vpop.permute.xlu0 %449 }
 0x24c   :  { %785 = vrot.lane.b32.xlu0 %v777_v25, %s3569_s22  ;;  %v846_v25 = vmul.f32 %v3968_v45, %v3750_v56 }
 0x24d   :  { %831 = vrot.lane.b32.xlu1 %v824_v13, %s3570_s23 }
 0x24e   :  { %v4126_v39 = vpop.permute.xlu0 %453 }
 0x24f   :  { %v4130_v4 = vpop.permute.xlu1 %1176 }
 0x250   :  { %805 = vrot.lane.b32.xlu0 %v799_v16, %s3569_s22  ;;  %v942_v16 = vmul.f32 %v4013_v14, %v3869_v63 }
 0x251   :  { %854 = vrot.lane.b32.xlu1 %v847_v9, %s3570_s23  ;;  %v848_v9 = vmul.f32 0.0, %v3968_v45 }
 0x252   :  { %v4135_v8 = vpop.permute.xlu0 %472 }
 0x254   :  { %v4139_v11 = vpop.permute.xlu1 %1200  ;;  %809 = vrot.lane.b32.xlu0 %v801_v48, %s3569_s22 }
 0x255   :  { %878 = vrot.lane.b32.xlu1 %v871_v59, %s3570_s23  ;;  %v966_v59 = vmul.f32 %v4024_v18, %v3869_v63 }
 0x256   :  { %v4145_v15 = vpop.permute.xlu0 %476 }
 0x257   :  { %6347 = vst [vmem:[#allocation21_spill] sm:$0xff] %v4145_v15 }
 0x258   :  { %829 = vrot.lane.b32.xlu0 %v823_v1, %s3570_s23  ;;  %v165_v37 = vpop.permute.xlu1 %164 }
 0x259   :  { %902 = vrot.lane.b32.xlu1 %v895_v52, %s3570_s23  ;;  %v870_v52 = vmul.f32 %v3978_v55, %v3750_v56 }
 0x25a   :  { %v4152_v60 = vpop.permute.xlu0 %496 }
 0x25c   :  { %833 = vrot.lane.b32.xlu0 %v825_v21, %s3570_s23  ;;  %v167_v46 = vpop.permute.xlu1 %166 }
 0x25d   :  { %926 = vrot.lane.b32.xlu1 %v919_v22, %s3571_s24  ;;  %v990_v22 = vmul.f32 %v4039_v31, %v3869_v63 }
 0x25e   :  { %v4160_v13 = vpop.permute.xlu0 %500 }
 0x25f   :  { %6348 = vst [vmem:[#allocation22_spill] sm:$0xff] %v4160_v13 }
 0x260   :  { %852 = vrot.lane.b32.xlu0 %v846_v25, %s3570_s23  ;;  %v190_v41 = vpop.permute.xlu1 %189  ;;  %v171_v25 = vsel %vm170_vm5, %v165_v37, %v167_v46  ;;  %v128_v37 = vmul.f32 %v3735_v47, %v3750_v56 }
 0x261   :  { %949 = vrot.lane.b32.xlu1 %v942_v16, %s3571_s24  ;;  %v172_v16 = vsel %vm170_vm5, %v167_v46, %v3906_v17 }
 0x262   :  { %v4167_v48 = vpop.permute.xlu0 %520 }
 0x263   :  { %6349 = vst [vmem:[#allocation23_spill] sm:$0xff] %v4167_v48  ;;  %v193_v48 = vsel %vm170_vm5, %v3916_v3, %v190_v41 }
 0x264   :  { %856 = vrot.lane.b32.xlu0 %v848_v9, %s3570_s23  ;;  %v214_v1 = vpop.permute.xlu1 %213  ;;  %v117_v9 = vmul.f32 %v3750_v56, %v3738_v49 }
 0x265   :  { %973 = vrot.lane.b32.xlu1 %v966_v59, %s3571_s24  ;;  %v118_v59 = vmul.f32 %v3869_v63, %v3738_v49  ;;  %v194_v49 = vsel %vm170_vm5, %v190_v41, %v3925_v6  ;;  %v1037_v41 = vmul.f32 %v4059_v42, %v3869_v63 }
 0x266   :  { %v4175_v21 = vpop.permute.xlu0 %524  ;;  %v175_v17 = vadd.f32 %v171_v25, %v117_v9  ;;  %v129_v25 = vmul.f32 %v3735_v47, %v3869_v63 }
 0x267   :  { %6350 = vst [vmem:[#allocation24_spill] sm:$0xff] %v4175_v21  ;;  %v872_v21 = vmul.f32 0.0, %v3978_v55  ;;  %v176_v46 = vadd.f32 %v172_v16, %v118_v59 }
 0x268   :  { %876 = vrot.lane.b32.xlu0 %v870_v52, %s3570_s23  ;;  %v4180_v45 = vpop.permute.xlu1 %237  ;;  %v1014_v52 = vmul.f32 %v4048_v35, %v3869_v63  ;;  %v199_v59 = vadd.f32 %v194_v49, %v129_v25 }
 0x269   :  { %6351 = vst [vmem:[#allocation25_spill] sm:$0xff] %v4180_v45  ;;  %997 = vrot.lane.b32.xlu1 %v990_v22, %s3571_s24 }
 0x26a   :  { %v4191_v24 = vpop.permute.xlu0 %544 }
 0x26c   :  { %880 = vrot.lane.b32.xlu0 %v872_v21, %s3570_s23  ;;  %v262_v22 = vpop.permute.xlu1 %261  ;;  %v894_v21 = vmul.f32 %v3993_v5, %v3750_v56 }
 0x26d   :  { %v266_v55 = vsel %vm6308_vm6, %v3971_v23, %v262_v22  ;;  %v267_v26 = vsel %vm6308_vm6, %v262_v22, %v3980_v27  ;;  %1021 = vrot.lane.b32.xlu1 %v1014_v52, %s3572_s25  ;;  %v138_v23 = vmul.f32 %v3740_v50, %v3750_v56  ;;  %v198_v27 = vadd.f32 %v193_v48, %v128_v37 }
 0x26e   :  { %v270_v16 = vadd.f32 %v266_v55, %v175_v17  ;;  %v271_v3 = vadd.f32 %v267_v26, %v176_v46  ;;  %v4211_v9 = vpop.permute.xlu0 %548  ;;  %v217_v22 = vsel %vm170_vm5, %v3935_v29, %v214_v1  ;;  %v218_v17 = vsel %vm170_vm5, %v214_v1, %v3942_v34 }
 0x26f   :  { %v139_v48 = vmul.f32 %v3740_v50, %v3869_v63  ;;  %v896_v37 = vmul.f32 0.0, %v3993_v5  ;;  %v1061_v29 = vmul.f32 %v4071_v51, %v3869_v63  ;;  %v222_v1 = vadd.f32 %v217_v22, %v138_v23 }
 0x270   :  { %900 = vrot.lane.b32.xlu0 %v894_v21, %s3570_s23  ;;  %v285_v52 = vpop.permute.xlu1 %284  ;;  %v918_v5 = vmul.f32 %v4003_v10, %v3750_v56  ;;  %v1085_v23 = vmul.f32 %v4084_v2, %v3869_v63 }
 0x271   :  { %v288_v26 = vsel %vm6308_vm6, %v3988_v30, %v285_v52  ;;  %v289_v46 = vsel %vm6308_vm6, %v285_v52, %v3997_v33  ;;  %1044 = vrot.lane.b32.xlu1 %v1037_v41, %s3572_s25  ;;  %v223_v21 = vadd.f32 %v218_v17, %v139_v48  ;;  %v1109_v48 = vmul.f32 %v4094_v57, %v3869_v63 }
 0x272   :  { %v293_v49 = vadd.f32 %v288_v26, %v198_v27  ;;  %v294_v55 = vadd.f32 %v289_v46, %v199_v59  ;;  %v4230_v25 = vpop.permute.xlu0 %567 }
 0x274   :  { %904 = vrot.lane.b32.xlu0 %v896_v37, %s3570_s23  ;;  %v309_v30 = vpop.permute.xlu1 %308 }
 0x275   :  { %v312_v41 = vsel %vm6308_vm6, %v4007_v36, %v309_v30  ;;  %v313_v52 = vsel %vm6308_vm6, %v309_v30, %v4016_v40  ;;  %1068 = vrot.lane.b32.xlu1 %v1061_v29, %s3572_s25  ;;  %v4250_v36 = vld [vmem:[#allocation2 + $0x10] sm:$0xff]  ;;  %vm6316_vm6 = vcmask 228352  }
 0x276   :  { %v317_v27 = vadd.f32 %v312_v41, %v222_v1  ;;  %v318_v59 = vadd.f32 %v313_v52, %v223_v21  ;;  %v4242_v26 = vpop.permute.xlu0 %571  ;;  %v920_v17 = vmul.f32 %v4250_v36, %v4003_v10  ;;  %v941_v10 = vmul.f32 %v4013_v14, %v3750_v56 }
 0x277   :  { %6352 = vst [vmem:[#allocation26_spill] sm:$0xff] %v4242_v26  ;;  %v1132_v52 = vmul.f32 %v4104_v0, %v3869_v63 }
 0x278   :  { %924 = vrot.lane.b32.xlu0 %v918_v5, %s3571_s24  ;;  %v4247_v22 = vpop.permute.xlu1 %332 }
 0x279   :  { %6353 = vst [vmem:[#allocation27_spill] sm:$0xff] %v4247_v22  ;;  %1092 = vrot.lane.b32.xlu1 %v1085_v23, %s3572_s25 }
 0x27a   :  { %v4254_v46 = vpop.permute.xlu0 %591 }
 0x27c   :  { %928 = vrot.lane.b32.xlu0 %v920_v17, %s3571_s24  ;;  %v357_v37 = vpop.permute.xlu1 %356 }
 0x27d   :  { %v361_v29 = vsel %vm6307_vm7, %v4043_v32, %v357_v37  ;;  %v362_v1 = vsel %vm6307_vm7, %v357_v37, %v4052_v61  ;;  %1116 = vrot.lane.b32.xlu1 %v1109_v48, %s3573_s26  ;;  %v1156_v48 = vmul.f32 %v4116_v28, %v3869_v63 }
 0x27e   :  { %v365_v21 = vadd.f32 %v361_v29, %v270_v16  ;;  %v366_v30 = vadd.f32 %v362_v1, %v271_v3  ;;  %v4266_v41 = vpop.permute.xlu0 %595  ;;  %v943_v16 = vmul.f32 %v4250_v36, %v4013_v14  ;;  %v965_v14 = vmul.f32 %v4024_v18, %v3750_v56 }
 0x27f   :  { %6354 = vst [vmem:[#allocation28_spill] sm:$0xff] %v4266_v41 }
 0x280   :  { %947 = vrot.lane.b32.xlu0 %v941_v10, %s3571_s24  ;;  %v380_v5 = vpop.permute.xlu1 %379  ;;  %v1180_v10 = vmul.f32 %v4130_v4, %v3869_v63 }
 0x281   :  { %v383_v32 = vsel %vm6307_vm7, %v4063_v44, %v380_v5  ;;  %v384_v61 = vsel %vm6307_vm7, %v380_v5, %v4073_v58  ;;  %1139 = vrot.lane.b32.xlu1 %v1132_v52, %s3573_s26 }
 0x282   :  { %v388_v3 = vadd.f32 %v383_v32, %v293_v49  ;;  %v389_v23 = vadd.f32 %v384_v61, %v294_v55  ;;  %v4278_v17 = vpop.permute.xlu0 %615 }
 0x283   :  { %6355 = vst [vmem:[#allocation29_spill] sm:$0xff] %v4278_v17 }
 0x284   :  { %951 = vrot.lane.b32.xlu0 %v943_v16, %s3571_s24  ;;  %v404_v37 = vpop.permute.xlu1 %403 }
 0x285   :  { %v407_v44 = vsel %vm6307_vm7, %v4080_v62, %v404_v37  ;;  %v408_v29 = vsel %vm6307_vm7, %v404_v37, %v4090_v7  ;;  %1163 = vrot.lane.b32.xlu1 %v1156_v48, %s3573_s26  ;;  %v967_v62 = vmul.f32 %v4250_v36, %v4024_v18  ;;  %v989_v18 = vmul.f32 %v4039_v31, %v3750_v56 }
 0x286   :  { %v412_v49 = vadd.f32 %v407_v44, %v317_v27  ;;  %v413_v55 = vadd.f32 %v408_v29, %v318_v59  ;;  %v4290_v1 = vpop.permute.xlu0 %619  ;;  %v1204_v27 = vmul.f32 %v4139_v11, %v3869_v63  ;;  %vm6325_vm7 = vcmask 261120  }
 0x287   :  { %6356 = vst [vmem:[#allocation30_spill] sm:$0xff] %v4290_v1 }
 0x288   :  { %971 = vrot.lane.b32.xlu0 %v965_v14, %s3571_s24  ;;  %v4295_v52 = vpop.permute.xlu1 %427 }
 0x289   :  { %6357 = vst [vmem:[#allocation31_spill] sm:$0xff] %v4295_v52  ;;  %1187 = vrot.lane.b32.xlu1 %v1180_v10, %s3573_s26 }
 0x28a   :  { %v4300_v5 = vpop.permute.xlu0 %639 }
 0x28c   :  { %975 = vrot.lane.b32.xlu0 %v967_v62, %s3571_s24  ;;  %v452_v59 = vpop.permute.xlu1 %451 }
 0x28d   :  { %v456_v32 = vsel %vm6306_vm8, %v4118_v54, %v452_v59  ;;  %v457_v61 = vsel %vm6306_vm8, %v452_v59, %v4126_v39  ;;  %1211 = vrot.lane.b32.xlu1 %v1204_v27, %s3574_s27  ;;  %v991_v39 = vmul.f32 %v4250_v36, %v4039_v31  ;;  %v1013_v27 = vmul.f32 %v4048_v35, %v3750_v56 }
 0x28e   :  { %v460_v16 = vadd.f32 %v456_v32, %v365_v21  ;;  %v461_v48 = vadd.f32 %v457_v61, %v366_v30  ;;  %v644_v37 = vpop.permute.xlu0 %643  ;;  %v3575_v31 = vmov 50  }
 0x290   :  { %995 = vrot.lane.b32.xlu0 %v989_v18, %s3571_s24  ;;  %v475_v44 = vpop.permute.xlu1 %474 }
 0x291   :  { %v478_v29 = vsel %vm6306_vm8, %v4135_v8, %v475_v44  ;;  %v479_v54 = vsel %vm6306_vm8, %v475_v44, %v4145_v15  ;;  %1223 = vperm.xlu1 %3393, %v3702_v19   ;;  %v1036_v44 = vmul.f32 %v4059_v42, %v3750_v56 }
 0x292   :  { %v483_v14 = vadd.f32 %v478_v29, %v388_v3  ;;  %v484_v10 = vadd.f32 %v479_v54, %v389_v23  ;;  %v663_v62 = vpop.permute.xlu0 %662  ;;  %v1015_v23 = vmul.f32 %v4250_v36, %v4048_v35 }
 0x294   :  { %999 = vrot.lane.b32.xlu0 %v991_v39, %s3571_s24  ;;  %v499_v21 = vpop.permute.xlu1 %498 }
 0x295   :  { %v502_v30 = vsel %vm6306_vm8, %v4152_v60, %v499_v21  ;;  %v503_v8 = vsel %vm6306_vm8, %v499_v21, %v4160_v13  ;;  %3394 = vset.pattern.permute.xlu1 %v3575_v31  ;;  %vm6329_vm8 = vcmask 293888  }
 0x296   :  { %v507_v59 = vadd.f32 %v502_v30, %v412_v49  ;;  %v508_v32 = vadd.f32 %v503_v8, %v413_v55  ;;  %v4327_v61 = vpop.permute.xlu0 %666 }
 0x297   :  { %6358 = vst [vmem:[#allocation32_spill] sm:$0xff] %v4327_v61 }
 0x298   :  { %1019 = vrot.lane.b32.xlu0 %v1013_v27, %s3572_s25  ;;  %v4330_v3 = vpop.permute.xlu1 %522 }
 0x299   :  { %6359 = vst [vmem:[#allocation33_spill] sm:$0xff] %v4330_v3 }
 0x29a   :  { %v687_v60 = vpop.permute.xlu0 %686 }
 0x29c   :  { %1023 = vrot.lane.b32.xlu0 %v1015_v23, %s3572_s25  ;;  %v547_v18 = vpop.permute.xlu1 %546 }
 0x29d   :  { %v551_v49 = vsel %vm6305_vm9, %v4191_v24, %v547_v18  ;;  %v552_v55 = vsel %vm6305_vm9, %v547_v18, %v4211_v9  ;;  %v1038_v24 = vmul.f32 %v4250_v36, %v4059_v42 }
 0x29e   :  { %v555_v29 = vadd.f32 %v551_v49, %v460_v16  ;;  %v556_v54 = vadd.f32 %v552_v55, %v461_v48  ;;  %v4341_v39 = vpop.permute.xlu0 %690 }
 0x29f   :  { %6360 = vst [vmem:[#allocation34_spill] sm:$0xff] %v4341_v39 }
 0x2a0   :  { %1042 = vrot.lane.b32.xlu0 %v1036_v44, %s3572_s25  ;;  %v570_v35 = vpop.permute.xlu1 %569 }
 0x2a1   :  { %v573_v21 = vsel %vm6305_vm9, %v4230_v25, %v570_v35  ;;  %v574_v30 = vsel %vm6305_vm9, %v570_v35, %v4242_v26  ;;  %v1060_v25 = vmul.f32 %v4071_v51, %v3750_v56 }
 0x2a2   :  { %v578_v9 = vadd.f32 %v573_v21, %v483_v14  ;;  %v579_v8 = vadd.f32 %v574_v30, %v484_v10  ;;  %v4350_v27 = vpop.permute.xlu0 %710  ;;  %v1062_v14 = vmul.f32 %v4250_v36, %v4071_v51 }
 0x2a3   :  { %6361 = vst [vmem:[#allocation35_spill] sm:$0xff] %v4350_v27 }
 0x2a4   :  { %1046 = vrot.lane.b32.xlu0 %v1038_v24, %s3572_s25  ;;  %v594_v16 = vpop.permute.xlu1 %593 }
 0x2a5   :  { %v597_v48 = vsel %vm6305_vm9, %v4254_v46, %v594_v16  ;;  %v598_v31 = vsel %vm6305_vm9, %v594_v16, %v4266_v41  ;;  %v1086_v16 = vmul.f32 %v4250_v36, %v4084_v2  ;;  %vm6331_vm9 = vcmask 326656  }
 0x2a6   :  { %v602_v23 = vadd.f32 %v597_v48, %v507_v59  ;;  %v603_v18 = vadd.f32 %v598_v31, %v508_v32  ;;  %v4359_v49 = vpop.permute.xlu0 %714  ;;  %v1084_v32 = vmul.f32 %v4084_v2, %v3750_v56  ;;  %v4382_v31 = vld [vmem:[#allocation2] sm:$0xff] }
 0x2a7   :  { %6362 = vst [vmem:[#allocation36_spill] sm:$0xff] %v4359_v49 }
 0x2a8   :  { %1066 = vrot.lane.b32.xlu0 %v1060_v25, %s3572_s25  ;;  %v4362_v42 = vpop.permute.xlu1 %617 }
 0x2a9   :  { %6363 = vst [vmem:[#allocation37_spill] sm:$0xff] %v4362_v42 }
 0x2aa   :  { %v735_v10 = vpop.permute.xlu0 %734 }
 0x2ac   :  { %1070 = vrot.lane.b32.xlu0 %v1062_v14, %s3572_s25  ;;  %v642_v46 = vpop.permute.xlu1 %641 }
 0x2ad   :  { %v646_v55 = vsel %vm6304_vm10, %v4300_v5, %v642_v46  ;;  %v647_v59 = vsel %vm6304_vm10, %v642_v46, %v644_v37 }
 0x2ae   :  { %v650_v44 = vadd.f32 %v646_v55, %v555_v29  ;;  %v651_v35 = vadd.f32 %v647_v59, %v556_v54  ;;  %v739_v21 = vpop.permute.xlu0 %738 }
 0x2b0   :  { %1090 = vrot.lane.b32.xlu0 %v1084_v32, %s3572_s25  ;;  %v665_v30 = vpop.permute.xlu1 %664 }
 0x2b1   :  { %v668_v51 = vsel %vm6304_vm10, %v663_v62, %v665_v30  ;;  %v669_v24 = vsel %vm6304_vm10, %v665_v30, %v4327_v61  ;;  %v1108_v62 = vmul.f32 %v4382_v31, %v4094_v57 }
 0x2b2   :  { %v673_v5 = vadd.f32 %v668_v51, %v578_v9  ;;  %v674_v48 = vadd.f32 %v669_v24, %v579_v8  ;;  %v758_v37 = vpop.permute.xlu0 %757  ;;  %v1110_v9 = vmul.f32 %v4250_v36, %v4094_v57 }
 0x2b4   :  { %1094 = vrot.lane.b32.xlu0 %v1086_v16, %s3572_s25  ;;  %v689_v56 = vpop.permute.xlu1 %688 }
 0x2b5   :  { %v692_v29 = vsel %vm6304_vm10, %v687_v60, %v689_v56  ;;  %v693_v54 = vsel %vm6304_vm10, %v689_v56, %v4341_v39  ;;  %vm6330_vm10 = vcmask 359424  }
 0x2b6   :  { %v697_v25 = vadd.f32 %v692_v29, %v602_v23  ;;  %v698_v14 = vadd.f32 %v693_v54, %v603_v18  ;;  %v4386_v46 = vpop.permute.xlu0 %761  ;;  %v1131_v23 = vmul.f32 %v4382_v31, %v4104_v0 }
 0x2b7   :  { %6364 = vst [vmem:[#allocation38_spill] sm:$0xff] %v4386_v46 }
 0x2b8   :  { %1114 = vrot.lane.b32.xlu0 %v1108_v62, %s3573_s26  ;;  %v4389_v2 = vpop.permute.xlu1 %712 }
 0x2b9   :  { %6365 = vst [vmem:[#allocation39_spill] sm:$0xff] %v4389_v2 }
 0x2ba   :  { %v782_v60 = vpop.permute.xlu0 %781 }
 0x2bc   :  { %1118 = vrot.lane.b32.xlu0 %v1110_v9, %s3573_s26  ;;  %v737_v8 = vpop.permute.xlu1 %736 }
 0x2bd   :  { %v741_v55 = vsel %vm6303_vm11, %v735_v10, %v737_v8  ;;  %v742_v59 = vsel %vm6303_vm11, %v737_v8, %v739_v21  ;;  %v1133_v10 = vmul.f32 %v4250_v36, %v4104_v0 }
 0x2be   :  { %v745_v18 = vadd.f32 %v741_v55, %v650_v44  ;;  %v746_v32 = vadd.f32 %v742_v59, %v651_v35  ;;  %v4398_v30 = vpop.permute.xlu0 %785 }
 0x2bf   :  { %6366 = vst [vmem:[#allocation40_spill] sm:$0xff] %v4398_v30 }
 0x2c0   :  { %1137 = vrot.lane.b32.xlu0 %v1131_v23, %s3573_s26  ;;  %v760_v51 = vpop.permute.xlu1 %759 }
 0x2c1   :  { %v763_v57 = vsel %vm6303_vm11, %v758_v37, %v760_v51  ;;  %v764_v24 = vsel %vm6303_vm11, %v760_v51, %v4386_v46  ;;  %v1155_v37 = vmul.f32 %v4382_v31, %v4116_v28 }
 0x2c2   :  { %v768_v16 = vadd.f32 %v763_v57, %v673_v5  ;;  %v769_v21 = vadd.f32 %v764_v24, %v674_v48  ;;  %v4406_v56 = vpop.permute.xlu0 %805  ;;  %v1157_v5 = vmul.f32 %v4250_v36, %v4116_v28  ;;  %v1181_v28 = vmul.f32 %v4250_v36, %v4130_v4 }
 0x2c3   :  { %6367 = vst [vmem:[#allocation41_spill] sm:$0xff] %v4406_v56 }
 0x2c4   :  { %1141 = vrot.lane.b32.xlu0 %v1133_v10, %s3573_s26  ;;  %v784_v44 = vpop.permute.xlu1 %783 }
 0x2c5   :  { %v787_v35 = vsel %vm6303_vm11, %v782_v60, %v784_v44  ;;  %v788_v29 = vsel %vm6303_vm11, %v784_v44, %v4398_v30  ;;  %vm1974_vm11 = vcmask 392192  }
 0x2c6   :  { %v792_v54 = vadd.f32 %v787_v35, %v697_v25  ;;  %v793_v62 = vadd.f32 %v788_v29, %v698_v14  ;;  %v4414_v9 = vpop.permute.xlu0 %809  ;;  %v1179_v25 = vmul.f32 %v4382_v31, %v4130_v4  ;;  %v1205_v4 = vmul.f32 %v4250_v36, %v4139_v11 }
 0x2c7   :  { %6368 = vst [vmem:[#allocation42_spill] sm:$0xff] %v4414_v9 }
 0x2c8   :  { %1161 = vrot.lane.b32.xlu0 %v1155_v37, %s3573_s26  ;;  %v4417_v0 = vpop.permute.xlu1 %807 }
 0x2c9   :  { %6369 = vst [vmem:[#allocation43_spill] sm:$0xff] %v4417_v0 }
 0x2ca   :  { %v830_v48 = vpop.permute.xlu0 %829 }
 0x2cc   :  { %1165 = vrot.lane.b32.xlu0 %v1157_v5, %s3573_s26  ;;  %v832_v60 = vpop.permute.xlu1 %831 }
 0x2cd   :  { %v836_v8 = vsel %vm6302_vm12, %v830_v48, %v832_v60 }
 0x2ce   :  { %v840_v14 = vadd.f32 %v836_v8, %v745_v18  ;;  %v834_v55 = vpop.permute.xlu0 %833  ;;  %v1203_v18 = vmul.f32 %v4382_v31, %v4139_v11 }
 0x2cf   :  { %v837_v59 = vsel %vm6302_vm12, %v832_v60, %v834_v55 }
 0x2d0   :  { %v841_v23 = vadd.f32 %v837_v59, %v746_v32  ;;  %1185 = vrot.lane.b32.xlu0 %v1179_v25, %s3573_s26  ;;  %v855_v51 = vpop.permute.xlu1 %854 }
 0x2d2   :  { %v853_v57 = vpop.permute.xlu0 %852 }
 0x2d3   :  { %v858_v24 = vsel %vm6302_vm12, %v853_v57, %v855_v51 }
 0x2d4   :  { %v863_v10 = vadd.f32 %v858_v24, %v768_v16  ;;  %1189 = vrot.lane.b32.xlu0 %v1181_v28, %s3573_s26  ;;  %v879_v44 = vpop.permute.xlu1 %878 }
 0x2d6   :  { %v4433_v35 = vpop.permute.xlu0 %856 }
 0x2d7   :  { %6370 = vst [vmem:[#allocation44_spill] sm:$0xff] %v4433_v35  ;;  %v859_v32 = vsel %vm6302_vm12, %v855_v51, %v4433_v35 }
 0x2d8   :  { %v864_v29 = vadd.f32 %v859_v32, %v769_v21  ;;  %1209 = vrot.lane.b32.xlu0 %v1203_v18, %s3574_s27  ;;  %v4438_v37 = vpop.permute.xlu1 %902 }
 0x2d9   :  { %6371 = vst [vmem:[#allocation45_spill] sm:$0xff] %v4438_v37 }
 0x2da   :  { %v877_v16 = vpop.permute.xlu0 %876 }
 0x2db   :  { %v882_v5 = vsel %vm6302_vm12, %v877_v16, %v879_v44 }
 0x2dc   :  { %v887_v48 = vadd.f32 %v882_v5, %v792_v54  ;;  %1213 = vrot.lane.b32.xlu0 %v1205_v4, %s3574_s27  ;;  %v927_v60 = vpop.permute.xlu1 %926 }
 0x2de   :  { %v4444_v8 = vpop.permute.xlu0 %880 }
 0x2df   :  { %6372 = vst [vmem:[#allocation46_spill] sm:$0xff] %v4444_v8  ;;  %v883_v25 = vsel %vm6302_vm12, %v879_v44, %v4444_v8  ;;  %vm1879_vm12 = vcmask 424960  }
 0x2e0   :  { %v888_v21 = vadd.f32 %v883_v25, %v793_v62  ;;  %v950_v55 = vpop.permute.xlu1 %949 }
 0x2e2   :  { %v4448_v59 = vpop.permute.xlu0 %900 }
 0x2e3   :  { %6373 = vst [vmem:[#allocation47_spill] sm:$0xff] %v4448_v59 }
 0x2e4   :  { %v974_v51 = vpop.permute.xlu1 %973 }
 0x2e6   :  { %v4450_v28 = vpop.permute.xlu0 %904 }
 0x2e7   :  { %6374 = vst [vmem:[#allocation48_spill] sm:$0xff] %v4450_v28 }
 0x2e8   :  { %v4452_v11 = vpop.permute.xlu1 %997 }
 0x2e9   :  { %6375 = vst [vmem:[#allocation49_spill] sm:$0xff] %v4452_v11 }
 0x2ea   :  { %v925_v57 = vpop.permute.xlu0 %924 }
 0x2eb   :  { %v931_v54 = vsel %vm6301_vm13, %v925_v57, %v927_v60 }
 0x2ec   :  { %v935_v24 = vadd.f32 %v931_v54, %v840_v14  ;;  %v1022_v18 = vpop.permute.xlu1 %1021 }
 0x2ee   :  { %v929_v32 = vpop.permute.xlu0 %928 }
 0x2ef   :  { %v932_v4 = vsel %vm6301_vm13, %v927_v60, %v929_v32 }
 0x2f0   :  { %v936_v16 = vadd.f32 %v932_v4, %v841_v23  ;;  %v1045_v44 = vpop.permute.xlu1 %1044 }
 0x2f2   :  { %v948_v62 = vpop.permute.xlu0 %947 }
 0x2f3   :  { %v953_v5 = vsel %vm6301_vm13, %v948_v62, %v950_v55 }
 0x2f4   :  { %v958_v25 = vadd.f32 %v953_v5, %v863_v10  ;;  %v1069_v8 = vpop.permute.xlu1 %1068 }
 0x2f6   :  { %v4457_v30 = vpop.permute.xlu0 %951 }
 0x2f7   :  { %6376 = vst [vmem:[#allocation50_spill] sm:$0xff] %v4457_v30  ;;  %v954_v39 = vsel %vm6301_vm13, %v950_v55, %v4457_v30 }
 0x2f8   :  { %v959_v41 = vadd.f32 %v954_v39, %v864_v29  ;;  %v4461_v13 = vpop.permute.xlu1 %1092 }
 0x2f9   :  { %6377 = vst [vmem:[#allocation51_spill] sm:$0xff] %v4461_v13 }
 0x2fa   :  { %v972_v14 = vpop.permute.xlu0 %971 }
 0x2fb   :  { %v977_v57 = vsel %vm6301_vm13, %v972_v14, %v974_v51 }
 0x2fc   :  { %v982_v54 = vadd.f32 %v977_v57, %v887_v48  ;;  %v1117_v60 = vpop.permute.xlu1 %1116 }
 0x2fe   :  { %v4464_v23 = vpop.permute.xlu0 %975 }
 0x2ff   :  { %6378 = vst [vmem:[#allocation52_spill] sm:$0xff] %v4464_v23  ;;  %v978_v32 = vsel %vm6301_vm13, %v974_v51, %v4464_v23  ;;  %vm1784_vm13 = vcmask 457728  }
 0x300   :  { %v983_v10 = vadd.f32 %v978_v32, %v888_v21  ;;  %v1140_v4 = vpop.permute.xlu1 %1139 }
 0x302   :  { %v4468_v62 = vpop.permute.xlu0 %995 }
 0x303   :  { %6379 = vst [vmem:[#allocation53_spill] sm:$0xff] %v4468_v62 }
 0x304   :  { %v1164_v5 = vpop.permute.xlu1 %1163 }
 0x306   :  { %v4470_v35 = vpop.permute.xlu0 %999 }
 0x307   :  { %6380 = vst [vmem:[#allocation54_spill] sm:$0xff] %v4470_v35 }
 0x308   :  { %v4472_v39 = vpop.permute.xlu1 %1187 }
 0x309   :  { %6381 = vst [vmem:[#allocation55_spill] sm:$0xff] %v4472_v39 }
 0x30a   :  { %v1020_v29 = vpop.permute.xlu0 %1019 }
 0x30b   :  { %v1026_v55 = vsel %vm6299_vm14, %v1020_v29, %v1022_v18 }
 0x30c   :  { %v1030_v48 = vadd.f32 %v1026_v55, %v935_v24  ;;  %v4475_v14 = vpop.permute.xlu1 %1211 }
 0x30d   :  { %6382 = vst [vmem:[#allocation56_spill] sm:$0xff] %v4475_v14 }
 0x30e   :  { %v1024_v57 = vpop.permute.xlu0 %1023 }
 0x30f   :  { %v1027_v30 = vsel %vm6299_vm14, %v1022_v18, %v1024_v57 }
 0x310   :  { %v1031_v51 = vadd.f32 %v1027_v30, %v936_v16  ;;  %v1224_v21 = vpop.permute.xlu1 %1223  ;;  %v3576_v16 = vmov 51  }
 0x311   :  { %v1226_v32 = vmul.f32 %v4382_v31, %v1224_v21  ;;  %v1227_v23 = vmul.f32 %v1224_v21, %v3869_v63  ;;  %v1228_v24 = vmul.f32 %v4250_v36, %v1224_v21 }
 0x312   :  { %v1043_v7 = vpop.permute.xlu0 %1042 }
 0x313   :  { %v1048_v46 = vsel %vm6299_vm14, %v1043_v7, %v1045_v44  ;;  %1234 = vrot.lane.b32.xlu1 %v1227_v23, %s3574_s27  ;;  %1232 = vrot.lane.b32.xlu0 %v1226_v32, %s3574_s27 }
 0x314   :  { %v1053_v29 = vadd.f32 %v1048_v46, %v958_v25 }
 0x316   :  { %v4484_v55 = vpop.permute.xlu0 %1046 }
 0x317   :  { %6383 = vst [vmem:[#allocation57_spill] sm:$0xff] %v4484_v55  ;;  %v1049_v30 = vsel %vm6299_vm14, %v1045_v44, %v4484_v55  ;;  %1247 = vperm.xlu1 %3394, %v3702_v19   ;;  %1236 = vrot.lane.b32.xlu0 %v1228_v24, %s3574_s27 }
 0x318   :  { %v1054_v63 = vadd.f32 %v1049_v30, %v959_v41 }
 0x31a   :  { %v1067_v18 = vpop.permute.xlu0 %1066 }
 0x31b   :  { %v1072_v7 = vsel %vm6299_vm14, %v1067_v18, %v1069_v8  ;;  %3395 = vset.pattern.permute.xlu1 %v3576_v16 }
 0x31c   :  { %v1077_v23 = vadd.f32 %v1072_v7, %v982_v54 }
 0x31e   :  { %v4491_v57 = vpop.permute.xlu0 %1070 }
 0x31f   :  { %6384 = vst [vmem:[#allocation58_spill] sm:$0xff] %v4491_v57  ;;  %v1073_v46 = vsel %vm6299_vm14, %v1069_v8, %v4491_v57  ;;  %vm1689_vm14 = vcmask 490496  }
 0x320   :  { %v1078_v25 = vadd.f32 %v1073_v46, %v983_v10 }
 0x322   :  { %v4495_v21 = vpop.permute.xlu0 %1090 }
 0x323   :  { %6385 = vst [vmem:[#allocation59_spill] sm:$0xff] %v4495_v21 }
 0x326   :  { %v4497_v44 = vpop.permute.xlu0 %1094 }
 0x327   :  { %6386 = vst [vmem:[#allocation60_spill] sm:$0xff] %v4497_v44 }
 0x32a   :  { %v1115_v32 = vpop.permute.xlu0 %1114 }
 0x32b   :  { %v1121_v41 = vsel %vm6296_vm15, %v1115_v32, %v1117_v60 }
 0x32c   :  { %v4500_v24 = vadd.f32 %v1121_v41, %v1030_v48 }
 0x32e   :  { %v1119_v30 = vpop.permute.xlu0 %1118 }
 0x32f   :  { %v1122_v18 = vsel %vm6296_vm15, %v1117_v60, %v1119_v30 }
 0x330   :  { %v4503_v54 = vadd.f32 %v1122_v18, %v1031_v51 }
 0x332   :  { %6387 = vst [vmem:[#allocation61_spill] sm:$0xff] %v4503_v54  ;;  %v1138_v7 = vpop.permute.xlu0 %1137 }
 0x333   :  { %v1143_v16 = vsel %vm6296_vm15, %v1138_v7, %v1140_v4 }
 0x334   :  { %v4506_v8 = vadd.f32 %v1143_v16, %v1053_v29 }
 0x336   :  { %v4508_v10 = vpop.permute.xlu0 %1141 }
 0x337   :  { %6388 = vst [vmem:[#allocation62_spill] sm:$0xff] %v4508_v10  ;;  %v1144_v46 = vsel %vm6296_vm15, %v1140_v4, %v4508_v10  ;;  %v4526_v4 = vld [vmem:[#allocation2 + $0x8] sm:$0xff] }
 0x338   :  { %v4512_v57 = vadd.f32 %v1144_v46, %v1054_v63 }
 0x33a   :  { %6389 = vst [vmem:[#allocation63_spill] sm:$0xff] %v4512_v57  ;;  %v1162_v32 = vpop.permute.xlu0 %1161 }
 0x33b   :  { %v1167_v48 = vsel %vm6296_vm15, %v1162_v32, %v1164_v5 }
 0x33c   :  { %v4515_v41 = vadd.f32 %v1167_v48, %v1077_v23 }
 0x33e   :  { %6390 = vst [vmem:[#allocation64_spill] sm:$0xff] %v4515_v41  ;;  %v4517_v60 = vpop.permute.xlu0 %1165 }
 0x33f   :  { %6391 = vst [vmem:[#allocation65_spill] sm:$0xff] %v4517_v60  ;;  %v1168_v51 = vsel %vm6296_vm15, %v1164_v5, %v4517_v60  ;;  %v3577_v5 = vmov 52   ;;  %vm1500_vm15 = vcmask 556032  }
 0x340   :  { %v4521_v30 = vadd.f32 %v1168_v51, %v1078_v25  ;;  %v3578_v51 = vmov 53  }
 0x342   :  { %6392 = vst [vmem:[#allocation66_spill] sm:$0xff] %v4521_v30 }
 0x385   :  { %v4523_v29 = vpop.permute.xlu1 %1234 }
 0x396   :  { %v1248_v18 = vpop.permute.xlu1 %1247 }
 0x397   :  { %v1250_v7 = vmul.f32 %v4382_v31, %v1248_v18  ;;  %v1251_v63 = vmul.f32 %v4526_v4, %v1248_v18  ;;  %v1252_v23 = vmul.f32 %v4250_v36, %v1248_v18 }
 0x399   :  { %1258 = vrot.lane.b32.xlu1 %v1251_v63, %s3574_s27  ;;  %1256 = vrot.lane.b32.xlu0 %v1250_v7, %s3574_s27 }
 0x39d   :  { %1271 = vperm.xlu1 %3395, %v3702_v19   ;;  %1260 = vrot.lane.b32.xlu0 %v1252_v23, %s3574_s27 }
 0x3a1   :  { %3396 = vset.pattern.permute.xlu1 %v3577_v5 }
 0x40b   :  { %v4534_v25 = vpop.permute.xlu1 %1258 }
 0x40c   :  { %6393 = vst [vmem:[#allocation67_spill] sm:$0xff] %v4534_v25 }
 0x41c   :  { %v1272_v16 = vpop.permute.xlu1 %1271 }
 0x41d   :  { %v1274_v46 = vmul.f32 %v4382_v31, %v1272_v16  ;;  %v1275_v32 = vmul.f32 %v4526_v4, %v1272_v16  ;;  %v1276_v48 = vmul.f32 %v4250_v36, %v1272_v16  ;;  %v3580_v16 = vmov 54  }
 0x41f   :  { %1282 = vrot.lane.b32.xlu1 %v1275_v32, %s3574_s27  ;;  %1280 = vrot.lane.b32.xlu0 %v1274_v46, %s3574_s27 }
 0x423   :  { %1295 = vperm.xlu1 %3396, %v3702_v19   ;;  %1284 = vrot.lane.b32.xlu0 %v1276_v48, %s3574_s27 }
 0x427   :  { %3397 = vset.pattern.permute.xlu1 %v3578_v51 }
 0x491   :  { %v4543_v18 = vpop.permute.xlu1 %1282 }
 0x492   :  { %6394 = vst [vmem:[#allocation68_spill] sm:$0xff] %v4543_v18 }
 0x4a2   :  { %v1296_v7 = vpop.permute.xlu1 %1295 }
 0x4a3   :  { %v1298_v63 = vmul.f32 %v4382_v31, %v1296_v7  ;;  %v1299_v23 = vmul.f32 %v4526_v4, %v1296_v7  ;;  %v1300_v5 = vmul.f32 %v4250_v36, %v1296_v7  ;;  %v3581_v7 = vmov 55  }
 0x4a5   :  { %1306 = vrot.lane.b32.xlu1 %v1299_v23, %s3579_s28  ;;  %1304 = vrot.lane.b32.xlu0 %v1298_v63, %s3579_s28 }
 0x4a9   :  { %1318 = vperm.xlu1 %3397, %v3702_v19   ;;  %1308 = vrot.lane.b32.xlu0 %v1300_v5, %s3579_s28 }
 0x4ad   :  { %3398 = vset.pattern.permute.xlu1 %v3580_v16 }
 0x517   :  { %v4552_v46 = vpop.permute.xlu1 %1306 }
 0x518   :  { %6395 = vst [vmem:[#allocation69_spill] sm:$0xff] %v4552_v46 }
 0x528   :  { %v1319_v32 = vpop.permute.xlu1 %1318 }
 0x529   :  { %v1321_v48 = vmul.f32 %v4382_v31, %v1319_v32  ;;  %v1322_v51 = vmul.f32 %v4526_v4, %v1319_v32  ;;  %v1323_v63 = vmul.f32 %v4250_v36, %v1319_v32  ;;  %v3582_v32 = vmov 56  }
 0x52b   :  { %1329 = vrot.lane.b32.xlu1 %v1322_v51, %s3579_s28  ;;  %1327 = vrot.lane.b32.xlu0 %v1321_v48, %s3579_s28 }
 0x52f   :  { %1342 = vperm.xlu1 %3398, %v3702_v19   ;;  %1331 = vrot.lane.b32.xlu0 %v1323_v63, %s3579_s28 }
 0x533   :  { %3399 = vset.pattern.permute.xlu1 %v3581_v7 }
 0x59d   :  { %v4561_v23 = vpop.permute.xlu1 %1329 }
 0x5ae   :  { %v1343_v5 = vpop.permute.xlu1 %1342 }
 0x5af   :  { %v1345_v16 = vmul.f32 %v4382_v31, %v1343_v5  ;;  %v1346_v54 = vmul.f32 %v4526_v4, %v1343_v5  ;;  %v1347_v48 = vmul.f32 %v4250_v36, %v1343_v5  ;;  %v3583_v5 = vmov 57  }
 0x5b1   :  { %1353 = vrot.lane.b32.xlu1 %v1346_v54, %s3579_s28  ;;  %1351 = vrot.lane.b32.xlu0 %v1345_v16, %s3579_s28 }
 0x5b5   :  { %1366 = vperm.xlu1 %3399, %v3702_v19   ;;  %1355 = vrot.lane.b32.xlu0 %v1347_v48, %s3579_s28 }
 0x5b9   :  { %3400 = vset.pattern.permute.xlu1 %v3582_v32 }
 0x623   :  { %v4570_v51 = vpop.permute.xlu1 %1353 }
 0x624   :  { %6396 = vst [vmem:[#allocation70_spill] sm:$0xff] %v4570_v51 }
 0x634   :  { %v1367_v63 = vpop.permute.xlu1 %1366 }
 0x635   :  { %v1369_v7 = vmul.f32 %v4382_v31, %v1367_v63  ;;  %v1370_v60 = vmul.f32 %v4526_v4, %v1367_v63  ;;  %v1371_v54 = vmul.f32 %v4250_v36, %v1367_v63  ;;  %v3585_v63 = vmov 58  }
 0x637   :  { %1377 = vrot.lane.b32.xlu1 %v1370_v60, %s3579_s28  ;;  %1375 = vrot.lane.b32.xlu0 %v1369_v7, %s3579_s28 }
 0x63b   :  { %1390 = vperm.xlu1 %3400, %v3702_v19   ;;  %1379 = vrot.lane.b32.xlu0 %v1371_v54, %s3579_s28 }
 0x63f   :  { %3401 = vset.pattern.permute.xlu1 %v3583_v5 }
 0x6a9   :  { %v4579_v16 = vpop.permute.xlu1 %1377 }
 0x6aa   :  { %6397 = vst [vmem:[#allocation71_spill] sm:$0xff] %v4579_v16 }
 0x6ba   :  { %v1391_v48 = vpop.permute.xlu1 %1390 }
 0x6bb   :  { %v1393_v32 = vmul.f32 %v4382_v31, %v1391_v48  ;;  %v1394_v57 = vmul.f32 %v4526_v4, %v1391_v48  ;;  %v1395_v60 = vmul.f32 %v4250_v36, %v1391_v48  ;;  %v3586_v48 = vmov 59  }
 0x6bd   :  { %1401 = vrot.lane.b32.xlu1 %v1394_v57, %s3584_s29  ;;  %1399 = vrot.lane.b32.xlu0 %v1393_v32, %s3584_s29 }
 0x6c1   :  { %1413 = vperm.xlu1 %3401, %v3702_v19   ;;  %1403 = vrot.lane.b32.xlu0 %v1395_v60, %s3584_s29 }
 0x6c5   :  { %3402 = vset.pattern.permute.xlu1 %v3585_v63 }
 0x72f   :  { %v4588_v7 = vpop.permute.xlu1 %1401 }
 0x730   :  { %6398 = vst [vmem:[#allocation72_spill] sm:$0xff] %v4588_v7 }
 0x740   :  { %v1414_v54 = vpop.permute.xlu1 %1413 }
 0x741   :  { %v1416_v5 = vmul.f32 %v4382_v31, %v1414_v54  ;;  %v1417_v10 = vmul.f32 %v4526_v4, %v1414_v54  ;;  %v1418_v57 = vmul.f32 %v4250_v36, %v1414_v54  ;;  %v3587_v54 = vmov 60  }
 0x743   :  { %1424 = vrot.lane.b32.xlu1 %v1417_v10, %s3584_s29  ;;  %1422 = vrot.lane.b32.xlu0 %v1416_v5, %s3584_s29 }
 0x747   :  { %1437 = vperm.xlu1 %3402, %v3702_v19   ;;  %1426 = vrot.lane.b32.xlu0 %v1418_v57, %s3584_s29 }
 0x74b   :  { %3403 = vset.pattern.permute.xlu1 %v3586_v48 }
 0x7b5   :  { %v4597_v32 = vpop.permute.xlu1 %1424 }
 0x7c6   :  { %v1438_v60 = vpop.permute.xlu1 %1437 }
 0x7c7   :  { %v1440_v63 = vmul.f32 %v4382_v31, %v1438_v60  ;;  %v1441_v55 = vmul.f32 %v4526_v4, %v1438_v60  ;;  %v1442_v10 = vmul.f32 %v4250_v36, %v1438_v60  ;;  %v3588_v60 = vmov 61  }
 0x7c9   :  { %1448 = vrot.lane.b32.xlu1 %v1441_v55, %s3584_s29  ;;  %1446 = vrot.lane.b32.xlu0 %v1440_v63, %s3584_s29 }
 0x7cd   :  { %1461 = vperm.xlu1 %3403, %v3702_v19   ;;  %1450 = vrot.lane.b32.xlu0 %v1442_v10, %s3584_s29 }
 0x7d1   :  { %3404 = vset.pattern.permute.xlu1 %v3587_v54 }
 0x83b   :  { %v4606_v5 = vpop.permute.xlu1 %1448 }
 0x83c   :  { %6399 = vst [vmem:[#allocation73_spill] sm:$0xff] %v4606_v5 }
 0x84c   :  { %v1462_v57 = vpop.permute.xlu1 %1461 }
 0x84d   :  { %v1464_v48 = vmul.f32 %v4382_v31, %v1462_v57  ;;  %v1465_v40 = vmul.f32 %v4526_v4, %v1462_v57  ;;  %v1466_v55 = vmul.f32 %v4250_v36, %v1462_v57  ;;  %v3590_v57 = vmov 62  }
 0x84f   :  { %1472 = vrot.lane.b32.xlu1 %v1465_v40, %s3584_s29  ;;  %1470 = vrot.lane.b32.xlu0 %v1464_v48, %s3584_s29 }
 0x853   :  { %1485 = vperm.xlu1 %3404, %v3702_v19   ;;  %1474 = vrot.lane.b32.xlu0 %v1466_v55, %s3584_s29 }
 0x857   :  { %3405 = vset.pattern.permute.xlu1 %v3588_v60 }
 0x8c1   :  { %v4615_v63 = vpop.permute.xlu1 %1472 }
 0x8c2   :  { %6400 = vst [vmem:[#allocation74_spill] sm:$0xff] %v4615_v63 }
 0x8d2   :  { %v1486_v10 = vpop.permute.xlu1 %1485 }
 0x8d3   :  { %v1488_v54 = vmul.f32 %v4382_v31, %v1486_v10  ;;  %v1489_v61 = vmul.f32 %v4526_v4, %v1486_v10  ;;  %v1490_v40 = vmul.f32 %v4250_v36, %v1486_v10  ;;  %v3591_v10 = vmov 63  }
 0x8d5   :  { %1496 = vrot.lane.b32.xlu1 %v1489_v61, %s3589_s30  ;;  %1494 = vrot.lane.b32.xlu0 %v1488_v54, %s3589_s30 }
 0x8d9   :  { %1508 = vperm.xlu1 %3405, %v3702_v19   ;;  %1498 = vrot.lane.b32.xlu0 %v1490_v40, %s3589_s30 }
 0x8dd   :  { %3406 = vset.pattern.permute.xlu1 %v3590_v57 }
 0x947   :  { %v4624_v48 = vpop.permute.xlu1 %1496 }
 0x948   :  { %6401 = vst [vmem:[#allocation75_spill] sm:$0xff] %v4624_v48 }
 0x958   :  { %v1509_v55 = vpop.permute.xlu1 %1508 }
 0x959   :  { %v1511_v60 = vmul.f32 %v4382_v31, %v1509_v55  ;;  %v1512_v34 = vmul.f32 %v4526_v4, %v1509_v55  ;;  %v1513_v61 = vmul.f32 %v4250_v36, %v1509_v55  ;;  %v3592_v55 = vmov 64  }
 0x95b   :  { %1519 = vrot.lane.b32.xlu1 %v1512_v34, %s3589_s30  ;;  %1517 = vrot.lane.b32.xlu0 %v1511_v60, %s3589_s30 }
 0x95f   :  { %1532 = vperm.xlu1 %3406, %v3702_v19   ;;  %1521 = vrot.lane.b32.xlu0 %v1513_v61, %s3589_s30 }
 0x963   :  { %3407 = vset.pattern.permute.xlu1 %v3591_v10 }
 0x9cd   :  { %v4633_v54 = vpop.permute.xlu1 %1519 }
 0x9de   :  { %v1533_v40 = vpop.permute.xlu1 %1532 }
 0x9df   :  { %v1535_v57 = vmul.f32 %v4382_v31, %v1533_v40  ;;  %v1536_v26 = vmul.f32 %v4526_v4, %v1533_v40  ;;  %v1537_v34 = vmul.f32 %v4250_v36, %v1533_v40  ;;  %v3593_v40 = vmov 65  }
 0x9e1   :  { %1543 = vrot.lane.b32.xlu1 %v1536_v26, %s3589_s30  ;;  %1541 = vrot.lane.b32.xlu0 %v1535_v57, %s3589_s30 }
 0x9e5   :  { %1556 = vperm.xlu1 %3407, %v3702_v19   ;;  %1545 = vrot.lane.b32.xlu0 %v1537_v34, %s3589_s30 }
 0x9e9   :  { %3408 = vset.pattern.permute.xlu1 %v3592_v55 }
 0xa53   :  { %v4642_v60 = vpop.permute.xlu1 %1543 }
 0xa54   :  { %6402 = vst [vmem:[#allocation76_spill] sm:$0xff] %v4642_v60 }
 0xa64   :  { %v1557_v61 = vpop.permute.xlu1 %1556 }
 0xa65   :  { %v1559_v10 = vmul.f32 %v4382_v31, %v1557_v61  ;;  %v1560_v50 = vmul.f32 %v4526_v4, %v1557_v61  ;;  %v1561_v26 = vmul.f32 %v4250_v36, %v1557_v61  ;;  %v3594_v61 = vmov 66  }
 0xa67   :  { %1567 = vrot.lane.b32.xlu1 %v1560_v50, %s3589_s30  ;;  %1565 = vrot.lane.b32.xlu0 %v1559_v10, %s3589_s30 }
 0xa6b   :  { %1580 = vperm.xlu1 %3408, %v3702_v19   ;;  %1569 = vrot.lane.b32.xlu0 %v1561_v26, %s3589_s30 }
 0xa6f   :  { %3409 = vset.pattern.permute.xlu1 %v3593_v40 }
 0xad9   :  { %v4651_v57 = vpop.permute.xlu1 %1567 }
 0xada   :  { %6403 = vst [vmem:[#allocation77_spill] sm:$0xff] %v4651_v57 }
 0xaea   :  { %v1581_v34 = vpop.permute.xlu1 %1580 }
 0xaeb   :  { %v1583_v55 = vmul.f32 %v4382_v31, %v1581_v34  ;;  %v1584_v15 = vmul.f32 %v4526_v4, %v1581_v34  ;;  %v1585_v50 = vmul.f32 %v4250_v36, %v1581_v34  ;;  %v3595_v34 = vmov 67  }
 0xaed   :  { %1591 = vrot.lane.b32.xlu1 %v1584_v15, %s3514_s0  ;;  %1589 = vrot.lane.b32.xlu0 %v1583_v55, %s3514_s0 }
 0xaf1   :  { %1602 = vperm.xlu1 %3409, %v3702_v19   ;;  %1593 = vrot.lane.b32.xlu0 %v1585_v50, %s3514_s0 }
 0xaf5   :  { %3410 = vset.pattern.permute.xlu1 %v3594_v61 }
 0xb5f   :  { %v4660_v10 = vpop.permute.xlu1 %1591 }
 0xb60   :  { %6404 = vst [vmem:[#allocation78_spill] sm:$0xff] %v4660_v10 }
 0xb70   :  { %v1603_v26 = vpop.permute.xlu1 %1602 }
 0xb71   :  { %v1605_v40 = vmul.f32 %v4382_v31, %v1603_v26  ;;  %v1606_v58 = vmul.f32 %v4526_v4, %v1603_v26  ;;  %v1607_v15 = vmul.f32 %v4250_v36, %v1603_v26  ;;  %v3596_v26 = vmov 68  }
 0xb73   :  { %1613 = vrot.lane.b32.xlu1 %v1606_v58, %s3514_s0  ;;  %1611 = vrot.lane.b32.xlu0 %v1605_v40, %s3514_s0 }
 0xb77   :  { %1626 = vperm.xlu1 %3410, %v3702_v19   ;;  %1615 = vrot.lane.b32.xlu0 %v1607_v15, %s3514_s0 }
 0xb7b   :  { %3411 = vset.pattern.permute.xlu1 %v3595_v34 }
 0xbe5   :  { %v4669_v55 = vpop.permute.xlu1 %1613 }
 0xbf6   :  { %v1627_v50 = vpop.permute.xlu1 %1626 }
 0xbf7   :  { %v1629_v61 = vmul.f32 %v4382_v31, %v1627_v50  ;;  %v1630_v33 = vmul.f32 %v4526_v4, %v1627_v50  ;;  %v1631_v58 = vmul.f32 %v4250_v36, %v1627_v50  ;;  %v3597_v50 = vmov 69  }
 0xbf9   :  { %1637 = vrot.lane.b32.xlu1 %v1630_v33, %s3514_s0  ;;  %1635 = vrot.lane.b32.xlu0 %v1629_v61, %s3514_s0 }
 0xbfd   :  { %1650 = vperm.xlu1 %3411, %v3702_v19   ;;  %1639 = vrot.lane.b32.xlu0 %v1631_v58, %s3514_s0 }
 0xc01   :  { %3412 = vset.pattern.permute.xlu1 %v3596_v26 }
 0xc6b   :  { %v4678_v40 = vpop.permute.xlu1 %1637 }
 0xc6c   :  { %6405 = vst [vmem:[#allocation79_spill] sm:$0xff] %v4678_v40 }
 0xc7c   :  { %v1651_v15 = vpop.permute.xlu1 %1650 }
 0xc7d   :  { %v1653_v34 = vmul.f32 %v4382_v31, %v1651_v15  ;;  %v1654_v6 = vmul.f32 %v4526_v4, %v1651_v15  ;;  %v1655_v33 = vmul.f32 %v4250_v36, %v1651_v15  ;;  %v3599_v15 = vmov 70  }
 0xc7f   :  { %1661 = vrot.lane.b32.xlu1 %v1654_v6, %s3514_s0  ;;  %1659 = vrot.lane.b32.xlu0 %v1653_v34, %s3514_s0 }
 0xc83   :  { %1674 = vperm.xlu1 %3412, %v3702_v19   ;;  %1663 = vrot.lane.b32.xlu0 %v1655_v33, %s3514_s0  ;;  %s3667_s0 = smov 4  }
 0xc87   :  { %3413 = vset.pattern.permute.xlu1 %v3597_v50 }
 0xcf1   :  { %v4687_v61 = vpop.permute.xlu1 %1661 }
 0xcf2   :  { %6406 = vst [vmem:[#allocation80_spill] sm:$0xff] %v4687_v61 }
 0xd02   :  { %v1675_v58 = vpop.permute.xlu1 %1674 }
 0xd03   :  { %v1677_v26 = vmul.f32 %v4382_v31, %v1675_v58  ;;  %v1678_v47 = vmul.f32 %v4526_v4, %v1675_v58  ;;  %v1679_v6 = vmul.f32 %v4250_v36, %v1675_v58  ;;  %v3600_v58 = vmov 71  }
 0xd05   :  { %1685 = vrot.lane.b32.xlu1 %v1678_v47, %s3598_s3  ;;  %1683 = vrot.lane.b32.xlu0 %v1677_v26, %s3598_s3 }
 0xd09   :  { %1697 = vperm.xlu1 %3413, %v3702_v19   ;;  %1687 = vrot.lane.b32.xlu0 %v1679_v6, %s3598_s3 }
 0xd0d   :  { %3414 = vset.pattern.permute.xlu1 %v3599_v15 }
 0xd77   :  { %v4696_v34 = vpop.permute.xlu1 %1685 }
 0xd78   :  { %6407 = vst [vmem:[#allocation81_spill] sm:$0xff] %v4696_v34 }
 0xd88   :  { %v1698_v33 = vpop.permute.xlu1 %1697 }
 0xd89   :  { %v1700_v50 = vmul.f32 %v4382_v31, %v1698_v33  ;;  %v1701_v61 = vmul.f32 %v4526_v4, %v1698_v33  ;;  %v1702_v47 = vmul.f32 %v4250_v36, %v1698_v33  ;;  %v3601_v33 = vmov 72  }
 0xd8b   :  { %1708 = vrot.lane.b32.xlu1 %v1701_v61, %s3598_s3  ;;  %1706 = vrot.lane.b32.xlu0 %v1700_v50, %s3598_s3 }
 0xd8f   :  { %1721 = vperm.xlu1 %3414, %v3702_v19   ;;  %1710 = vrot.lane.b32.xlu0 %v1702_v47, %s3598_s3 }
 0xd93   :  { %3415 = vset.pattern.permute.xlu1 %v3600_v58 }
 0xdfd   :  { %v4705_v26 = vpop.permute.xlu1 %1708 }
 0xe0e   :  { %v1722_v6 = vpop.permute.xlu1 %1721 }
 0xe0f   :  { %v1724_v15 = vmul.f32 %v4382_v31, %v1722_v6  ;;  %v1725_v57 = vmul.f32 %v4526_v4, %v1722_v6  ;;  %v1726_v61 = vmul.f32 %v4250_v36, %v1722_v6  ;;  %v4723_v6 = vpop.permute.xlu0 %1185 }
 0xe10   :  { %6409 = vst [vmem:[#allocation83_spill] sm:$0xff] %v4723_v6 }
 0xe11   :  { %1732 = vrot.lane.b32.xlu1 %v1725_v57, %s3598_s3  ;;  %1730 = vrot.lane.b32.xlu0 %v1724_v15, %s3598_s3  ;;  %v4720_v57 = vld [vmem:[#allocation2 + $0x10] sm:$0xff]  ;;  %v3602_v15 = vmov 73  }
 0xe13   :  { %v4729_v16 = vpop.permute.xlu0 %1189 }
 0xe14   :  { %6411 = vst [vmem:[#allocation85_spill] sm:$0xff] %v4729_v16 }
 0xe15   :  { %1745 = vperm.xlu1 %3415, %v3702_v19   ;;  %1734 = vrot.lane.b32.xlu0 %v1726_v61, %s3598_s3 }
 0xe17   :  { %v4736_v18 = vpop.permute.xlu0 %1209 }
 0xe19   :  { %3416 = vset.pattern.permute.xlu1 %v3601_v33 }
 0xe83   :  { %v4714_v50 = vpop.permute.xlu1 %1732 }
 0xe84   :  { %6408 = vst [vmem:[#allocation82_spill] sm:$0xff] %v4714_v50 }
 0xe94   :  { %v1746_v47 = vpop.permute.xlu1 %1745 }
 0xe95   :  { %v1748_v58 = vmul.f32 %v4382_v31, %v1746_v47  ;;  %v1749_v63 = vmul.f32 %v4526_v4, %v1746_v47  ;;  %v1750_v36 = vmul.f32 %v4720_v57, %v1746_v47 }
 0xe97   :  { %1756 = vrot.lane.b32.xlu1 %v1749_v63, %s3598_s3  ;;  %1754 = vrot.lane.b32.xlu0 %v1748_v58, %s3598_s3 }
 0xe9b   :  { %1769 = vperm.xlu1 %3416, %v3702_v19   ;;  %1758 = vrot.lane.b32.xlu0 %v1750_v36, %s3598_s3  ;;  %v3604_v36 = vmov 74  }
 0xe9f   :  { %3417 = vset.pattern.permute.xlu1 %v3602_v15 }
 0xf09   :  { %v4727_v61 = vpop.permute.xlu1 %1756 }
 0xf0a   :  { %6410 = vst [vmem:[#allocation84_spill] sm:$0xff] %v4727_v61 }
 0xf1a   :  { %v1770_v33 = vpop.permute.xlu1 %1769 }
 0xf1b   :  { %v1772_v63 = vmul.f32 %v4382_v31, %v1770_v33  ;;  %v1773_v58 = vmul.f32 %v4526_v4, %v1770_v33  ;;  %v1774_v47 = vmul.f32 %v4720_v57, %v1770_v33 }
 0xf1d   :  { %1780 = vrot.lane.b32.xlu1 %v1773_v58, %s3603_s4  ;;  %1778 = vrot.lane.b32.xlu0 %v1772_v63, %s3603_s4  ;;  %v4744_v58 = vpop.permute.xlu0 %1213 }
 0xf1e   :  { %6413 = vst [vmem:[#allocation87_spill] sm:$0xff] %v4744_v58 }
 0xf21   :  { %1792 = vperm.xlu1 %3417, %v3702_v19   ;;  %1782 = vrot.lane.b32.xlu0 %v1774_v47, %s3603_s4  ;;  %v4749_v63 = vpop.permute.xlu0 %1232  ;;  %v3605_v47 = vmov 75  }
 0xf25   :  { %3418 = vset.pattern.permute.xlu1 %v3604_v36 }
 0xf8f   :  { %v4740_v15 = vpop.permute.xlu1 %1780 }
 0xf90   :  { %6412 = vst [vmem:[#allocation86_spill] sm:$0xff] %v4740_v15 }
 0xfa0   :  { %v1793_v61 = vpop.permute.xlu1 %1792 }
 0xfa1   :  { %v1795_v16 = vmul.f32 %v4382_v31, %v1793_v61  ;;  %v1796_v44 = vmul.f32 %v4526_v4, %v1793_v61  ;;  %v1797_v33 = vmul.f32 %v4720_v57, %v1793_v61 }
 0xfa3   :  { %1803 = vrot.lane.b32.xlu1 %v1796_v44, %s3603_s4  ;;  %1801 = vrot.lane.b32.xlu0 %v1795_v16, %s3603_s4  ;;  %v4757_v44 = vpop.permute.xlu0 %1236 }
 0xfa4   :  { %6414 = vst [vmem:[#allocation88_spill] sm:$0xff] %v4757_v44 }
 0xfa7   :  { %1816 = vperm.xlu1 %3418, %v3702_v19   ;;  %1805 = vrot.lane.b32.xlu0 %v1797_v33, %s3603_s4  ;;  %v4762_v61 = vpop.permute.xlu0 %1256  ;;  %v3606_v33 = vmov 76  }
 0xfa8   :  { %6415 = vst [vmem:[#allocation89_spill] sm:$0xff] %v4762_v61 }
 0xfab   :  { %3419 = vset.pattern.permute.xlu1 %v3605_v47 }
0x1015   :  { %v4753_v36 = vpop.permute.xlu1 %1803 }
0x1026   :  { %v1817_v6 = vpop.permute.xlu1 %1816 }
0x1027   :  { %v1819_v39 = vmul.f32 %v4382_v31, %v1817_v6  ;;  %v1820_v58 = vmul.f32 %v4526_v4, %v1817_v6  ;;  %v1821_v16 = vmul.f32 %v4720_v57, %v1817_v6 }
0x1029   :  { %1827 = vrot.lane.b32.xlu1 %v1820_v58, %s3603_s4  ;;  %1825 = vrot.lane.b32.xlu0 %v1819_v39, %s3603_s4  ;;  %v4770_v58 = vpop.permute.xlu0 %1260 }
0x102a   :  { %6417 = vst [vmem:[#allocation91_spill] sm:$0xff] %v4770_v58 }
0x102d   :  { %1840 = vperm.xlu1 %3419, %v3702_v19   ;;  %1829 = vrot.lane.b32.xlu0 %v1821_v16, %s3603_s4  ;;  %v4775_v6 = vpop.permute.xlu0 %1280  ;;  %v3607_v16 = vmov 77  }
0x102e   :  { %6418 = vst [vmem:[#allocation92_spill] sm:$0xff] %v4775_v6 }
0x1031   :  { %3420 = vset.pattern.permute.xlu1 %v3606_v33 }
0x109b   :  { %v4766_v47 = vpop.permute.xlu1 %1827 }
0x109c   :  { %6416 = vst [vmem:[#allocation90_spill] sm:$0xff] %v4766_v47 }
0x10ac   :  { %v1841_v35 = vpop.permute.xlu1 %1840 }
0x10ad   :  { %v1843_v21 = vmul.f32 %v4382_v31, %v1841_v35  ;;  %v1844_v44 = vmul.f32 %v4526_v4, %v1841_v35  ;;  %v1845_v39 = vmul.f32 %v4720_v57, %v1841_v35 }
0x10af   :  { %1851 = vrot.lane.b32.xlu1 %v1844_v44, %s3603_s4  ;;  %1849 = vrot.lane.b32.xlu0 %v1843_v21, %s3603_s4  ;;  %v4783_v44 = vpop.permute.xlu0 %1284 }
0x10b0   :  { %6420 = vst [vmem:[#allocation94_spill] sm:$0xff] %v4783_v44 }
0x10b3   :  { %1864 = vperm.xlu1 %3420, %v3702_v19   ;;  %1853 = vrot.lane.b32.xlu0 %v1845_v39, %s3603_s4  ;;  %v4788_v21 = vpop.permute.xlu0 %1304  ;;  %v3609_v39 = vmov 78  }
0x10b7   :  { %3421 = vset.pattern.permute.xlu1 %v3607_v16 }
0x1121   :  { %v4779_v33 = vpop.permute.xlu1 %1851 }
0x1122   :  { %6419 = vst [vmem:[#allocation93_spill] sm:$0xff] %v4779_v33 }
0x1132   :  { %v1865_v13 = vpop.permute.xlu1 %1864 }
0x1133   :  { %v1867_v28 = vmul.f32 %v4382_v31, %v1865_v13  ;;  %v1868_v62 = vmul.f32 %v4526_v4, %v1865_v13  ;;  %v1869_v35 = vmul.f32 %v4720_v57, %v1865_v13 }
0x1135   :  { %1875 = vrot.lane.b32.xlu1 %v1868_v62, %s3608_s5  ;;  %1873 = vrot.lane.b32.xlu0 %v1867_v28, %s3608_s5  ;;  %v4796_v62 = vpop.permute.xlu0 %1308 }
0x1136   :  { %6422 = vst [vmem:[#allocation96_spill] sm:$0xff] %v4796_v62 }
0x1139   :  { %1887 = vperm.xlu1 %3421, %v3702_v19   ;;  %1877 = vrot.lane.b32.xlu0 %v1869_v35, %s3608_s5  ;;  %v4801_v28 = vpop.permute.xlu0 %1327  ;;  %v3610_v35 = vmov 79  }
0x113d   :  { %3422 = vset.pattern.permute.xlu1 %v3609_v39 }
0x11a7   :  { %v4792_v16 = vpop.permute.xlu1 %1875 }
0x11a8   :  { %6421 = vst [vmem:[#allocation95_spill] sm:$0xff] %v4792_v16 }
0x11b8   :  { %v1888_v33 = vpop.permute.xlu1 %1887 }
0x11b9   :  { %v1890_v44 = vmul.f32 %v4382_v31, %v1888_v33  ;;  %v1891_v6 = vmul.f32 %v4526_v4, %v1888_v33  ;;  %v1892_v13 = vmul.f32 %v4720_v57, %v1888_v33 }
0x11bb   :  { %1898 = vrot.lane.b32.xlu1 %v1891_v6, %s3608_s5  ;;  %1896 = vrot.lane.b32.xlu0 %v1890_v44, %s3608_s5  ;;  %v4809_v6 = vpop.permute.xlu0 %1331 }
0x11bc   :  { %6423 = vst [vmem:[#allocation97_spill] sm:$0xff] %v4809_v6 }
0x11bf   :  { %1911 = vperm.xlu1 %3422, %v3702_v19   ;;  %1900 = vrot.lane.b32.xlu0 %v1892_v13, %s3608_s5  ;;  %v4814_v44 = vpop.permute.xlu0 %1351  ;;  %v3611_v13 = vmov 80  }
0x11c0   :  { %6424 = vst [vmem:[#allocation98_spill] sm:$0xff] %v4814_v44 }
0x11c3   :  { %3423 = vset.pattern.permute.xlu1 %v3610_v35 }
0x122d   :  { %v4805_v39 = vpop.permute.xlu1 %1898 }
0x123e   :  { %v1912_v11 = vpop.permute.xlu1 %1911 }
0x123f   :  { %v1914_v9 = vmul.f32 %v4382_v31, %v1912_v11  ;;  %v1915_v62 = vmul.f32 %v4526_v4, %v1912_v11  ;;  %v1916_v33 = vmul.f32 %v4720_v57, %v1912_v11 }
0x1241   :  { %1922 = vrot.lane.b32.xlu1 %v1915_v62, %s3608_s5  ;;  %1920 = vrot.lane.b32.xlu0 %v1914_v9, %s3608_s5  ;;  %v4822_v62 = vpop.permute.xlu0 %1355 }
0x1242   :  { %6426 = vst [vmem:[#allocation100_spill] sm:$0xff] %v4822_v62 }
0x1245   :  { %1935 = vperm.xlu1 %3423, %v3702_v19   ;;  %1924 = vrot.lane.b32.xlu0 %v1916_v33, %s3608_s5  ;;  %v4827_v11 = vpop.permute.xlu0 %1375  ;;  %v3612_v33 = vmov 81  }
0x1246   :  { %6427 = vst [vmem:[#allocation101_spill] sm:$0xff] %v4827_v11 }
0x1249   :  { %3424 = vset.pattern.permute.xlu1 %v3611_v13 }
0x12b3   :  { %v4818_v35 = vpop.permute.xlu1 %1922 }
0x12b4   :  { %6425 = vst [vmem:[#allocation99_spill] sm:$0xff] %v4818_v35 }
0x12c4   :  { %v1936_v59 = vpop.permute.xlu1 %1935 }
0x12c5   :  { %v1938_v37 = vmul.f32 %v4382_v31, %v1936_v59  ;;  %v1939_v6 = vmul.f32 %v4526_v4, %v1936_v59  ;;  %v1940_v9 = vmul.f32 %v4720_v57, %v1936_v59 }
0x12c7   :  { %1946 = vrot.lane.b32.xlu1 %v1939_v6, %s3608_s5  ;;  %1944 = vrot.lane.b32.xlu0 %v1938_v37, %s3608_s5  ;;  %v4835_v6 = vpop.permute.xlu0 %1379 }
0x12c8   :  { %6429 = vst [vmem:[#allocation103_spill] sm:$0xff] %v4835_v6 }
0x12cb   :  { %1959 = vperm.xlu1 %3424, %v3702_v19   ;;  %1948 = vrot.lane.b32.xlu0 %v1940_v9, %s3608_s5  ;;  %v4840_v59 = vpop.permute.xlu0 %1399  ;;  %v3614_v9 = vmov 82  }
0x12cf   :  { %3425 = vset.pattern.permute.xlu1 %v3612_v33 }
0x1339   :  { %v4831_v13 = vpop.permute.xlu1 %1946 }
0x133a   :  { %6428 = vst [vmem:[#allocation102_spill] sm:$0xff] %v4831_v13  ;;  %v4846_v13 = vld [vmem:[#allocation2] sm:$0xff] }
0x134a   :  { %v1960_v49 = vpop.permute.xlu1 %1959 }
0x134b   :  { %v1962_v56 = vmul.f32 %v4382_v31, %v1960_v49  ;;  %v1963_v0 = vmul.f32 %v4526_v4, %v1960_v49  ;;  %v1964_v37 = vmul.f32 %v4720_v57, %v1960_v49 }
0x134d   :  { %1970 = vrot.lane.b32.xlu1 %v1963_v0, %s3613_s6  ;;  %1968 = vrot.lane.b32.xlu0 %v1962_v56, %s3613_s6  ;;  %v4850_v56 = vpop.permute.xlu0 %1403 }
0x134e   :  { %6431 = vst [vmem:[#allocation105_spill] sm:$0xff] %v4850_v56 }
0x1351   :  { %1982 = vperm.xlu1 %3425, %v3702_v19   ;;  %1972 = vrot.lane.b32.xlu0 %v1964_v37, %s3613_s6  ;;  %v4855_v37 = vpop.permute.xlu0 %1422 }
0x1355   :  { %3426 = vset.pattern.permute.xlu1 %v3614_v9  ;;  %v3615_v9 = vmov 83  }
0x13bf   :  { %v4844_v31 = vpop.permute.xlu1 %1970 }
0x13c0   :  { %6430 = vst [vmem:[#allocation104_spill] sm:$0xff] %v4844_v31 }
0x13d0   :  { %v1983_v33 = vpop.permute.xlu1 %1982 }
0x13d1   :  { %v1985_v6 = vmul.f32 %v4846_v13, %v1983_v33  ;;  %v1986_v0 = vmul.f32 %v4526_v4, %v1983_v33  ;;  %v1987_v49 = vmul.f32 %v4720_v57, %v1983_v33 }
0x13d3   :  { %1993 = vrot.lane.b32.xlu1 %v1986_v0, %s3613_s6  ;;  %1991 = vrot.lane.b32.xlu0 %v1985_v6, %s3613_s6  ;;  %v4863_v0 = vpop.permute.xlu0 %1426 }
0x13d4   :  { %6432 = vst [vmem:[#allocation106_spill] sm:$0xff] %v4863_v0 }
0x13d7   :  { %2006 = vperm.xlu1 %3426, %v3702_v19   ;;  %1995 = vrot.lane.b32.xlu0 %v1987_v49, %s3613_s6  ;;  %v4868_v33 = vpop.permute.xlu0 %1446  ;;  %v3616_v49 = vmov 84  }
0x13d8   :  { %6433 = vst [vmem:[#allocation107_spill] sm:$0xff] %v4868_v33 }
0x13db   :  { %3427 = vset.pattern.permute.xlu1 %v3615_v9 }
0x1445   :  { %v4859_v11 = vpop.permute.xlu1 %1993 }
0x1456   :  { %v2007_v1 = vpop.permute.xlu1 %2006 }
0x1457   :  { %v2009_v27 = vmul.f32 %v4846_v13, %v2007_v1  ;;  %v2010_v56 = vmul.f32 %v4526_v4, %v2007_v1  ;;  %v2011_v6 = vmul.f32 %v4720_v57, %v2007_v1 }
0x1459   :  { %2017 = vrot.lane.b32.xlu1 %v2010_v56, %s3613_s6  ;;  %2015 = vrot.lane.b32.xlu0 %v2009_v27, %s3613_s6  ;;  %v4876_v56 = vpop.permute.xlu0 %1450 }
0x145a   :  { %6435 = vst [vmem:[#allocation109_spill] sm:$0xff] %v4876_v56 }
0x145d   :  { %2030 = vperm.xlu1 %3427, %v3702_v19   ;;  %2019 = vrot.lane.b32.xlu0 %v2011_v6, %s3613_s6  ;;  %v4881_v27 = vpop.permute.xlu0 %1470  ;;  %v3617_v6 = vmov 85  }
0x145e   :  { %6436 = vst [vmem:[#allocation110_spill] sm:$0xff] %v4881_v27 }
0x1461   :  { %3428 = vset.pattern.permute.xlu1 %v3616_v49 }
0x14cb   :  { %v4872_v9 = vpop.permute.xlu1 %2017 }
0x14cc   :  { %6434 = vst [vmem:[#allocation108_spill] sm:$0xff] %v4872_v9 }
0x14dc   :  { %v2031_v2 = vpop.permute.xlu1 %2030 }
0x14dd   :  { %v2033_v17 = vmul.f32 %v4846_v13, %v2031_v2  ;;  %v2034_v0 = vmul.f32 %v4526_v4, %v2031_v2  ;;  %v2035_v1 = vmul.f32 %v4720_v57, %v2031_v2 }
0x14df   :  { %2041 = vrot.lane.b32.xlu1 %v2034_v0, %s3613_s6  ;;  %2039 = vrot.lane.b32.xlu0 %v2033_v17, %s3613_s6  ;;  %v4889_v0 = vpop.permute.xlu0 %1474 }
0x14e0   :  { %6438 = vst [vmem:[#allocation112_spill] sm:$0xff] %v4889_v0 }
0x14e3   :  { %2054 = vperm.xlu1 %3428, %v3702_v19   ;;  %2043 = vrot.lane.b32.xlu0 %v2035_v1, %s3613_s6  ;;  %v4894_v2 = vpop.permute.xlu0 %1494  ;;  %v3619_v1 = vmov 86  }
0x14e7   :  { %3429 = vset.pattern.permute.xlu1 %v3617_v6 }
0x1551   :  { %v4885_v49 = vpop.permute.xlu1 %2041 }
0x1552   :  { %6437 = vst [vmem:[#allocation111_spill] sm:$0xff] %v4885_v49 }
0x1562   :  { %v2055_v42 = vpop.permute.xlu1 %2054 }
0x1563   :  { %v2057_v3 = vmul.f32 %v4846_v13, %v2055_v42  ;;  %v2058_v12 = vmul.f32 %v4526_v4, %v2055_v42  ;;  %v2059_v17 = vmul.f32 %v4720_v57, %v2055_v42 }
0x1565   :  { %2065 = vrot.lane.b32.xlu1 %v2058_v12, %s3618_s7  ;;  %2063 = vrot.lane.b32.xlu0 %v2057_v3, %s3618_s7  ;;  %v4902_v12 = vpop.permute.xlu0 %1498 }
0x1566   :  { %6440 = vst [vmem:[#allocation114_spill] sm:$0xff] %v4902_v12 }
0x1569   :  { %2077 = vperm.xlu1 %3429, %v3702_v19   ;;  %2067 = vrot.lane.b32.xlu0 %v2059_v17, %s3618_s7  ;;  %v4907_v42 = vpop.permute.xlu0 %1517  ;;  %v3620_v17 = vmov 87  }
0x156d   :  { %3430 = vset.pattern.permute.xlu1 %v3619_v1 }
0x15d7   :  { %v4898_v6 = vpop.permute.xlu1 %2065 }
0x15d8   :  { %6439 = vst [vmem:[#allocation113_spill] sm:$0xff] %v4898_v6 }
0x15e8   :  { %v2078_v49 = vpop.permute.xlu1 %2077 }
0x15e9   :  { %v2080_v0 = vmul.f32 %v4846_v13, %v2078_v49  ;;  %v2081_v27 = vmul.f32 %v4526_v4, %v2078_v49  ;;  %v2082_v3 = vmul.f32 %v4720_v57, %v2078_v49 }
0x15eb   :  { %2088 = vrot.lane.b32.xlu1 %v2081_v27, %s3618_s7  ;;  %2086 = vrot.lane.b32.xlu0 %v2080_v0, %s3618_s7  ;;  %v4915_v27 = vpop.permute.xlu0 %1521 }
0x15ec   :  { %6441 = vst [vmem:[#allocation115_spill] sm:$0xff] %v4915_v27 }
0x15ef   :  { %2101 = vperm.xlu1 %3430, %v3702_v19   ;;  %2090 = vrot.lane.b32.xlu0 %v2082_v3, %s3618_s7  ;;  %v4920_v0 = vpop.permute.xlu0 %1541  ;;  %v3621_v3 = vmov 88  }
0x15f0   :  { %6442 = vst [vmem:[#allocation116_spill] sm:$0xff] %v4920_v0 }
0x15f3   :  { %3431 = vset.pattern.permute.xlu1 %v3620_v17 }
0x165d   :  { %v4911_v1 = vpop.permute.xlu1 %2088 }
0x166e   :  { %v2102_v52 = vpop.permute.xlu1 %2101 }
0x166f   :  { %v2104_v20 = vmul.f32 %v4846_v13, %v2102_v52  ;;  %v2105_v12 = vmul.f32 %v4526_v4, %v2102_v52  ;;  %v2106_v49 = vmul.f32 %v4720_v57, %v2102_v52 }
0x1671   :  { %2112 = vrot.lane.b32.xlu1 %v2105_v12, %s3618_s7  ;;  %2110 = vrot.lane.b32.xlu0 %v2104_v20, %s3618_s7  ;;  %v4928_v12 = vpop.permute.xlu0 %1545 }
0x1672   :  { %6444 = vst [vmem:[#allocation118_spill] sm:$0xff] %v4928_v12 }
0x1675   :  { %2125 = vperm.xlu1 %3431, %v3702_v19   ;;  %2114 = vrot.lane.b32.xlu0 %v2106_v49, %s3618_s7  ;;  %v4933_v52 = vpop.permute.xlu0 %1565  ;;  %v3622_v49 = vmov 89  }
0x1676   :  { %6445 = vst [vmem:[#allocation119_spill] sm:$0xff] %v4933_v52 }
0x1679   :  { %3432 = vset.pattern.permute.xlu1 %v3621_v3 }
0x16e3   :  { %v4924_v17 = vpop.permute.xlu1 %2112 }
0x16e4   :  { %6443 = vst [vmem:[#allocation117_spill] sm:$0xff] %v4924_v17 }
0x16f4   :  { %v2126_v43 = vpop.permute.xlu1 %2125 }
0x16f5   :  { %v2128_v22 = vmul.f32 %v4846_v13, %v2126_v43  ;;  %v2129_v27 = vmul.f32 %v4526_v4, %v2126_v43  ;;  %v2130_v20 = vmul.f32 %v4720_v57, %v2126_v43 }
0x16f7   :  { %2136 = vrot.lane.b32.xlu1 %v2129_v27, %s3618_s7  ;;  %2134 = vrot.lane.b32.xlu0 %v2128_v22, %s3618_s7  ;;  %v4941_v27 = vpop.permute.xlu0 %1569 }
0x16f8   :  { %6447 = vst [vmem:[#allocation121_spill] sm:$0xff] %v4941_v27 }
0x16fb   :  { %2149 = vperm.xlu1 %3432, %v3702_v19   ;;  %2138 = vrot.lane.b32.xlu0 %v2130_v20, %s3618_s7  ;;  %v4946_v22 = vpop.permute.xlu0 %1589  ;;  %v3624_v20 = vmov 90  }
0x16ff   :  { %3433 = vset.pattern.permute.xlu1 %v3622_v49 }
0x1769   :  { %v4937_v3 = vpop.permute.xlu1 %2136 }
0x176a   :  { %6446 = vst [vmem:[#allocation120_spill] sm:$0xff] %v4937_v3 }
0x177a   :  { %v2150_v53 = vpop.permute.xlu1 %2149 }
0x177b   :  { %v2152_v38 = vmul.f32 %v4846_v13, %v2150_v53  ;;  %v2153_v45 = vmul.f32 %v4526_v4, %v2150_v53  ;;  %v2154_v43 = vmul.f32 %v4720_v57, %v2150_v53 }
0x177d   :  { %2160 = vrot.lane.b32.xlu1 %v2153_v45, %s3623_s8  ;;  %2158 = vrot.lane.b32.xlu0 %v2152_v38, %s3623_s8  ;;  %v4954_v45 = vpop.permute.xlu0 %1593 }
0x177e   :  { %6449 = vst [vmem:[#allocation123_spill] sm:$0xff] %v4954_v45 }
0x1781   :  { %2172 = vperm.xlu1 %3433, %v3702_v19   ;;  %2162 = vrot.lane.b32.xlu0 %v2154_v43, %s3623_s8  ;;  %v4959_v38 = vpop.permute.xlu0 %1611  ;;  %v3625_v43 = vmov 91  }
0x1785   :  { %3434 = vset.pattern.permute.xlu1 %v3624_v20 }
0x17ef   :  { %v4950_v49 = vpop.permute.xlu1 %2160 }
0x17f0   :  { %6448 = vst [vmem:[#allocation122_spill] sm:$0xff] %v4950_v49 }
0x1800   :  { %v2173_v3 = vpop.permute.xlu1 %2172 }
0x1801   :  { %v2175_v27 = vmul.f32 %v4846_v13, %v2173_v3  ;;  %v2176_v52 = vmul.f32 %v4526_v4, %v2173_v3  ;;  %v2177_v53 = vmul.f32 %v4720_v57, %v2173_v3 }
0x1803   :  { %2183 = vrot.lane.b32.xlu1 %v2176_v52, %s3623_s8  ;;  %2181 = vrot.lane.b32.xlu0 %v2175_v27, %s3623_s8  ;;  %v4967_v52 = vpop.permute.xlu0 %1615 }
0x1804   :  { %6450 = vst [vmem:[#allocation124_spill] sm:$0xff] %v4967_v52 }
0x1807   :  { %2196 = vperm.xlu1 %3434, %v3702_v19   ;;  %2185 = vrot.lane.b32.xlu0 %v2177_v53, %s3623_s8  ;;  %v4972_v27 = vpop.permute.xlu0 %1635  ;;  %v3626_v53 = vmov 92  }
0x1808   :  { %6451 = vst [vmem:[#allocation125_spill] sm:$0xff] %v4972_v27 }
0x180b   :  { %3435 = vset.pattern.permute.xlu1 %v3625_v43 }
0x1875   :  { %v4963_v20 = vpop.permute.xlu1 %2183 }
0x1886   :  { %v2197_v17 = vpop.permute.xlu1 %2196 }
0x1887   :  { %v2199_v9 = vmul.f32 %v4846_v13, %v2197_v17  ;;  %v2200_v45 = vmul.f32 %v4526_v4, %v2197_v17  ;;  %v2201_v3 = vmul.f32 %v4720_v57, %v2197_v17 }
0x1889   :  { %2207 = vrot.lane.b32.xlu1 %v2200_v45, %s3623_s8  ;;  %2205 = vrot.lane.b32.xlu0 %v2199_v9, %s3623_s8  ;;  %v4980_v45 = vpop.permute.xlu0 %1639 }
0x188a   :  { %6453 = vst [vmem:[#allocation127_spill] sm:$0xff] %v4980_v45  ;;  %v4992_v45 = vld [vmem:[#allocation2 + $0x8] sm:$0xff] }
0x188d   :  { %2220 = vperm.xlu1 %3435, %v3702_v19   ;;  %2209 = vrot.lane.b32.xlu0 %v2201_v3, %s3623_s8  ;;  %v4985_v17 = vpop.permute.xlu0 %1659  ;;  %v3627_v3 = vmov 93  }
0x188e   :  { %6454 = vst [vmem:[#allocation128_spill] sm:$0xff] %v4985_v17 }
0x1891   :  { %3436 = vset.pattern.permute.xlu1 %v3626_v53 }
0x18fb   :  { %v4976_v43 = vpop.permute.xlu1 %2207 }
0x18fc   :  { %6452 = vst [vmem:[#allocation126_spill] sm:$0xff] %v4976_v43 }
0x190c   :  { %v2221_v35 = vpop.permute.xlu1 %2220 }
0x190d   :  { %v2223_v47 = vmul.f32 %v4846_v13, %v2221_v35  ;;  %v2224_v52 = vmul.f32 %v4526_v4, %v2221_v35  ;;  %v2225_v9 = vmul.f32 %v4720_v57, %v2221_v35 }
0x190f   :  { %2231 = vrot.lane.b32.xlu1 %v2224_v52, %s3623_s8  ;;  %2229 = vrot.lane.b32.xlu0 %v2223_v47, %s3623_s8  ;;  %v4995_v47 = vpop.permute.xlu0 %1663 }
0x1910   :  { %6456 = vst [vmem:[#allocation130_spill] sm:$0xff] %v4995_v47 }
0x1913   :  { %2244 = vperm.xlu1 %3436, %v3702_v19   ;;  %2233 = vrot.lane.b32.xlu0 %v2225_v9, %s3623_s8  ;;  %v5000_v9 = vpop.permute.xlu0 %1683 }
0x1917   :  { %3437 = vset.pattern.permute.xlu1 %v3627_v3  ;;  %v3629_v3 = vmov 94  }
0x1981   :  { %v4989_v53 = vpop.permute.xlu1 %2231 }
0x1982   :  { %6455 = vst [vmem:[#allocation129_spill] sm:$0xff] %v4989_v53 }
0x1992   :  { %v2245_v43 = vpop.permute.xlu1 %2244 }
0x1993   :  { %v2247_v4 = vmul.f32 %v4846_v13, %v2245_v43  ;;  %v2248_v52 = vmul.f32 %v4992_v45, %v2245_v43  ;;  %v2249_v35 = vmul.f32 %v4720_v57, %v2245_v43 }
0x1995   :  { %2255 = vrot.lane.b32.xlu1 %v2248_v52, %s3628_s9  ;;  %2253 = vrot.lane.b32.xlu0 %v2247_v4, %s3628_s9  ;;  %v5008_v52 = vpop.permute.xlu0 %1687 }
0x1996   :  { %6458 = vst [vmem:[#allocation132_spill] sm:$0xff] %v5008_v52 }
0x1999   :  { %2267 = vperm.xlu1 %3437, %v3702_v19   ;;  %2257 = vrot.lane.b32.xlu0 %v2249_v35, %s3628_s9  ;;  %v5013_v4 = vpop.permute.xlu0 %1706  ;;  %v3630_v35 = vmov 95  }
0x199d   :  { %3438 = vset.pattern.permute.xlu1 %v3629_v3 }
0x1a07   :  { %v5004_v53 = vpop.permute.xlu1 %2255 }
0x1a08   :  { %6457 = vst [vmem:[#allocation131_spill] sm:$0xff] %v5004_v53 }
0x1a18   :  { %v2268_v17 = vpop.permute.xlu1 %2267 }
0x1a19   :  { %v2270_v47 = vmul.f32 %v4846_v13, %v2268_v17  ;;  %v2271_v50 = vmul.f32 %v4992_v45, %v2268_v17  ;;  %v2272_v43 = vmul.f32 %v4720_v57, %v2268_v17 }
0x1a1b   :  { %2278 = vrot.lane.b32.xlu1 %v2271_v50, %s3628_s9  ;;  %2276 = vrot.lane.b32.xlu0 %v2270_v47, %s3628_s9  ;;  %v5021_v50 = vpop.permute.xlu0 %1710 }
0x1a1c   :  { %6460 = vst [vmem:[#allocation134_spill] sm:$0xff] %v5021_v50 }
0x1a1f   :  { %2291 = vperm.xlu1 %3438, %v3702_v19   ;;  %2280 = vrot.lane.b32.xlu0 %v2272_v43, %s3628_s9  ;;  %v5026_v47 = vpop.permute.xlu0 %1730  ;;  %v3631_v43 = vmov 96  }
0x1a20   :  { %6461 = vst [vmem:[#allocation135_spill] sm:$0xff] %v5026_v47 }
0x1a23   :  { %3439 = vset.pattern.permute.xlu1 %v3630_v35 }
0x1a8d   :  { %v5017_v3 = vpop.permute.xlu1 %2278 }
0x1a8e   :  { %6459 = vst [vmem:[#allocation133_spill] sm:$0xff] %v5017_v3 }
0x1a9e   :  { %v2292_v12 = vpop.permute.xlu1 %2291 }
0x1a9f   :  { %v2294_v27 = vmul.f32 %v4846_v13, %v2292_v12  ;;  %v2295_v52 = vmul.f32 %v4992_v45, %v2292_v12  ;;  %v2296_v17 = vmul.f32 %v4720_v57, %v2292_v12 }
0x1aa1   :  { %2302 = vrot.lane.b32.xlu1 %v2295_v52, %s3628_s9  ;;  %2300 = vrot.lane.b32.xlu0 %v2294_v27, %s3628_s9  ;;  %v5034_v52 = vpop.permute.xlu0 %1734 }
0x1aa2   :  { %6463 = vst [vmem:[#allocation137_spill] sm:$0xff] %v5034_v52 }
0x1aa5   :  { %2315 = vperm.xlu1 %3439, %v3702_v19   ;;  %2304 = vrot.lane.b32.xlu0 %v2296_v17, %s3628_s9  ;;  %v5039_v27 = vpop.permute.xlu0 %1754  ;;  %v3632_v17 = vmov 97  }
0x1aa6   :  { %6464 = vst [vmem:[#allocation138_spill] sm:$0xff] %v5039_v27 }
0x1aa9   :  { %3440 = vset.pattern.permute.xlu1 %v3631_v43 }
0x1b13   :  { %v5030_v35 = vpop.permute.xlu1 %2302 }
0x1b14   :  { %6462 = vst [vmem:[#allocation136_spill] sm:$0xff] %v5030_v35 }
0x1b24   :  { %v2316_v40 = vpop.permute.xlu1 %2315 }
0x1b25   :  { %v2318_v56 = vmul.f32 %v4846_v13, %v2316_v40  ;;  %v2319_v50 = vmul.f32 %v4992_v45, %v2316_v40  ;;  %v2320_v12 = vmul.f32 %v4720_v57, %v2316_v40 }
0x1b27   :  { %2326 = vrot.lane.b32.xlu1 %v2319_v50, %s3628_s9  ;;  %2324 = vrot.lane.b32.xlu0 %v2318_v56, %s3628_s9  ;;  %v5047_v50 = vpop.permute.xlu0 %1758 }
0x1b28   :  { %6466 = vst [vmem:[#allocation140_spill] sm:$0xff] %v5047_v50 }
0x1b2b   :  { %2339 = vperm.xlu1 %3440, %v3702_v19   ;;  %2328 = vrot.lane.b32.xlu0 %v2320_v12, %s3628_s9  ;;  %v5052_v56 = vpop.permute.xlu0 %1778  ;;  %v3634_v12 = vmov 98  }
0x1b2f   :  { %3441 = vset.pattern.permute.xlu1 %v3632_v17 }
0x1b99   :  { %v5043_v43 = vpop.permute.xlu1 %2326 }
0x1b9a   :  { %6465 = vst [vmem:[#allocation139_spill] sm:$0xff] %v5043_v43 }
0x1baa   :  { %v2340_v35 = vpop.permute.xlu1 %2339 }
0x1bab   :  { %v2342_v47 = vmul.f32 %v4846_v13, %v2340_v35  ;;  %v2343_v52 = vmul.f32 %v4992_v45, %v2340_v35  ;;  %v2344_v40 = vmul.f32 %v4720_v57, %v2340_v35 }
0x1bad   :  { %2350 = vrot.lane.b32.xlu1 %v2343_v52, %s3633_s10  ;;  %2348 = vrot.lane.b32.xlu0 %v2342_v47, %s3633_s10  ;;  %v5060_v52 = vpop.permute.xlu0 %1782 }
0x1bae   :  { %6468 = vst [vmem:[#allocation142_spill] sm:$0xff] %v5060_v52 }
0x1bb1   :  { %2362 = vperm.xlu1 %3441, %v3702_v19   ;;  %2352 = vrot.lane.b32.xlu0 %v2344_v40, %s3633_s10  ;;  %v5065_v35 = vpop.permute.xlu0 %1801  ;;  %v3635_v40 = vmov 99  }
0x1bb5   :  { %3442 = vset.pattern.permute.xlu1 %v3634_v12 }
0x1c1f   :  { %v5056_v17 = vpop.permute.xlu1 %2350 }
0x1c20   :  { %6467 = vst [vmem:[#allocation141_spill] sm:$0xff] %v5056_v17 }
0x1c30   :  { %v2363_v43 = vpop.permute.xlu1 %2362 }
0x1c31   :  { %v2365_v50 = vmul.f32 %v4846_v13, %v2363_v43  ;;  %v2366_v27 = vmul.f32 %v4992_v45, %v2363_v43  ;;  %v2367_v47 = vmul.f32 %v4720_v57, %v2363_v43 }
0x1c33   :  { %2373 = vrot.lane.b32.xlu1 %v2366_v27, %s3633_s10  ;;  %2371 = vrot.lane.b32.xlu0 %v2365_v50, %s3633_s10  ;;  %v5073_v27 = vpop.permute.xlu0 %1805 }
0x1c34   :  { %6470 = vst [vmem:[#allocation144_spill] sm:$0xff] %v5073_v27 }
0x1c37   :  { %2386 = vperm.xlu1 %3442, %v3702_v19   ;;  %2375 = vrot.lane.b32.xlu0 %v2367_v47, %s3633_s10  ;;  %v5078_v50 = vpop.permute.xlu0 %1825  ;;  %v3636_v47 = vmov 100  }
0x1c38   :  { %6471 = vst [vmem:[#allocation145_spill] sm:$0xff] %v5078_v50 }
0x1c3b   :  { %3443 = vset.pattern.permute.xlu1 %v3635_v40 }
0x1ca5   :  { %v5069_v12 = vpop.permute.xlu1 %2373 }
0x1ca6   :  { %6469 = vst [vmem:[#allocation143_spill] sm:$0xff] %v5069_v12 }
0x1cb6   :  { %v2387_v30 = vpop.permute.xlu1 %2386 }
0x1cb7   :  { %v2389_v0 = vmul.f32 %v4846_v13, %v2387_v30  ;;  %v2390_v52 = vmul.f32 %v4992_v45, %v2387_v30  ;;  %v2391_v43 = vmul.f32 %v4720_v57, %v2387_v30 }
0x1cb9   :  { %2397 = vrot.lane.b32.xlu1 %v2390_v52, %s3633_s10  ;;  %2395 = vrot.lane.b32.xlu0 %v2389_v0, %s3633_s10  ;;  %v5086_v52 = vpop.permute.xlu0 %1829 }
0x1cba   :  { %6473 = vst [vmem:[#allocation147_spill] sm:$0xff] %v5086_v52 }
0x1cbd   :  { %2410 = vperm.xlu1 %3443, %v3702_v19   ;;  %2399 = vrot.lane.b32.xlu0 %v2391_v43, %s3633_s10  ;;  %v5091_v0 = vpop.permute.xlu0 %1849  ;;  %v3637_v43 = vmov 101  }
0x1cbe   :  { %6474 = vst [vmem:[#allocation148_spill] sm:$0xff] %v5091_v0 }
0x1cc1   :  { %3444 = vset.pattern.permute.xlu1 %v3636_v47 }
0x1d2b   :  { %v5082_v40 = vpop.permute.xlu1 %2397 }
0x1d2c   :  { %6472 = vst [vmem:[#allocation146_spill] sm:$0xff] %v5082_v40 }
0x1d3c   :  { %v2411_v60 = vpop.permute.xlu1 %2410 }
0x1d3d   :  { %v2413_v62 = vmul.f32 %v4846_v13, %v2411_v60  ;;  %v2414_v27 = vmul.f32 %v4992_v45, %v2411_v60  ;;  %v2415_v30 = vmul.f32 %v4720_v57, %v2411_v60 }
0x1d3f   :  { %2421 = vrot.lane.b32.xlu1 %v2414_v27, %s3633_s10  ;;  %2419 = vrot.lane.b32.xlu0 %v2413_v62, %s3633_s10  ;;  %v5099_v27 = vpop.permute.xlu0 %1853 }
0x1d40   :  { %6476 = vst [vmem:[#allocation150_spill] sm:$0xff] %v5099_v27 }
0x1d43   :  { %2434 = vperm.xlu1 %3444, %v3702_v19   ;;  %2423 = vrot.lane.b32.xlu0 %v2415_v30, %s3633_s10  ;;  %v5104_v62 = vpop.permute.xlu0 %1873  ;;  %v3639_v30 = vmov 102  }
0x1d47   :  { %3445 = vset.pattern.permute.xlu1 %v3637_v43 }
0x1db1   :  { %v5095_v47 = vpop.permute.xlu1 %2421 }
0x1db2   :  { %6475 = vst [vmem:[#allocation149_spill] sm:$0xff] %v5095_v47 }
0x1dc2   :  { %v2435_v40 = vpop.permute.xlu1 %2434 }
0x1dc3   :  { %v2437_v50 = vmul.f32 %v4846_v13, %v2435_v40  ;;  %v2438_v52 = vmul.f32 %v4992_v45, %v2435_v40  ;;  %v2439_v60 = vmul.f32 %v4720_v57, %v2435_v40 }
0x1dc5   :  { %2445 = vrot.lane.b32.xlu1 %v2438_v52, %s3638_s11  ;;  %2443 = vrot.lane.b32.xlu0 %v2437_v50, %s3638_s11  ;;  %v5112_v52 = vpop.permute.xlu0 %1877 }
0x1dc6   :  { %6478 = vst [vmem:[#allocation152_spill] sm:$0xff] %v5112_v52 }
0x1dc9   :  { %2457 = vperm.xlu1 %3445, %v3702_v19   ;;  %2447 = vrot.lane.b32.xlu0 %v2439_v60, %s3638_s11  ;;  %v5117_v40 = vpop.permute.xlu0 %1896  ;;  %v3640_v60 = vmov 103  }
0x1dcd   :  { %3446 = vset.pattern.permute.xlu1 %v3639_v30 }
0x1e37   :  { %v5108_v43 = vpop.permute.xlu1 %2445 }
0x1e38   :  { %6477 = vst [vmem:[#allocation151_spill] sm:$0xff] %v5108_v43 }
0x1e48   :  { %v2458_v47 = vpop.permute.xlu1 %2457 }
0x1e49   :  { %v2460_v27 = vmul.f32 %v4846_v13, %v2458_v47  ;;  %v2461_v0 = vmul.f32 %v4992_v45, %v2458_v47  ;;  %v2462_v50 = vmul.f32 %v4720_v57, %v2458_v47 }
0x1e4b   :  { %2468 = vrot.lane.b32.xlu1 %v2461_v0, %s3638_s11  ;;  %2466 = vrot.lane.b32.xlu0 %v2460_v27, %s3638_s11  ;;  %v5125_v0 = vpop.permute.xlu0 %1900 }
0x1e4c   :  { %6480 = vst [vmem:[#allocation154_spill] sm:$0xff] %v5125_v0 }
0x1e4f   :  { %2481 = vperm.xlu1 %3446, %v3702_v19   ;;  %2470 = vrot.lane.b32.xlu0 %v2462_v50, %s3638_s11  ;;  %v5130_v27 = vpop.permute.xlu0 %1920  ;;  %v3641_v50 = vmov 107  }
0x1e50   :  { %6481 = vst [vmem:[#allocation155_spill] sm:$0xff] %v5130_v27  ;;  %3448 = vset.pattern.permute.xlu0 %v3641_v50  ;;  %v3644_v50 = vmov 119  }
0x1e53   :  { %3447 = vset.pattern.permute.xlu1 %v3640_v60  ;;  %v3642_v60 = vmov 111  }
0x1ebd   :  { %v5121_v30 = vpop.permute.xlu1 %2468 }
0x1ebe   :  { %6479 = vst [vmem:[#allocation153_spill] sm:$0xff] %v5121_v30 }
0x1ece   :  { %v2482_v33 = vpop.permute.xlu1 %2481 }
0x1ecf   :  { %v2484_v5 = vmul.f32 %v4846_v13, %v2482_v33  ;;  %v2485_v52 = vmul.f32 %v4992_v45, %v2482_v33  ;;  %v2486_v47 = vmul.f32 %v4720_v57, %v2482_v33 }
0x1ed1   :  { %2492 = vrot.lane.b32.xlu1 %v2485_v52, %s3638_s11  ;;  %2490 = vrot.lane.b32.xlu0 %v2484_v5, %s3638_s11  ;;  %v5138_v5 = vpop.permute.xlu0 %1924 }
0x1ed2   :  { %6483 = vst [vmem:[#allocation157_spill] sm:$0xff] %v5138_v5 }
0x1ed5   :  { %2505 = vperm.xlu1 %3447, %v3702_v19   ;;  %2494 = vrot.lane.b32.xlu0 %v2486_v47, %s3638_s11  ;;  %v5142_v33 = vpop.permute.xlu0 %1944  ;;  %v3643_v47 = vmov 115  }
0x1ed6   :  { %6484 = vst [vmem:[#allocation158_spill] sm:$0xff] %v5142_v33  ;;  %v6271_v33 = vmov 127  }
0x1ed9   :  { %3449 = vset.pattern.permute.xlu1 %v3642_v60  ;;  %v5146_v60 = vpop.permute.xlu0 %1948 }
0x1eda   :  { %6485 = vst [vmem:[#allocation159_spill] sm:$0xff] %v5146_v60  ;;  %v3648_v60 = vmov 105  }
0x1f43   :  { %v5134_v58 = vpop.permute.xlu1 %2492 }
0x1f44   :  { %6482 = vst [vmem:[#allocation156_spill] sm:$0xff] %v5134_v58  ;;  %v5151_v58 = vpop.permute.xlu0 %1968 }
0x1f54   :  { %v2506_v41 = vpop.permute.xlu1 %2505 }
0x1f55   :  { %v2508_v0 = vmul.f32 %v4846_v13, %v2506_v41  ;;  %v2509_v52 = vmul.f32 %v4992_v45, %v2506_v41 }
0x1f57   :  { %2516 = vrot.lane.b32.xlu1 %v2509_v52, %s3638_s11  ;;  %2514 = vrot.lane.b32.xlu0 %v2508_v0, %s3638_s11  ;;  %v2510_v52 = vmul.f32 %v4720_v57, %v2506_v41  ;;  %v3645_v0 = vmov 123  }
0x1f5b   :  { %2694 = vperm.xlu1 %3449, %v3702_v19   ;;  %2599 = vperm.xlu0 %3448, %v3702_v19  }
0x1f5f   :  { %3450 = vset.pattern.permute.xlu1 %v3643_v47  ;;  %3451 = vset.pattern.permute.xlu0 %v3644_v50  ;;  %v3647_v47 = vmov 104   ;;  %v5157_v50 = vpop.permute.xlu0 %1972 }
0x1f60   :  { %2789 = vperm.xlu1 %3450, %v3702_v19   ;;  %2884 = vperm.xlu0 %3451, %v3702_v19   ;;  %6486 = vst [vmem:[#allocation160_spill] sm:$0xff] %v5157_v50 }
0x1f63   :  { %v5160_v41 = vpop.permute.xlu0 %1991 }
0x1f64   :  { %3452 = vset.pattern.permute.xlu1 %v3645_v0  ;;  %2518 = vrot.lane.b32.xlu0 %v2510_v52, %s3638_s11 }
0x1f65   :  { %2979 = vperm.xlu1 %3452, %v3702_v19  }
0x1f67   :  { %v5162_v0 = vpop.permute.xlu0 %1995 }
0x1f68   :  { %6487 = vst [vmem:[#allocation161_spill] sm:$0xff] %v5162_v0 }
0x1f69   :  { %3453 = vset.pattern.permute.xlu1 %v6271_v33 }
0x1f6a   :  { %3074 = vperm.xlu1 %3453, %v3702_v19  }
0x1f6b   :  { %v5164_v52 = vpop.permute.xlu0 %2015 }
0x1f6c   :  { %6488 = vst [vmem:[#allocation162_spill] sm:$0xff] %v5164_v52 }
0x1f6e   :  { %3454 = vset.pattern.permute.xlu1 %v3647_v47 }
0x1f6f   :  { %2529 = vperm.xlu1 %3454, %v3702_v19   ;;  %v5166_v5 = vpop.permute.xlu0 %2019 }
0x1f70   :  { %6489 = vst [vmem:[#allocation163_spill] sm:$0xff] %v5166_v5 }
0x1f73   :  { %3455 = vset.pattern.permute.xlu1 %v3648_v60  ;;  %v5168_v27 = vpop.permute.xlu0 %2039 }
0x1f74   :  { %6490 = vst [vmem:[#allocation164_spill] sm:$0xff] %v5168_v27 }
0x1f77   :  { %v5170_v33 = vpop.permute.xlu0 %2043 }
0x1f78   :  { %6491 = vst [vmem:[#allocation165_spill] sm:$0xff] %v5170_v33 }
0x1f7b   :  { %v5172_v44 = vpop.permute.xlu0 %2063 }
0x1f7f   :  { %v5174_v47 = vpop.permute.xlu0 %2067 }
0x1f80   :  { %6492 = vst [vmem:[#allocation166_spill] sm:$0xff] %v5174_v47 }
0x1f83   :  { %v5176_v50 = vpop.permute.xlu0 %2086 }
0x1f87   :  { %v5178_v51 = vpop.permute.xlu0 %2090 }
0x1f88   :  { %6493 = vst [vmem:[#allocation167_spill] sm:$0xff] %v5178_v51 }
0x1f8b   :  { %v5180_v61 = vpop.permute.xlu0 %2110 }
0x1f8c   :  { %6494 = vst [vmem:[#allocation168_spill] sm:$0xff] %v5180_v61 }
0x1f8f   :  { %v5182_v60 = vpop.permute.xlu0 %2114 }
0x1f90   :  { %6495 = vst [vmem:[#allocation169_spill] sm:$0xff] %v5182_v60 }
0x1f93   :  { %v5184_v0 = vpop.permute.xlu0 %2134 }
0x1f94   :  { %6496 = vst [vmem:[#allocation170_spill] sm:$0xff] %v5184_v0 }
0x1f97   :  { %v5186_v52 = vpop.permute.xlu0 %2138 }
0x1f98   :  { %6497 = vst [vmem:[#allocation171_spill] sm:$0xff] %v5186_v52 }
0x1f9b   :  { %v5188_v5 = vpop.permute.xlu0 %2158 }
0x1f9f   :  { %v5190_v27 = vpop.permute.xlu0 %2162 }
0x1fa0   :  { %6498 = vst [vmem:[#allocation172_spill] sm:$0xff] %v5190_v27 }
0x1fa3   :  { %v5192_v33 = vpop.permute.xlu0 %2181 }
0x1fa4   :  { %6499 = vst [vmem:[#allocation173_spill] sm:$0xff] %v5192_v33 }
0x1fa7   :  { %v5194_v25 = vpop.permute.xlu0 %2185 }
0x1fa8   :  { %6500 = vst [vmem:[#allocation174_spill] sm:$0xff] %v5194_v25 }
0x1fab   :  { %v5196_v47 = vpop.permute.xlu0 %2205 }
0x1fac   :  { %6501 = vst [vmem:[#allocation175_spill] sm:$0xff] %v5196_v47 }
0x1faf   :  { %v5198_v30 = vpop.permute.xlu0 %2209 }
0x1fb0   :  { %6502 = vst [vmem:[#allocation176_spill] sm:$0xff] %v5198_v30 }
0x1fb3   :  { %v5202_v61 = vpop.permute.xlu0 %2229 }
0x1fb4   :  { %6504 = vst [vmem:[#allocation178_spill] sm:$0xff] %v5202_v61 }
0x1fb7   :  { %v5206_v0 = vpop.permute.xlu0 %2233 }
0x1fb8   :  { %6506 = vst [vmem:[#allocation180_spill] sm:$0xff] %v5206_v0 }
0x1fbb   :  { %v5210_v12 = vpop.permute.xlu0 %2253 }
0x1fbf   :  { %v5214_v3 = vpop.permute.xlu0 %2257 }
0x1fc0   :  { %6509 = vst [vmem:[#allocation183_spill] sm:$0xff] %v5214_v3  ;;  %v3650_v3 = vmov 106  }
0x1fc3   :  { %v5218_v47 = vpop.permute.xlu0 %2276 }
0x1fc4   :  { %6511 = vst [vmem:[#allocation185_spill] sm:$0xff] %v5218_v47 }
0x1fc9   :  { %v5200_v51 = vpop.permute.xlu1 %2516 }
0x1fca   :  { %6503 = vst [vmem:[#allocation177_spill] sm:$0xff] %v5200_v51 }
0x1fda   :  { %v5204_v60 = vpop.permute.xlu1 %2694 }
0x1fdb   :  { %6505 = vst [vmem:[#allocation179_spill] sm:$0xff] %v5204_v60  ;;  %v5222_v60 = vpop.permute.xlu0 %2280 }
0x1fdc   :  { %6512 = vst [vmem:[#allocation186_spill] sm:$0xff] %v5222_v60 }
0x1fdf   :  { %v5208_v52 = vpop.permute.xlu1 %2789 }
0x1fe0   :  { %6507 = vst [vmem:[#allocation181_spill] sm:$0xff] %v5208_v52 }
0x1fe4   :  { %v5212_v27 = vpop.permute.xlu1 %2979 }
0x1fe5   :  { %6508 = vst [vmem:[#allocation182_spill] sm:$0xff] %v5212_v27  ;;  %v5227_v27 = vpop.permute.xlu0 %2300 }
0x1fe6   :  { %6513 = vst [vmem:[#allocation187_spill] sm:$0xff] %v5227_v27 }
0x1fe9   :  { %v5216_v25 = vpop.permute.xlu1 %3074 }
0x1fea   :  { %6510 = vst [vmem:[#allocation184_spill] sm:$0xff] %v5216_v25  ;;  %v5231_v25 = vpop.permute.xlu0 %2304 }
0x1feb   :  { %6514 = vst [vmem:[#allocation188_spill] sm:$0xff] %v5231_v25 }
0x1fee   :  { %v2530_v30 = vpop.permute.xlu1 %2529  ;;  %v5233_v52 = vpop.permute.xlu0 %2324 }
0x1fef   :  { %v2532_v51 = vmul.f32 %v4846_v13, %v2530_v30  ;;  %v2533_v61 = vmul.f32 %v4992_v45, %v2530_v30  ;;  %v2534_v0 = vmul.f32 %v4720_v57, %v2530_v30  ;;  %6515 = vst [vmem:[#allocation189_spill] sm:$0xff] %v5233_v52 }
0x1ff1   :  { %2540 = vrot.lane.b32.xlu1 %v2533_v61, %s3649_s12  ;;  %2538 = vrot.lane.b32.xlu0 %v2532_v51, %s3649_s12 }
0x1ff2   :  { %v5235_v60 = vpop.permute.xlu0 %2328 }
0x1ff3   :  { %6516 = vst [vmem:[#allocation190_spill] sm:$0xff] %v5235_v60 }
0x1ff5   :  { %2551 = vperm.xlu1 %3455, %v3702_v19   ;;  %2542 = vrot.lane.b32.xlu0 %v2534_v0, %s3649_s12 }
0x1ff6   :  { %v2349_v47 = vpop.permute.xlu0 %2348 }
0x1ff9   :  { %3456 = vset.pattern.permute.xlu1 %v3650_v3 }
0x1ffa   :  { %v5237_v61 = vpop.permute.xlu0 %2352 }
0x1ffb   :  { %6517 = vst [vmem:[#allocation191_spill] sm:$0xff] %v5237_v61 }
0x1ffe   :  { %v5239_v51 = vpop.permute.xlu0 %2371 }
0x2002   :  { %v5241_v57 = vpop.permute.xlu0 %2375 }
0x2003   :  { %6518 = vst [vmem:[#allocation192_spill] sm:$0xff] %v5241_v57  ;;  %v1216_v57 = vsel %vm1215_vm0, %v4736_v18, %v4475_v14 }
0x2006   :  { %v5243_v30 = vpop.permute.xlu0 %2395 }
0x200a   :  { %v5245_v27 = vpop.permute.xlu0 %2399 }
0x200b   :  { %6519 = vst [vmem:[#allocation193_spill] sm:$0xff] %v5245_v27 }
0x200e   :  { %v5247_v0 = vpop.permute.xlu0 %2419 }
0x200f   :  { %6520 = vst [vmem:[#allocation194_spill] sm:$0xff] %v5247_v0  ;;  %v1220_v0 = vadd.f32 %v1216_v57, %v4500_v24 }
0x2012   :  { %v5249_v3 = vpop.permute.xlu0 %2423 }
0x2013   :  { %6521 = vst [vmem:[#allocation195_spill] sm:$0xff] %v5249_v3  ;;  %v1311_v3 = vsel %vm1310_vm2, %v4788_v21, %v4552_v46  ;;  %v1595_v21 = vsel %vm109_vm4, %v4946_v22, %v4660_v10  ;;  %v1880_v22 = vsel %vm1879_vm12, %v5104_v62, %v4792_v16  ;;  %v2165_v62 = vsel %vm6331_vm9, %v5188_v5, %v4950_v49  ;;  %v6579_v49 = vld [vmem:[#allocation156_spill] sm:$0xff] }
0x2016   :  { %v2444_v25 = vpop.permute.xlu0 %2443 }
0x201a   :  { %v5251_v33 = vpop.permute.xlu0 %2447 }
0x201b   :  { %6522 = vst [vmem:[#allocation196_spill] sm:$0xff] %v5251_v33  ;;  %v1406_v33 = vsel %vm1405_vm3, %v4840_v59, %v4588_v7  ;;  %v1690_v59 = vsel %vm1689_vm14, %v5000_v9, %v4696_v34  ;;  %v1975_v9 = vsel %vm1974_vm11, %v5151_v58, %v4844_v31  ;;  %v2260_v58 = vsel %vm6329_vm8, %v5210_v12, %v5004_v53  ;;  %v6575_v53 = vld [vmem:[#allocation187_spill] sm:$0xff] }
0x201e   :  { %v5253_v52 = vpop.permute.xlu0 %2466 }
0x2022   :  { %v5255_v60 = vpop.permute.xlu0 %2470 }
0x2023   :  { %6523 = vst [vmem:[#allocation197_spill] sm:$0xff] %v5255_v60  ;;  %v1315_v60 = vadd.f32 %v1311_v3, %v1220_v0 }
0x2025   :  { %v1410_v18 = vadd.f32 %v1406_v33, %v1315_v60 }
0x2026   :  { %v5257_v61 = vpop.permute.xlu0 %2490 }
0x2027   :  { %6524 = vst [vmem:[#allocation198_spill] sm:$0xff] %v5257_v61  ;;  %v1501_v61 = vsel %vm1500_vm15, %v4894_v2, %v4624_v48  ;;  %v1785_v2 = vsel %vm1784_vm13, %v5052_v56, %v4740_v15  ;;  %v2070_v56 = vsel %vm6330_vm10, %v5172_v44, %v4898_v6  ;;  %v6596_v48 = vld [vmem:[#allocation33_spill] sm:$0xff] }
0x2028   :  { %v1505_v46 = vadd.f32 %v1501_v61, %v1410_v18 }
0x202a   :  { %v5269_v27 = vpop.permute.xlu0 %2494  ;;  %v1599_v57 = vadd.f32 %v1595_v21, %v1505_v46 }
0x202b   :  { %6525 = vst [vmem:[#allocation199_spill] sm:$0xff] %v5269_v27 }
0x202c   :  { %v1694_v33 = vadd.f32 %v1690_v59, %v1599_v57  ;;  %v2355_v59 = vsel %vm6325_vm7, %v2349_v47, %v5056_v17  ;;  %v6572_v17 = vld [vmem:[#allocation175_spill] sm:$0xff] }
0x202e   :  { %v5277_v24 = vpop.permute.xlu0 %2514  ;;  %v1789_v61 = vadd.f32 %v1785_v2, %v1694_v33  ;;  %v2450_v2 = vsel %vm6316_vm6, %v2444_v25, %v5108_v43  ;;  %v5320_v25 = vld [vmem:[#allocation2 + $0x10] sm:$0xff]  ;;  %v6569_v43 = vld [vmem:[#allocation168_spill] sm:$0xff] }
0x2030   :  { %v1884_v46 = vadd.f32 %v1880_v22, %v1789_v61 }
0x2032   :  { %v5285_v60 = vpop.permute.xlu0 %2599  ;;  %v1979_v0 = vadd.f32 %v1975_v9, %v1884_v46 }
0x2034   :  { %v2074_v18 = vadd.f32 %v2070_v56, %v1979_v0 }
0x2036   :  { %v5296_v3 = vpop.permute.xlu0 %2884  ;;  %v2169_v21 = vadd.f32 %v2165_v62, %v2074_v18  ;;  %v3651_v62 = vmov 109   ;;  %v3652_v18 = vmov 110  }
0x2037   :  { %3458 = vset.pattern.permute.xlu0 %v3652_v18  ;;  %v6529_v18 = vld [vmem:[#allocation133_spill] sm:$0xff] }
0x2038   :  { %v2264_v44 = vadd.f32 %v2260_v58, %v2169_v21  ;;  %v1238_v58 = vsel %vm1215_vm0, %v4749_v63, %v4523_v29  ;;  %v1333_v21 = vsel %vm1310_vm2, %v4801_v28, %v4561_v23  ;;  %v1617_v63 = vsel %vm109_vm4, %v4959_v38, %v4669_v55 }
0x2039   :  { %v1712_v28 = vsel %vm1689_vm14, %v5013_v4, %v4705_v26  ;;  %v1997_v38 = vsel %vm1974_vm11, %v5160_v41, %v4859_v11  ;;  %v2092_v4 = vsel %vm6330_vm10, %v5176_v50, %v4911_v1 }
0x203a   :  { %v5306_v57 = vpop.permute.xlu0 %2518  ;;  %v2359_v33 = vadd.f32 %v2355_v59, %v2264_v44  ;;  %v1243_v59 = vadd.f32 %v1238_v58, %v4506_v8  ;;  %v1428_v44 = vsel %vm1405_vm3, %v4855_v37, %v4597_v32  ;;  %v1807_v37 = vsel %vm1784_vm13, %v5065_v35, %v4753_v36  ;;  %v6530_v58 = vld [vmem:[#allocation185_spill] sm:$0xff] }
0x203c   :  { %v2454_v22 = vadd.f32 %v2450_v2, %v2359_v33  ;;  %v1338_v2 = vadd.f32 %v1333_v21, %v1243_v59  ;;  %v1523_v33 = vsel %vm1500_vm15, %v4907_v42, %v4633_v54  ;;  %v1902_v42 = vsel %vm1879_vm12, %v5117_v40, %v4805_v39  ;;  %v6531_v59 = vld [vmem:[#allocation143_spill] sm:$0xff] }
0x203d   :  { %v2282_v40 = vsel %vm6329_vm8, %v6530_v58, %v6529_v18  ;;  %v2377_v41 = vsel %vm6325_vm7, %v5239_v51, %v6531_v59  ;;  %v2604_v58 = vmul.f32 %v5320_v25, %v5285_v60 }
0x2063   :  { %v5310_v5 = vpop.permute.xlu1 %2540  ;;  %v2539_v61 = vpop.permute.xlu0 %2538 }
0x2064   :  { %6526 = vst [vmem:[#allocation200_spill] sm:$0xff] %v5310_v5  ;;  %v2544_v9 = vsel %vm6317_vm1, %v2539_v61, %v5310_v5  ;;  %v6563_v5 = vld [vmem:[#allocation155_spill] sm:$0xff] }
0x2065   :  { %v5314_v12 = vadd.f32 %v2544_v9, %v2454_v22  ;;  %v1433_v22 = vadd.f32 %v1428_v44, %v1338_v2 }
0x2067   :  { %6527 = vst [vmem:[#allocation201_spill] sm:$0xff] %v5314_v12  ;;  %v1528_v61 = vadd.f32 %v1523_v33, %v1433_v22  ;;  %v5365_v2 = vpop.permute.xlu0 %2542  ;;  %v6533_v33 = vld [vmem:[#allocation153_spill] sm:$0xff] }
0x2068   :  { %v2472_v50 = vsel %vm6316_vm6, %v5253_v52, %v6533_v33  ;;  %v2602_v52 = vmul.f32 %v4846_v13, %v5285_v60  ;;  %v6560_v12 = vld [vmem:[#allocation145_spill] sm:$0xff] }
0x2069   :  { %v1622_v8 = vadd.f32 %v1617_v63, %v1528_v61 }
0x206b   :  { %v1717_v9 = vadd.f32 %v1712_v28, %v1622_v8 }
0x2074   :  { %v2552_v46 = vpop.permute.xlu1 %2551 }
0x2075   :  { %v2554_v56 = vmul.f32 %v4846_v13, %v2552_v46  ;;  %v2555_v47 = vmul.f32 %v4992_v45, %v2552_v46  ;;  %v2556_v0 = vmul.f32 %v5320_v25, %v2552_v46  ;;  %v1812_v46 = vadd.f32 %v1807_v37, %v1717_v9 }
0x2077   :  { %2562 = vrot.lane.b32.xlu1 %v2555_v47, %s3649_s12  ;;  %2560 = vrot.lane.b32.xlu0 %v2554_v56, %s3649_s12  ;;  %v1907_v56 = vadd.f32 %v1902_v42, %v1812_v46 }
0x2079   :  { %v2002_v47 = vadd.f32 %v1997_v38, %v1907_v56  ;;  %v2603_v38 = vmul.f32 %v4992_v45, %v5285_v60  ;;  %v3653_v56 = vmov 113  }
0x207b   :  { %2575 = vperm.xlu1 %3456, %v3702_v19   ;;  %2564 = vrot.lane.b32.xlu0 %v2556_v0, %s3649_s12  ;;  %v6528_v0 = vld [vmem:[#allocation173_spill] sm:$0xff] }
0x207c   :  { %v2187_v35 = vsel %vm6331_vm9, %v6528_v0, %v4963_v20  ;;  %6532 = vst [vmem:[#allocation173_spill] sm:$0xff] %v5365_v2  ;;  %v3657_v0 = vmov 118   ;;  %v6566_v2 = vld [vmem:[#allocation162_spill] sm:$0xff] }
0x207f   :  { %3457 = vset.pattern.permute.xlu1 %v3651_v62  ;;  %v2097_v62 = vadd.f32 %v2092_v4, %v2002_v47  ;;  %v3655_v4 = vmov 114   ;;  %v3656_v47 = vmov 121  }
0x2081   :  { %v2192_v21 = vadd.f32 %v2187_v35, %v2097_v62  ;;  %v6536_v35 = vld [vmem:[#allocation179_spill] sm:$0xff] }
0x2082   :  { %v2698_v62 = vmul.f32 %v4992_v45, %v6536_v35 }
0x2083   :  { %v2287_v44 = vadd.f32 %v2282_v40, %v2192_v21  ;;  %v3659_v40 = vmov 125   ;;  %v3660_v21 = vmov 122  }
0x2085   :  { %v2382_v22 = vadd.f32 %v2377_v41, %v2287_v44  ;;  %v6537_v41 = vld [vmem:[#allocation181_spill] sm:$0xff] }
0x2086   :  { %v2793_v44 = vmul.f32 %v4992_v45, %v6537_v41 }
0x2087   :  { %v2477_v63 = vadd.f32 %v2472_v50, %v2382_v22  ;;  %v5405_v50 = vld [vmem:[#allocation2] sm:$0xff]  ;;  %v3662_v22 = vmov 112  }
0x2088   :  { %v2697_v60 = vmul.f32 %v5405_v50, %v6536_v35 }
0x20e9   :  { %v5370_v61 = vpop.permute.xlu1 %2562  ;;  %v2561_v28 = vpop.permute.xlu0 %2560 }
0x20ea   :  { %6534 = vst [vmem:[#allocation133_spill] sm:$0xff] %v5370_v61  ;;  %v2566_v8 = vsel %vm6317_vm1, %v2561_v28, %v5370_v61  ;;  %v3663_v28 = vmov 126   ;;  %v6667_v61 = vld [vmem:[#allocation171_spill] sm:$0xff] }
0x20eb   :  { %v5374_v37 = vadd.f32 %v2566_v8, %v2477_v63  ;;  %v2887_v63 = vmul.f32 %v5405_v50, %v5296_v3  ;;  %v2699_v8 = vmul.f32 %v5320_v25, %v6536_v35 }
0x20ed   :  { %6535 = vst [vmem:[#allocation185_spill] sm:$0xff] %v5374_v37 }
0x20fa   :  { %v2576_v9 = vpop.permute.xlu1 %2575 }
0x20fb   :  { %v2578_v51 = vmul.f32 %v4846_v13, %v2576_v9  ;;  %v2579_v42 = vmul.f32 %v4992_v45, %v2576_v9  ;;  %v2580_v46 = vmul.f32 %v5320_v25, %v2576_v9  ;;  %v3654_v13 = vmov 117  }
0x20fc   :  { %v2889_v9 = vmul.f32 %v5320_v25, %v5296_v3 }
0x20fd   :  { %2586 = vrot.lane.b32.xlu1 %v2579_v42, %s3649_s12  ;;  %2584 = vrot.lane.b32.xlu0 %v2578_v51, %s3649_s12  ;;  %v6538_v51 = vld [vmem:[#allocation182_spill] sm:$0xff] }
0x20fe   :  { %v2983_v42 = vmul.f32 %v4992_v45, %v6538_v51  ;;  %v2984_v35 = vmul.f32 %v5320_v25, %v6538_v51 }
0x2101   :  { %2588 = vrot.lane.b32.xlu0 %v2580_v46, %s3649_s12  ;;  %2608 = vrot.lane.b32.xlu1 %v2602_v52, %s3649_s12  ;;  %v2792_v52 = vmul.f32 %v5405_v50, %v6537_v41  ;;  %v6539_v46 = vld [vmem:[#allocation184_spill] sm:$0xff] }
0x2105   :  { %2610 = vrot.lane.b32.xlu0 %v2603_v38, %s3649_s12  ;;  %2646 = vperm.xlu1 %3457, %v3702_v19   ;;  %v3077_v38 = vmul.f32 %v5405_v50, %v6539_v46 }
0x2109   :  { %2670 = vperm.xlu0 %3458, %v3702_v19   ;;  %3459 = vset.pattern.permute.xlu1 %v3653_v56  ;;  %v3666_v56 = vmov 108  }
0x210a   :  { %2741 = vperm.xlu1 %3459, %v3702_v19  }
0x210d   :  { %3461 = vset.pattern.permute.xlu0 %v3654_v13  ;;  %v2794_v13 = vmul.f32 %v5320_v25, %v6537_v41  ;;  %v6541_v41 = vld [vmem:[#allocation89_spill] sm:$0xff] }
0x210e   :  { %2836 = vperm.xlu0 %3461, %v3702_v19   ;;  %3460 = vset.pattern.permute.xlu1 %v3655_v4  ;;  %v3079_v4 = vmul.f32 %v5320_v25, %v6539_v46 }
0x210f   :  { %2765 = vperm.xlu1 %3460, %v3702_v19  }
0x2112   :  { %3463 = vset.pattern.permute.xlu0 %v3656_v47  ;;  %v2888_v47 = vmul.f32 %v4992_v45, %v5296_v3  ;;  %v3078_v3 = vmul.f32 %v4992_v45, %v6539_v46 }
0x2113   :  { %2931 = vperm.xlu0 %3463, %v3702_v19   ;;  %3462 = vset.pattern.permute.xlu1 %v3657_v0  ;;  %v2982_v0 = vmul.f32 %v5405_v50, %v6538_v51 }
0x2114   :  { %2860 = vperm.xlu1 %3462, %v3702_v19  }
0x2117   :  { %2705 = vrot.lane.b32.xlu0 %v2698_v62, %s3658_s13  ;;  %v3668_v62 = vmov 124  }
0x2118   :  { %2612 = vrot.lane.b32.xlu1 %v2604_v58, %s3649_s12  ;;  %3465 = vset.pattern.permute.xlu0 %v3659_v40  ;;  %v3669_v58 = vmov 116   ;;  %v3670_v40 = vmov 120  }
0x2119   :  { %3464 = vset.pattern.permute.xlu1 %v3660_v21  ;;  %v6540_v21 = vld [vmem:[#allocation67_spill] sm:$0xff] }
0x211b   :  { %3026 = vperm.xlu0 %3465, %v3702_v19  }
0x211c   :  { %2955 = vperm.xlu1 %3464, %v3702_v19  }
0x211f   :  { %2800 = vrot.lane.b32.xlu0 %v2793_v44, %s3661_s14  ;;  %v1262_v44 = vsel %vm1215_vm0, %v6541_v41, %v6540_v21  ;;  %v6554_v41 = vld [vmem:[#allocation125_spill] sm:$0xff] }
0x2120   :  { %2703 = vrot.lane.b32.xlu1 %v2697_v60, %s3658_s13  ;;  %3468 = vset.pattern.permute.xlu0 %v3662_v22  ;;  %v6542_v60 = vld [vmem:[#allocation70_spill] sm:$0xff] }
0x2121   :  { %3466 = vset.pattern.permute.xlu1 %v3663_v28  ;;  %v6543_v22 = vld [vmem:[#allocation98_spill] sm:$0xff]  ;;  %v6544_v28 = vld [vmem:[#allocation64_spill] sm:$0xff] }
0x2123   :  { %2893 = vrot.lane.b32.xlu0 %v2887_v63, %s3664_s15  ;;  %v1357_v63 = vsel %vm1310_vm2, %v6543_v22, %v6542_v60 }
0x2124   :  { %2707 = vrot.lane.b32.xlu1 %v2699_v8, %s3658_s13  ;;  %v1267_v8 = vadd.f32 %v1262_v44, %v6544_v28  ;;  %v6555_v28 = vld [vmem:[#allocation118_spill] sm:$0xff] }
0x2127   :  { %2897 = vrot.lane.b32.xlu0 %v2889_v9, %s3664_s15  ;;  %v6545_v9 = vld [vmem:[#allocation91_spill] sm:$0xff] }
0x2128   :  { %3050 = vperm.xlu1 %3466, %v3702_v19   ;;  %v1263_v51 = vsel %vm1215_vm0, %v6540_v21, %v6545_v9  ;;  %v6553_v21 = vld [vmem:[#allocation79_spill] sm:$0xff] }
0x2129   :  { %v1641_v44 = vsel %vm109_vm4, %v6554_v41, %v6553_v21 }
0x212b   :  { %2990 = vrot.lane.b32.xlu0 %v2983_v42, %s3665_s16  ;;  %v6546_v42 = vld [vmem:[#allocation73_spill] sm:$0xff] }
0x212c   :  { %2798 = vrot.lane.b32.xlu1 %v2792_v52, %s3661_s14  ;;  %v6547_v52 = vld [vmem:[#allocation107_spill] sm:$0xff] }
0x212d   :  { %3467 = vset.pattern.permute.xlu1 %v3666_v56  ;;  %v1452_v46 = vsel %vm1405_vm3, %v6547_v52, %v6546_v42  ;;  %v6548_v56 = vld [vmem:[#allocation100_spill] sm:$0xff]  ;;  %v6557_v52 = vld [vmem:[#allocation135_spill] sm:$0xff] }
0x212f   :  { %3083 = vrot.lane.b32.xlu0 %v3077_v38, %s3667_s0  ;;  %v1362_v38 = vadd.f32 %v1357_v63, %v1267_v8  ;;  %v6556_v8 = vld [vmem:[#allocation82_spill] sm:$0xff] }
0x2130   :  { %2802 = vrot.lane.b32.xlu1 %v2794_v13, %s3661_s14  ;;  %v1358_v13 = vsel %vm1310_vm2, %v6542_v60, %v6548_v56 }
0x2133   :  { %3087 = vrot.lane.b32.xlu0 %v3079_v4, %s3667_s0  ;;  %v6549_v4 = vld [vmem:[#allocation76_spill] sm:$0xff] }
0x2134   :  { %2895 = vrot.lane.b32.xlu1 %v2888_v47, %s3664_s15  ;;  %v6550_v47 = vld [vmem:[#allocation116_spill] sm:$0xff]  ;;  %v1548_v60 = vsel %vm1500_vm15, %v6549_v4, %v6555_v28 }
0x2137   :  { %2718 = vperm.xlu0 %3468, %v3702_v19  }
0x2138   :  { %2988 = vrot.lane.b32.xlu1 %v2982_v0, %s3665_s16  ;;  %v1547_v0 = vsel %vm1500_vm15, %v6550_v47, %v6549_v4  ;;  %v1736_v47 = vsel %vm1689_vm14, %v6557_v52, %v6556_v8 }
0x213b   :  { %3471 = vset.pattern.permute.xlu0 %v3668_v62 }
0x213c   :  { %2992 = vrot.lane.b32.xlu1 %v2984_v35, %s3665_s16  ;;  %v6551_v35 = vld [vmem:[#allocation66_spill] sm:$0xff] }
0x213d   :  { %v1268_v62 = vadd.f32 %v1263_v51, %v6551_v35  ;;  %v6559_v35 = vld [vmem:[#allocation90_spill] sm:$0xff] }
0x213e   :  { %v1831_v41 = vsel %vm1784_vm13, %v6560_v12, %v6559_v35 }
0x213f   :  { %v1363_v22 = vadd.f32 %v1358_v13, %v1268_v62  ;;  %v6561_v62 = vld [vmem:[#allocation137_spill] sm:$0xff] }
0x2140   :  { %3085 = vrot.lane.b32.xlu1 %v3078_v3, %s3667_s0  ;;  %v1457_v3 = vadd.f32 %v1452_v46, %v1362_v38  ;;  %v6558_v38 = vld [vmem:[#allocation127_spill] sm:$0xff]  ;;  %v1737_v4 = vsel %vm1689_vm14, %v6556_v8, %v6561_v62 }
0x2142   :  { %v1552_v63 = vadd.f32 %v1547_v0, %v1457_v3  ;;  %v6562_v3 = vld [vmem:[#allocation99_spill] sm:$0xff] }
0x2143   :  { %v1926_v52 = vsel %vm1879_vm12, %v6563_v5, %v6562_v3 }
0x2144   :  { %2623 = vperm.xlu1 %3467, %v3702_v19   ;;  %v1646_v46 = vadd.f32 %v1641_v44, %v1552_v63  ;;  %v6565_v63 = vld [vmem:[#allocation108_spill] sm:$0xff] }
0x2145   :  { %v2021_v12 = vsel %vm1974_vm11, %v6566_v2, %v6565_v63 }
0x2146   :  { %v1741_v0 = vadd.f32 %v1736_v47, %v1646_v46  ;;  %v6568_v46 = vld [vmem:[#allocation117_spill] sm:$0xff] }
0x2147   :  { %v2116_v5 = vsel %vm6330_vm10, %v6569_v43, %v6568_v46 }
0x2148   :  { %3469 = vset.pattern.permute.xlu1 %v3669_v58  ;;  %v6552_v58 = vld [vmem:[#allocation109_spill] sm:$0xff]  ;;  %v1836_v44 = vadd.f32 %v1831_v41, %v1741_v0  ;;  %v6571_v0 = vld [vmem:[#allocation126_spill] sm:$0xff] }
0x2149   :  { %2813 = vperm.xlu1 %3469, %v3702_v19   ;;  %v2211_v2 = vsel %vm6331_vm9, %v6572_v17, %v6571_v0 }
0x214a   :  { %v1931_v47 = vadd.f32 %v1926_v52, %v1836_v44  ;;  %v6574_v44 = vld [vmem:[#allocation136_spill] sm:$0xff] }
0x214b   :  { %v2306_v43 = vsel %vm6329_vm8, %v6575_v53, %v6574_v44  ;;  %v6580_v53 = vld [vmem:[#allocation198_spill] sm:$0xff] }
0x214c   :  { %v2026_v41 = vadd.f32 %v2021_v12, %v1931_v47  ;;  %v6577_v47 = vld [vmem:[#allocation146_spill] sm:$0xff] }
0x214d   :  { %3470 = vset.pattern.permute.xlu1 %v3670_v40  ;;  %v1453_v40 = vsel %vm1405_vm3, %v6546_v42, %v6552_v58  ;;  %v1642_v42 = vsel %vm109_vm4, %v6553_v21, %v6558_v38  ;;  %v2401_v17 = vsel %vm6325_vm7, %v5243_v30, %v6577_v47 }
0x214e   :  { %2908 = vperm.xlu1 %3470, %v3702_v19   ;;  %v1458_v51 = vadd.f32 %v1453_v40, %v1363_v22  ;;  %v6564_v22 = vld [vmem:[#allocation147_spill] sm:$0xff]  ;;  %v2121_v52 = vadd.f32 %v2116_v5, %v2026_v41  ;;  %v6578_v41 = vld [vmem:[#allocation188_spill] sm:$0xff] }
0x214f   :  { %v1832_v21 = vsel %vm1784_vm13, %v6559_v35, %v6564_v22 }
0x2150   :  { %v1553_v13 = vadd.f32 %v1548_v60, %v1458_v51  ;;  %v6567_v51 = vld [vmem:[#allocation157_spill] sm:$0xff]  ;;  %v2216_v12 = vadd.f32 %v2211_v2, %v2121_v52 }
0x2151   :  { %v1927_v8 = vsel %vm1879_vm12, %v6562_v3, %v6567_v51  ;;  %v6581_v52 = vld [vmem:[#allocation193_spill] sm:$0xff] }
0x2152   :  { %v1647_v40 = vadd.f32 %v1642_v42, %v1553_v13  ;;  %v6570_v13 = vld [vmem:[#allocation163_spill] sm:$0xff]  ;;  %v2311_v5 = vadd.f32 %v2306_v43, %v2216_v12 }
0x2153   :  { %v2022_v35 = vsel %vm1974_vm11, %v6565_v63, %v6570_v13 }
0x2154   :  { %v1742_v60 = vadd.f32 %v1737_v4, %v1647_v40  ;;  %v6573_v40 = vld [vmem:[#allocation169_spill] sm:$0xff] }
0x2155   :  { %v2117_v3 = vsel %vm6330_vm10, %v6568_v46, %v6573_v40  ;;  %v2307_v46 = vsel %vm6329_vm8, %v6574_v44, %v6578_v41 }
0x2156   :  { %v1837_v42 = vadd.f32 %v1832_v21, %v1742_v60  ;;  %v6576_v60 = vld [vmem:[#allocation176_spill] sm:$0xff] }
0x2157   :  { %v2212_v63 = vsel %vm6331_vm9, %v6571_v0, %v6576_v60  ;;  %v2402_v0 = vsel %vm6325_vm7, %v6577_v47, %v6581_v52  ;;  %vm6610_vm7 = vcmask 818176   ;;  %v6631_v52 = vld [vmem:[#allocation60_spill] sm:$0xff] }
0x2158   :  { %v1932_v4 = vadd.f32 %v1927_v8, %v1837_v42  ;;  %v5526_v42 = vpop.permute.xlu0 %2564 }
0x215a   :  { %v2027_v21 = vadd.f32 %v2022_v35, %v1932_v4  ;;  %v2496_v35 = vsel %vm6316_vm6, %v6580_v53, %v6579_v49  ;;  %v2406_v4 = vadd.f32 %v2401_v17, %v2311_v5  ;;  %v6585_v5 = vld [vmem:[#allocation25_spill] sm:$0xff] }
0x215c   :  { %v2122_v8 = vadd.f32 %v2117_v3, %v2027_v21  ;;  %v2501_v30 = vadd.f32 %v2496_v35, %v2406_v4  ;;  %v2497_v21 = vsel %vm6316_vm6, %v6579_v49, %v5269_v27  ;;  %v6587_v49 = vld [vmem:[#allocation8_spill] sm:$0xff]  ;;  %v6588_v4 = vld [vmem:[#allocation27_spill] sm:$0xff]  ;;  %vm6590_vm6 = vcmask 982016  }
0x215e   :  { %v2217_v2 = vadd.f32 %v2212_v63, %v2122_v8 }
0x2160   :  { %v2312_v6 = vadd.f32 %v2307_v46, %v2217_v2  ;;  %v6586_v46 = vld [vmem:[#allocation11_spill] sm:$0xff]  ;;  %v148_v2 = vmul.f32 %v5405_v50, %v6587_v49 }
0x2161   :  { %v241_v35 = vsel %vm170_vm5, %v6586_v46, %v6585_v5  ;;  %v6593_v46 = vld [vmem:[#allocation19_spill] sm:$0xff] }
0x2162   :  { %v2407_v12 = vadd.f32 %v2402_v0, %v2312_v6  ;;  %v150_v6 = vmul.f32 %v5320_v25, %v6587_v49  ;;  %v6589_v0 = vld [vmem:[#allocation15_spill] sm:$0xff] }
0x2164   :  { %v2502_v53 = vadd.f32 %v2497_v21, %v2407_v12  ;;  %v246_v21 = vadd.f32 %v241_v35, %v148_v2 }
0x216f   :  { %v2587_v3 = vpop.permute.xlu1 %2586  ;;  %v2585_v43 = vpop.permute.xlu0 %2584 }
0x2170   :  { %v2590_v44 = vsel %vm6317_vm1, %v2585_v43, %v2587_v3  ;;  %v6591_v43 = vld [vmem:[#allocation12_spill] sm:$0xff] }
0x2171   :  { %v5541_v31 = vadd.f32 %v2590_v44, %v2501_v30  ;;  %v336_v30 = vsel %vm6590_vm6, %v6589_v0, %v6588_v4  ;;  %v149_v0 = vmul.f32 %v4992_v45, %v6587_v49 }
0x2172   :  { %v341_v2 = vadd.f32 %v336_v30, %v246_v21  ;;  %v6600_v30 = vld [vmem:[#allocation37_spill] sm:$0xff] }
0x2173   :  { %6582 = vst [vmem:[#allocation143_spill] sm:$0xff] %v5541_v31  ;;  %v5543_v63 = vpop.permute.xlu0 %2588  ;;  %v5549_v8 = vpop.permute.xlu1 %2608 }
0x2174   :  { %6583 = vst [vmem:[#allocation153_spill] sm:$0xff] %v5543_v63  ;;  %v2591_v17 = vsel %vm6317_vm1, %v2587_v3, %v5543_v63  ;;  %v248_v3 = vadd.f32 %v6591_v43, %v150_v6  ;;  %vm6594_vm1 = vcmask 949248   ;;  %v6595_v6 = vld [vmem:[#allocation16_spill] sm:$0xff]  ;;  %v6616_v63 = vld [vmem:[#allocation42_spill] sm:$0xff] }
0x2175   :  { %v5547_v47 = vadd.f32 %v2591_v17, %v2502_v53  ;;  %v242_v53 = vsel %vm170_vm5, %v6585_v5, %v6591_v43  ;;  %v6592_v17 = vld [vmem:[#allocation31_spill] sm:$0xff]  ;;  %v337_v10 = vsel %vm6590_vm6, %v6588_v4, %v6595_v6  ;;  %vm6598_vm5 = vcmask 916480  }
0x2176   :  { %v431_v16 = vsel %vm6594_vm1, %v6593_v46, %v6592_v17  ;;  %v343_v35 = vadd.f32 %v6595_v6, %v248_v3  ;;  %v6597_v5 = vld [vmem:[#allocation23_spill] sm:$0xff]  ;;  %v6599_v46 = vld [vmem:[#allocation20_spill] sm:$0xff]  ;;  %v247_v14 = vadd.f32 %v242_v53, %v149_v0  ;;  %v6601_v3 = vld [vmem:[#allocation29_spill] sm:$0xff]  ;;  %vm6602_vm6 = vcmask 883712  }
0x2177   :  { %6584 = vst [vmem:[#allocation179_spill] sm:$0xff] %v5547_v47  ;;  %v5562_v44 = vpop.permute.xlu0 %2610  ;;  %v526_v43 = vsel %vm6598_vm5, %v6597_v5, %v6596_v48  ;;  %v436_v47 = vadd.f32 %v431_v16, %v341_v2  ;;  %v432_v49 = vsel %vm6594_vm1, %v6592_v17, %v6599_v46  ;;  %v621_v4 = vsel %vm6602_vm6, %v6601_v3, %v6600_v30  ;;  %v6603_v5 = vld [vmem:[#allocation24_spill] sm:$0xff]  ;;  %v6604_v53 = vld [vmem:[#allocation39_spill] sm:$0xff] }
0x2178   :  { %v438_v7 = vadd.f32 %v6599_v46, %v343_v35  ;;  %v342_v31 = vadd.f32 %v337_v10, %v247_v14  ;;  %v527_v16 = vsel %vm6598_vm5, %v6596_v48, %v6603_v5  ;;  %v6605_v0 = vld [vmem:[#allocation35_spill] sm:$0xff]  ;;  %vm6606_vm1 = vcmask 850944   ;;  %v6609_v10 = vld [vmem:[#allocation41_spill] sm:$0xff] }
0x2179   :  { %v531_v35 = vadd.f32 %v526_v43, %v436_v47  ;;  %v716_v17 = vsel %vm6606_vm1, %v6605_v0, %v6604_v53  ;;  %v5608_v47 = vld [vmem:[#allocation2 + $0x8] sm:$0xff]  ;;  %vm6612_vm5 = vmmov %vm6606_vm1  ;;  %v6614_v0 = vld [vmem:[#allocation47_spill] sm:$0xff]  ;;  %vm6617_vm1 = vcmask 818176  }
0x217a   :  { %v437_v46 = vadd.f32 %v432_v49, %v342_v31  ;;  %v6611_v49 = vld [vmem:[#allocation36_spill] sm:$0xff] }
0x217b   :  { %v626_v3 = vadd.f32 %v621_v4, %v531_v35  ;;  %v6613_v35 = vld [vmem:[#allocation45_spill] sm:$0xff] }
0x2184   :  { %v2647_v12 = vpop.permute.xlu1 %2646 }
0x2185   :  { %v2649_v15 = vmul.f32 %v5405_v50, %v2647_v12  ;;  %v2650_v34 = vmul.f32 %v4992_v45, %v2647_v12  ;;  %v2651_v21 = vmul.f32 %v5320_v25, %v2647_v12  ;;  %v6607_v12 = vld [vmem:[#allocation30_spill] sm:$0xff] }
0x2186   :  { %v622_v14 = vsel %vm6602_vm6, %v6600_v30, %v6607_v12  ;;  %v717_v30 = vsel %vm6612_vm5, %v6604_v53, %v6611_v49  ;;  %vm6620_vm6 = vcmask 752640  }
0x2187   :  { %2657 = vrot.lane.b32.xlu1 %v2650_v34, %s3658_s13  ;;  %2655 = vrot.lane.b32.xlu0 %v2649_v15, %s3658_s13  ;;  %v533_v15 = vadd.f32 %v6603_v5, %v438_v7  ;;  %v6608_v7 = vld [vmem:[#allocation43_spill] sm:$0xff] }
0x2188   :  { %v2671_v45 = vpop.permute.xlu0 %2670  ;;  %v811_v48 = vsel %vm6610_vm7, %v6609_v10, %v6608_v7  ;;  %vm6615_vm7 = vcmask 785408  }
0x2189   :  { %v2673_v6 = vmul.f32 %v5405_v50, %v2671_v45  ;;  %v2742_v34 = vpop.permute.xlu1 %2741  ;;  %v628_v2 = vadd.f32 %v6607_v12, %v533_v15  ;;  %v2674_v43 = vmul.f32 %v5608_v47, %v2671_v45  ;;  %v721_v15 = vadd.f32 %v716_v17, %v626_v3  ;;  %vm6622_vm5 = vmmov %vm6615_vm7 }
0x218a   :  { %v906_v12 = vsel %vm6615_vm7, %v6614_v0, %v6613_v35  ;;  %v812_v17 = vsel %vm6617_vm1, %v6608_v7, %v6616_v63  ;;  %v2744_v3 = vmul.f32 %v5405_v50, %v2742_v34  ;;  %vm6625_vm7 = vcmask 719872   ;;  %vm6627_vm1 = vmmov %vm6620_vm6 }
0x218b   :  { %2659 = vrot.lane.b32.xlu0 %v2651_v21, %s3658_s13  ;;  %2679 = vrot.lane.b32.xlu1 %v2673_v6, %s3658_s13  ;;  %v2675_v21 = vmul.f32 %v5320_v25, %v2671_v45  ;;  %v532_v6 = vadd.f32 %v527_v16, %v437_v46  ;;  %v723_v4 = vadd.f32 %v6611_v49, %v628_v2  ;;  %v6618_v2 = vld [vmem:[#allocation49_spill] sm:$0xff] }
0x218c   :  { %v816_v10 = vadd.f32 %v811_v48, %v721_v15  ;;  %v6619_v46 = vld [vmem:[#allocation53_spill] sm:$0xff] }
0x218d   :  { %v5612_v5 = vpop.permute.xlu0 %2836  ;;  %v627_v45 = vadd.f32 %v622_v14, %v532_v6  ;;  %v818_v16 = vadd.f32 %v6616_v63, %v723_v4  ;;  %v1001_v53 = vsel %vm6620_vm6, %v6619_v46, %v6618_v2  ;;  %v6624_v6 = vld [vmem:[#allocation59_spill] sm:$0xff]  ;;  %vm6630_vm6 = vcmask 687104  }
0x218e   :  { %v2766_v31 = vpop.permute.xlu1 %2765  ;;  %v911_v0 = vadd.f32 %v906_v12, %v816_v10  ;;  %v6629_v10 = vld [vmem:[#allocation83_spill] sm:$0xff]  ;;  %v2745_v46 = vmul.f32 %v5608_v47, %v2742_v34 }
0x218f   :  { %2681 = vrot.lane.b32.xlu0 %v2674_v43, %s3658_s13  ;;  %2683 = vrot.lane.b32.xlu1 %v2675_v21, %s3658_s13  ;;  %v722_v49 = vadd.f32 %v717_v30, %v627_v45  ;;  %v6621_v43 = vld [vmem:[#allocation48_spill] sm:$0xff]  ;;  %v6623_v21 = vld [vmem:[#allocation51_spill] sm:$0xff]  ;;  %v6626_v30 = vld [vmem:[#allocation54_spill] sm:$0xff] }
0x2190   :  { %v907_v14 = vsel %vm6622_vm5, %v6613_v35, %v6621_v43  ;;  %v913_v48 = vadd.f32 %v6621_v43, %v818_v16  ;;  %v1096_v63 = vsel %vm6625_vm7, %v6624_v6, %v6623_v21  ;;  %v1006_v4 = vadd.f32 %v1001_v53, %v911_v0  ;;  %v6628_v45 = vld [vmem:[#allocation55_spill] sm:$0xff]  ;;  %vm6632_vm5 = vmmov %vm6625_vm7 }
0x2191   :  { %v817_v15 = vadd.f32 %v812_v17, %v722_v49  ;;  %v1002_v12 = vsel %vm6627_vm1, %v6618_v2, %v6626_v30  ;;  %v1191_v16 = vsel %vm6630_vm6, %v6629_v10, %v6628_v45  ;;  %v2746_v43 = vmul.f32 %v5320_v25, %v2742_v34  ;;  %v6634_v2 = vld [vmem:[#allocation92_spill] sm:$0xff]  ;;  %vm6636_vm7 = vmmov %vm6630_vm6 }
0x2192   :  { %v5631_v27 = vpop.permute.xlu0 %2931  ;;  %v1008_v35 = vadd.f32 %v6626_v30, %v913_v48  ;;  %v1097_v17 = vsel %vm6632_vm5, %v6623_v21, %v6631_v52  ;;  %v6639_v30 = vld [vmem:[#allocation101_spill] sm:$0xff]  ;;  %v2768_v10 = vmul.f32 %v5405_v50, %v2766_v31  ;;  %vm6673_vm1 = vcmask 261120  }
0x2193   :  { %v5640_v7 = vpop.permute.xlu1 %2860  ;;  %3003 = vperm.xlu0 %3471, %v3702_v19   ;;  %2750 = vrot.lane.b32.xlu1 %v2744_v3, %s3661_s14  ;;  %v912_v6 = vadd.f32 %v907_v14, %v817_v15  ;;  %v1101_v19 = vadd.f32 %v1096_v63, %v1006_v4  ;;  %v6633_v3 = vld [vmem:[#allocation68_spill] sm:$0xff]  ;;  %v6635_v63 = vld [vmem:[#allocation85_spill] sm:$0xff]  ;;  %v6637_v15 = vmov 127   ;;  %v6638_v4 = vld [vmem:[#allocation71_spill] sm:$0xff]  ;;  %vm6676_vm6 = vcmask 228352  }
0x2194   :  { %v1103_v53 = vadd.f32 %v6631_v52, %v1008_v35  ;;  %v1286_v49 = vsel %vm1215_vm0, %v6634_v2, %v6633_v3  ;;  %v1192_v21 = vsel %vm6636_vm7, %v6628_v45, %v6635_v63  ;;  %v1381_v35 = vsel %vm1310_vm2, %v6639_v30, %v6638_v4  ;;  %vm6678_vm5 = vmmov %vm6673_vm1 }
0x2195   :  { %v1007_v34 = vadd.f32 %v1002_v12, %v912_v6  ;;  %v1196_v14 = vadd.f32 %v1191_v16, %v1101_v19  ;;  %v6640_v12 = vld [vmem:[#allocation94_spill] sm:$0xff]  ;;  %vm2638_vm7 = vcmask 162816  }
0x2196   :  { %v5660_v0 = vpop.permute.xlu0 %2705  ;;  %v1198_v52 = vadd.f32 %v6635_v63, %v1103_v53  ;;  %v1287_v16 = vsel %vm1215_vm0, %v6633_v3, %v6640_v12  ;;  %v6641_v6 = vld [vmem:[#allocation74_spill] sm:$0xff] }
0x2197   :  { %v5662_v48 = vpop.permute.xlu1 %2612  ;;  %2754 = vrot.lane.b32.xlu0 %v2746_v43, %s3661_s14  ;;  %2752 = vrot.lane.b32.xlu1 %v2745_v46, %s3661_s14  ;;  %v2769_v43 = vmul.f32 %v5608_v47, %v2766_v31  ;;  %v1102_v2 = vadd.f32 %v1097_v17, %v1007_v34  ;;  %v1291_v46 = vadd.f32 %v1286_v49, %v1196_v14  ;;  %v6642_v19 = vld [vmem:[#allocation110_spill] sm:$0xff]  ;;  %v6643_v17 = vld [vmem:[#allocation103_spill] sm:$0xff]  ;;  %v6644_v34 = vld [vmem:[#allocation77_spill] sm:$0xff] }
0x2198   :  { %3472 = vset.pattern.permute.xlu0 %v6637_v15  ;;  %v1293_v45 = vadd.f32 %v6640_v12, %v1198_v52  ;;  %v1476_v53 = vsel %vm1405_vm3, %v6642_v19, %v6641_v6  ;;  %v1382_v49 = vsel %vm1310_vm2, %v6638_v4, %v6643_v17  ;;  %v6645_v14 = vld [vmem:[#allocation119_spill] sm:$0xff]  ;;  %v2839_v12 = vmul.f32 %v5405_v50, %v5612_v5 }
0x2199   :  { %v1197_v15 = vadd.f32 %v1192_v21, %v1102_v2  ;;  %v1386_v30 = vadd.f32 %v1381_v35, %v1291_v46  ;;  %v1571_v52 = vsel %vm1500_vm15, %v6645_v14, %v6644_v34  ;;  %v2770_v19 = vmul.f32 %v5320_v25, %v2766_v31  ;;  %v6646_v35 = vld [vmem:[#allocation112_spill] sm:$0xff] }
0x219a   :  { %v1388_v3 = vadd.f32 %v6643_v17, %v1293_v45  ;;  %v1477_v2 = vsel %vm1405_vm3, %v6641_v6, %v6646_v35  ;;  %v6647_v46 = vld [vmem:[#allocation80_spill] sm:$0xff] }
0x219b   :  { %v5683_v63 = vpop.permute.xlu1 %2955  ;;  %2776 = vrot.lane.b32.xlu0 %v2769_v43, %s3661_s14  ;;  %2774 = vrot.lane.b32.xlu1 %v2768_v10, %s3661_s14  ;;  %v5697_v43 = vpop.permute.xlu0 %3026  ;;  %v1292_v10 = vadd.f32 %v1287_v16, %v1197_v15  ;;  %v1481_v21 = vadd.f32 %v1476_v53, %v1386_v30  ;;  %v6648_v45 = vld [vmem:[#allocation128_spill] sm:$0xff]  ;;  %v6649_v16 = vld [vmem:[#allocation121_spill] sm:$0xff]  ;;  %v6651_v30 = vld [vmem:[#allocation138_spill] sm:$0xff] }
0x219c   :  { %v1483_v4 = vadd.f32 %v6646_v35, %v1388_v3  ;;  %v1665_v17 = vsel %vm109_vm4, %v6648_v45, %v6647_v46  ;;  %v1572_v53 = vsel %vm1500_vm15, %v6644_v34, %v6649_v16  ;;  %v6650_v15 = vld [vmem:[#allocation84_spill] sm:$0xff]  ;;  %v2840_v35 = vmul.f32 %v5608_v47, %v5612_v5 }
0x219d   :  { %v1387_v31 = vadd.f32 %v1382_v49, %v1292_v10  ;;  %v1576_v41 = vadd.f32 %v1571_v52, %v1481_v21  ;;  %v1760_v3 = vsel %vm1689_vm14, %v6651_v30, %v6650_v15  ;;  %v6652_v49 = vld [vmem:[#allocation130_spill] sm:$0xff]  ;;  %v6653_v10 = vld [vmem:[#allocation93_spill] sm:$0xff]  ;;  %v6654_v21 = vld [vmem:[#allocation148_spill] sm:$0xff] }
0x219e   :  { %v1578_v6 = vadd.f32 %v6649_v16, %v1483_v4  ;;  %v1666_v52 = vsel %vm109_vm4, %v6647_v46, %v6652_v49  ;;  %v1855_v4 = vsel %vm1784_vm13, %v6654_v21, %v6653_v10  ;;  %v2863_v21 = vmul.f32 %v5405_v50, %v5640_v7 }
0x219f   :  { %v5706_v14 = vpop.permute.xlu1 %2703  ;;  %2778 = vrot.lane.b32.xlu1 %v2770_v19, %s3661_s14  ;;  %2845 = vrot.lane.b32.xlu0 %v2839_v12, %s3664_s15  ;;  %v2841_v19 = vmul.f32 %v5320_v25, %v5612_v5  ;;  %v1482_v45 = vadd.f32 %v1477_v2, %v1387_v31  ;;  %v1670_v12 = vadd.f32 %v1665_v17, %v1576_v41  ;;  %v5728_v16 = vpop.permute.xlu0 %2800  ;;  %v6655_v2 = vld [vmem:[#allocation140_spill] sm:$0xff]  ;;  %v6656_v31 = vld [vmem:[#allocation102_spill] sm:$0xff] }
0x21a0   :  { %v1672_v34 = vadd.f32 %v6652_v49, %v1578_v6  ;;  %v1761_v46 = vsel %vm1689_vm14, %v6650_v15, %v6655_v2  ;;  %v6657_v6 = vld [vmem:[#allocation158_spill] sm:$0xff] }
0x21a1   :  { %v1577_v5 = vadd.f32 %v1572_v53, %v1482_v45  ;;  %v1765_v41 = vadd.f32 %v1760_v3, %v1670_v12  ;;  %v1950_v49 = vsel %vm1879_vm12, %v6657_v6, %v6656_v31  ;;  %v6658_v53 = vld [vmem:[#allocation150_spill] sm:$0xff]  ;;  %v6659_v45 = vld [vmem:[#allocation111_spill] sm:$0xff]  ;;  %v6660_v12 = vld [vmem:[#allocation164_spill] sm:$0xff] }
0x21a2   :  { %v1767_v17 = vadd.f32 %v6655_v2, %v1672_v34  ;;  %v1856_v3 = vsel %vm1784_vm13, %v6653_v10, %v6658_v53  ;;  %v2045_v34 = vsel %vm1974_vm11, %v6660_v12, %v6659_v45 }
0x21a3   :  { %v5730_v30 = vpop.permute.xlu1 %2707  ;;  %2847 = vrot.lane.b32.xlu1 %v2840_v35, %s3664_s15  ;;  %2849 = vrot.lane.b32.xlu0 %v2841_v19, %s3664_s15  ;;  %v2864_v35 = vmul.f32 %v5608_v47, %v5640_v7  ;;  %v1671_v60 = vadd.f32 %v1666_v52, %v1577_v5  ;;  %v1860_v19 = vadd.f32 %v1855_v4, %v1765_v41  ;;  %v6661_v52 = vld [vmem:[#allocation159_spill] sm:$0xff]  ;;  %v6662_v5 = vld [vmem:[#allocation120_spill] sm:$0xff]  ;;  %v6663_v41 = vld [vmem:[#allocation170_spill] sm:$0xff]  ;;  %v5767_v12 = vpop.permute.xlu0 %2893 }
0x21a4   :  { %v1862_v15 = vadd.f32 %v6658_v53, %v1767_v17  ;;  %v1951_v4 = vsel %vm1879_vm12, %v6656_v31, %v6661_v52  ;;  %v2140_v17 = vsel %vm6330_vm10, %v6663_v41, %v6662_v5  ;;  %v2934_v53 = vmul.f32 %v5405_v50, %v5631_v27 }
0x21a5   :  { %v1766_v6 = vadd.f32 %v1761_v46, %v1671_v60  ;;  %v1955_v37 = vadd.f32 %v1950_v49, %v1860_v19  ;;  %v6664_v49 = vld [vmem:[#allocation165_spill] sm:$0xff] }
0x21a6   :  { %v1957_v10 = vadd.f32 %v6661_v52, %v1862_v15  ;;  %v2046_v31 = vsel %vm1974_vm11, %v6659_v45, %v6664_v49  ;;  %v6665_v19 = vld [vmem:[#allocation129_spill] sm:$0xff]  ;;  %v6666_v15 = vld [vmem:[#allocation178_spill] sm:$0xff]  ;;  %v6668_v45 = vld [vmem:[#allocation139_spill] sm:$0xff] }
0x21a7   :  { %v5752_v2 = vpop.permute.xlu1 %3050  ;;  %2869 = vrot.lane.b32.xlu1 %v2863_v21, %s3664_s15  ;;  %2871 = vrot.lane.b32.xlu0 %v2864_v35, %s3664_s15  ;;  %v2865_v21 = vmul.f32 %v5320_v25, %v5640_v7  ;;  %v1861_v60 = vadd.f32 %v1856_v3, %v1766_v6  ;;  %v2050_v46 = vadd.f32 %v2045_v34, %v1955_v37  ;;  %v6669_v34 = vld [vmem:[#allocation189_spill] sm:$0xff] }
0x21a8   :  { %v2052_v35 = vadd.f32 %v6664_v49, %v1957_v10  ;;  %v2235_v52 = vsel %vm6331_vm9, %v6666_v15, %v6665_v19  ;;  %v2141_v37 = vsel %vm6330_vm10, %v6662_v5, %v6667_v61  ;;  %v2330_v6 = vsel %vm6329_vm8, %v6669_v34, %v6668_v45 }
0x21a9   :  { %v1956_v7 = vadd.f32 %v1951_v4, %v1861_v60  ;;  %v2145_v40 = vadd.f32 %v2140_v17, %v2050_v46  ;;  %v2935_v10 = vmul.f32 %v5608_v47, %v5631_v27  ;;  %v6670_v4 = vld [vmem:[#allocation180_spill] sm:$0xff]  ;;  %v6671_v60 = vld [vmem:[#allocation149_spill] sm:$0xff]  ;;  %v2958_v34 = vmul.f32 %v5405_v50, %v5683_v63 }
0x21aa   :  { %v2147_v3 = vadd.f32 %v6667_v61, %v2052_v35  ;;  %v2236_v17 = vsel %vm6331_vm9, %v6665_v19, %v6670_v4  ;;  %v6672_v61 = vld [vmem:[#allocation194_spill] sm:$0xff]  ;;  %v5796_v35 = vpop.permute.xlu0 %2897 }
0x21ab   :  { %v2799_v41 = vpop.permute.xlu1 %2798  ;;  %2873 = vrot.lane.b32.xlu1 %v2865_v21, %s3664_s15  ;;  %2940 = vrot.lane.b32.xlu0 %v2934_v53, %s3665_s16  ;;  %v2936_v21 = vmul.f32 %v5320_v25, %v5631_v27  ;;  %v2051_v49 = vadd.f32 %v2046_v31, %v1956_v7  ;;  %v2240_v53 = vadd.f32 %v2235_v52, %v2145_v40  ;;  %v6674_v40 = vld [vmem:[#allocation190_spill] sm:$0xff]  ;;  %v6675_v7 = vld [vmem:[#allocation177_spill] sm:$0xff] }
0x21ac   :  { %v2242_v5 = vadd.f32 %v6670_v4, %v2147_v3  ;;  %v2425_v46 = vsel %vm6673_vm1, %v6672_v61, %v6671_v60  ;;  %v2331_v52 = vsel %vm6329_vm8, %v6668_v45, %v6674_v40  ;;  %v2520_v3 = vsel %vm6676_vm6, %v5277_v24, %v6675_v7  ;;  %vm6679_vm1 = vmmov %vm6676_vm6 }
0x21ad   :  { %v2146_v27 = vadd.f32 %v2141_v37, %v2051_v49  ;;  %v2335_v31 = vadd.f32 %v2330_v6, %v2240_v53  ;;  %v6677_v37 = vld [vmem:[#allocation195_spill] sm:$0xff]  ;;  %vm6680_vm6 = vcmask 195584   ;;  %v3029_v61 = vmul.f32 %v5405_v50, %v5697_v43 }
0x21ae   :  { %v2337_v19 = vadd.f32 %v6674_v40, %v2242_v5  ;;  %v2426_v6 = vsel %vm6678_vm5, %v6671_v60, %v6677_v37  ;;  %v2521_v5 = vsel %vm6679_vm1, %v6675_v7, %v5306_v57  ;;  %vm2733_vm5 = vcmask 130048  }
0x21af   :  { %v2803_v15 = vpop.permute.xlu1 %2802  ;;  %2942 = vrot.lane.b32.xlu1 %v2935_v10, %s3665_s16  ;;  %2944 = vrot.lane.b32.xlu0 %v2936_v21, %s3665_s16  ;;  %v2959_v10 = vmul.f32 %v5608_v47, %v5683_v63  ;;  %v2241_v4 = vadd.f32 %v2236_v17, %v2146_v27  ;;  %v2430_v21 = vadd.f32 %v2425_v46, %v2335_v31  ;;  %v2991_v27 = vpop.permute.xlu0 %2990  ;;  %vm2828_vm1 = vcmask 97280  }
0x21b0   :  { %v2432_v45 = vadd.f32 %v6677_v37, %v2337_v19  ;;  %v2614_v17 = vsel %vm6680_vm6, %v5549_v8, %v5562_v44  ;;  %v2960_v46 = vmul.f32 %v5320_v25, %v5683_v63  ;;  %v2709_v40 = vsel %vm2638_vm7, %v5706_v14, %v5660_v0 }
0x21b1   :  { %v2336_v24 = vadd.f32 %v2331_v52, %v2241_v4  ;;  %v2525_v53 = vadd.f32 %v2520_v3, %v2430_v21  ;;  %v2615_v63 = vsel %vm6680_vm6, %v5562_v44, %v5662_v48  ;;  %v2804_v7 = vsel %vm2733_vm5, %v2799_v41, %v5728_v16 }
0x21b2   :  { %v2527_v60 = vadd.f32 %v5306_v57, %v2432_v45  ;;  %vm2923_vm8 = vcmask 64512   ;;  %v3030_v14 = vmul.f32 %v5608_v47, %v5697_v43  ;;  %v3031_v3 = vmul.f32 %v5320_v25, %v5697_v43 }
0x21b3   :  { %v2896_v49 = vpop.permute.xlu1 %2895  ;;  %2964 = vrot.lane.b32.xlu1 %v2958_v34, %s3665_s16  ;;  %2966 = vrot.lane.b32.xlu0 %v2959_v10, %s3665_s16  ;;  %v2431_v31 = vadd.f32 %v2426_v6, %v2336_v24  ;;  %v2619_v52 = vadd.f32 %v2614_v17, %v2525_v53  ;;  %v2710_v4 = vsel %vm2638_vm7, %v5660_v0, %v5730_v30  ;;  %v3084_v41 = vpop.permute.xlu0 %3083  ;;  %vm3018_vm6 = vcmask 31744  }
0x21b4   :  { %v2621_v19 = vadd.f32 %v5662_v48, %v2527_v60  ;;  %v2899_v44 = vsel %vm2828_vm1, %v5767_v12, %v2896_v49  ;;  %v2805_v43 = vsel %vm2733_vm5, %v5728_v16, %v2803_v15  ;;  %v3053_v0 = vmul.f32 %v5405_v50, %v5752_v2 }
0x21b5   :  { %v2526_v57 = vadd.f32 %v2521_v5, %v2431_v31  ;;  %v2714_v34 = vadd.f32 %v2709_v40, %v2619_v52  ;;  %v2900_v53 = vsel %vm2828_vm1, %v2896_v49, %v5796_v35 }
0x21b6   :  { %v2716_v10 = vadd.f32 %v5730_v30, %v2621_v19  ;;  %v3054_v30 = vmul.f32 %v5608_v47, %v5752_v2 }
0x21b7   :  { %v2989_v8 = vpop.permute.xlu1 %2988  ;;  %2968 = vrot.lane.b32.xlu1 %v2960_v46, %s3665_s16  ;;  %3035 = vrot.lane.b32.xlu0 %v3029_v61, %s3667_s0  ;;  %v2620_v48 = vadd.f32 %v2615_v63, %v2526_v57  ;;  %v2809_v21 = vadd.f32 %v2804_v7, %v2714_v34  ;;  %v3055_v46 = vmul.f32 %v5320_v25, %v5752_v2  ;;  %v3088_v31 = vpop.permute.xlu0 %3087 }
0x21b8   :  { %v2811_v37 = vadd.f32 %v2803_v15, %v2716_v10  ;;  %v2994_v45 = vsel %vm2923_vm8, %v2989_v8, %v2991_v27 }
0x21b9   :  { %v2715_v24 = vadd.f32 %v2710_v4, %v2620_v48  ;;  %v2904_v12 = vadd.f32 %v2899_v44, %v2809_v21 }
0x21ba   :  { %v2906_v60 = vadd.f32 %v5796_v35, %v2811_v37 }
0x21bb   :  { %v2993_v6 = vpop.permute.xlu1 %2992  ;;  %3037 = vrot.lane.b32.xlu1 %v3030_v14, %s3667_s0  ;;  %3039 = vrot.lane.b32.xlu0 %v3031_v3, %s3667_s0  ;;  %v2810_v5 = vadd.f32 %v2805_v43, %v2715_v24  ;;  %v2999_v17 = vadd.f32 %v2994_v45, %v2904_v12  ;;  %v2719_v7 = vpop.permute.xlu0 %2718  ;;  %v6681_v24 = vld [vmem:[#allocation6_spill] sm:$0xff]  ;;  %v6682_v12 = vld [vmem:[#allocation9_spill] sm:$0xff] }
0x21bc   :  { %v2995_v16 = vsel %vm2923_vm8, %v2991_v27, %v2993_v6  ;;  %v3001_v52 = vadd.f32 %v2993_v6, %v2906_v60  ;;  %v2721_v14 = vmul.f32 %v5405_v50, %v2719_v7  ;;  %v2722_v10 = vmul.f32 %v5608_v47, %v2719_v7 }
0x21bd   :  { %v2905_v40 = vadd.f32 %v2900_v53, %v2810_v5  ;;  %v2723_v4 = vmul.f32 %v5320_v25, %v2719_v7  ;;  %v6683_v5 = vld [vmem:[#allocation13_spill] sm:$0xff] }
0x21be   :  { %v3096_v35 = vadd.f32 %v3088_v31, %v3001_v52  ;;  %v6686_v52 = vld [vmem:[#allocation7_spill] sm:$0xff] }
0x21bf   :  { %v3086_v61 = vpop.permute.xlu1 %3085  ;;  %3059 = vrot.lane.b32.xlu1 %v3053_v0, %s3667_s0  ;;  %3061 = vrot.lane.b32.xlu0 %v3054_v30, %s3667_s0  ;;  %v3000_v8 = vadd.f32 %v2995_v16, %v2905_v40  ;;  %v130_v0 = vmul.f32 %v5320_v25, %v6681_v24  ;;  %v6684_v16 = vld [vmem:[#allocation17_spill] sm:$0xff] }
0x21c0   :  { %v3089_v15 = vsel %vm3018_vm6, %v3084_v41, %v3086_v61  ;;  %v3090_v19 = vsel %vm3018_vm6, %v3086_v61, %v3088_v31 }
0x21c1   :  { %v3094_v49 = vadd.f32 %v3089_v15, %v2999_v17  ;;  %v3095_v57 = vadd.f32 %v3090_v19, %v3000_v8  ;;  %v200_v53 = vadd.f32 %v6682_v12, %v130_v0  ;;  %v6687_v19 = vld [vmem:[#allocation26_spill] sm:$0xff]  ;;  %v6696_v0 = vld [vmem:[#allocation28_spill] sm:$0xff] }
0x21c3   :  { %3063 = vrot.lane.b32.xlu1 %v3055_v46, %s3667_s0  ;;  %3116 = vrot.lane.b32.xlu0 %v3094_v49, %s3671_s1  ;;  %v2624_v27 = vpop.permute.xlu1 %2623  ;;  %v295_v17 = vadd.f32 %v6683_v5, %v200_v53  ;;  %v6685_v46 = vld [vmem:[#allocation21_spill] sm:$0xff]  ;;  %v140_v49 = vmul.f32 %v5320_v25, %v6686_v52 }
0x21c4   :  { %v2626_v2 = vmul.f32 %v5405_v50, %v2624_v27  ;;  %v2627_v63 = vmul.f32 %v5608_v47, %v2624_v27  ;;  %v2628_v3 = vmul.f32 %v5320_v25, %v2624_v27  ;;  %v6697_v53 = vld [vmem:[#allocation57_spill] sm:$0xff] }
0x21c5   :  { %v390_v15 = vadd.f32 %v6684_v16, %v295_v17  ;;  %v6698_v16 = vld [vmem:[#allocation34_spill] sm:$0xff] }
0x21c7   :  { %3120 = vrot.lane.b32.xlu0 %v3096_v35, %s3671_s1  ;;  %3118 = vrot.lane.b32.xlu1 %v3095_v57, %s3671_s1  ;;  %v485_v31 = vadd.f32 %v6685_v46, %v390_v15  ;;  %v6688_v35 = vld [vmem:[#allocation10_spill] sm:$0xff] }
0x21c8   :  { %v2814_v34 = vpop.permute.xlu1 %2813  ;;  %v224_v57 = vadd.f32 %v6688_v35, %v140_v49  ;;  %v6700_v49 = vld [vmem:[#allocation88_spill] sm:$0xff] }
0x21c9   :  { %v2816_v44 = vmul.f32 %v5405_v50, %v2814_v34  ;;  %v2817_v48 = vmul.f32 %v5608_v47, %v2814_v34  ;;  %v2818_v41 = vmul.f32 %v5320_v25, %v2814_v34  ;;  %v580_v8 = vadd.f32 %v6687_v19, %v485_v31  ;;  %v6691_v34 = vld [vmem:[#allocation38_spill] sm:$0xff] }
0x21ca   :  { %v6699_v31 = vld [vmem:[#allocation62_spill] sm:$0xff]  ;;  %v1239_v19 = vsel %vm1215_vm0, %v4523_v29, %v6700_v49 }
0x21cb   :  { %2634 = vrot.lane.b32.xlu0 %v2627_v63, %s3658_s13  ;;  %2632 = vrot.lane.b32.xlu1 %v2626_v2, %s3658_s13  ;;  %v6689_v2 = vld [vmem:[#allocation32_spill] sm:$0xff] }
0x21cc   :  { %v675_v63 = vadd.f32 %v6689_v2, %v580_v8 }
0x21cd   :  { %v2909_v21 = vpop.permute.xlu1 %2908 }
0x21ce   :  { %v2911_v37 = vmul.f32 %v5405_v50, %v2909_v21  ;;  %v2912_v6 = vmul.f32 %v5608_v47, %v2909_v21  ;;  %v2913_v43 = vmul.f32 %v5320_v25, %v2909_v21  ;;  %v6694_v25 = vld [vmem:[#allocation22_spill] sm:$0xff] }
0x21cf   :  { %2636 = vrot.lane.b32.xlu1 %v2628_v3, %s3658_s13  ;;  %2727 = vrot.lane.b32.xlu0 %v2721_v14, %s3661_s14  ;;  %v6690_v14 = vld [vmem:[#allocation14_spill] sm:$0xff] }
0x21d0   :  { %v319_v3 = vadd.f32 %v6690_v14, %v224_v57  ;;  %v6701_v57 = vld [vmem:[#allocation40_spill] sm:$0xff]  ;;  %v6702_v14 = vld [vmem:[#allocation97_spill] sm:$0xff] }
0x21d3   :  { %2729 = vrot.lane.b32.xlu1 %v2722_v10, %s3661_s14  ;;  %2731 = vrot.lane.b32.xlu0 %v2723_v4, %s3661_s14  ;;  %v770_v10 = vadd.f32 %v6691_v34, %v675_v63  ;;  %v6692_v4 = vld [vmem:[#allocation18_spill] sm:$0xff] }
0x21d7   :  { %2822 = vrot.lane.b32.xlu1 %v2816_v44, %s3664_s15  ;;  %2824 = vrot.lane.b32.xlu0 %v2817_v48, %s3664_s15  ;;  %v414_v44 = vadd.f32 %v6692_v4, %v319_v3  ;;  %v6693_v48 = vld [vmem:[#allocation44_spill] sm:$0xff]  ;;  %v1334_v3 = vsel %vm1310_vm2, %v4561_v23, %v6702_v14  ;;  %v6704_v4 = vld [vmem:[#allocation63_spill] sm:$0xff] }
0x21d8   :  { %v865_v21 = vadd.f32 %v6693_v48, %v770_v10  ;;  %v6703_v10 = vld [vmem:[#allocation46_spill] sm:$0xff] }
0x21d9   :  { %v6705_v48 = vld [vmem:[#allocation106_spill] sm:$0xff] }
0x21db   :  { %2826 = vrot.lane.b32.xlu1 %v2818_v41, %s3664_s15  ;;  %2917 = vrot.lane.b32.xlu0 %v2911_v37, %s3665_s16  ;;  %v509_v37 = vadd.f32 %v6694_v25, %v414_v44  ;;  %v3484_v25 = vld [vmem:[#allocation2 + $0x10] sm:$0xff] }
0x21dd   :  { %v604_v12 = vadd.f32 %v6696_v0, %v509_v37  ;;  %v6706_v37 = vld [vmem:[#allocation52_spill] sm:$0xff] }
0x21df   :  { %2919 = vrot.lane.b32.xlu1 %v2912_v6, %s3665_s16  ;;  %2921 = vrot.lane.b32.xlu0 %v2913_v43, %s3665_s16  ;;  %v6695_v43 = vld [vmem:[#allocation50_spill] sm:$0xff]  ;;  %v699_v15 = vadd.f32 %v6698_v16, %v604_v12  ;;  %v6707_v12 = vld [vmem:[#allocation115_spill] sm:$0xff] }
0x21e0   :  { %v960_v24 = vadd.f32 %v6695_v43, %v865_v21  ;;  %v1429_v21 = vsel %vm1405_vm3, %v4597_v32, %v6705_v48  ;;  %v6708_v16 = vld [vmem:[#allocation58_spill] sm:$0xff] }
0x21e1   :  { %v794_v2 = vadd.f32 %v6701_v57, %v699_v15  ;;  %v6711_v57 = vld [vmem:[#allocation134_spill] sm:$0xff] }
0x21e2   :  { %v1055_v5 = vadd.f32 %v6697_v53, %v960_v24  ;;  %v1524_v53 = vsel %vm1500_vm15, %v4633_v54, %v6707_v12 }
0x21e3   :  { %v889_v29 = vadd.f32 %v6703_v10, %v794_v2  ;;  %v1713_v2 = vsel %vm1689_vm14, %v4705_v26, %v6711_v57 }
0x21e4   :  { %v1150_v52 = vadd.f32 %v6699_v31, %v1055_v5 }
0x21e5   :  { %v984_v43 = vadd.f32 %v6706_v37, %v889_v29 }
0x21e6   :  { %v1245_v63 = vadd.f32 %v6700_v49, %v1150_v52 }
0x21e7   :  { %v1079_v15 = vadd.f32 %v6708_v16, %v984_v43 }
0x21f9   :  { %v5896_v45 = vpop.permute.xlu1 %2657  ;;  %v5906_v61 = vpop.permute.xlu0 %2655 }
0x21fd   :  { %v5900_v30 = vpop.permute.xlu1 %2679  ;;  %v5916_v27 = vpop.permute.xlu0 %2659 }
0x2201   :  { %v5904_v60 = vpop.permute.xlu1 %2683  ;;  %v5928_v6 = vpop.permute.xlu0 %2681 }
0x2205   :  { %v5910_v40 = vpop.permute.xlu1 %2750 }
0x2209   :  { %v5919_v7 = vpop.permute.xlu1 %2752 }
0x220d   :  { %v5925_v41 = vpop.permute.xlu1 %2774 }
0x2211   :  { %v5933_v17 = vpop.permute.xlu1 %2778 }
0x2212   :  { %v3004_v46 = vpop.permute.xlu0 %3003 }
0x2213   :  { %v3006_v8 = vmul.f32 %v5405_v50, %v3004_v46  ;;  %v3007_v35 = vmul.f32 %v5608_v47, %v3004_v46  ;;  %v1244_v50 = vadd.f32 %v1239_v19, %v6704_v4  ;;  %v1340_v47 = vadd.f32 %v6702_v14, %v1245_v63  ;;  %v6710_v19 = vld [vmem:[#allocation65_spill] sm:$0xff]  ;;  %v6712_v4 = vld [vmem:[#allocation144_spill] sm:$0xff] }
0x2214   :  { %v3008_v23 = vmul.f32 %v3484_v25, %v3004_v46  ;;  %v6709_v46 = vld [vmem:[#allocation124_spill] sm:$0xff] }
0x2215   :  { %v5947_v34 = vpop.permute.xlu1 %2847  ;;  %3014 = vrot.lane.b32.xlu0 %v3007_v35, %s3667_s0  ;;  %3012 = vrot.lane.b32.xlu1 %v3006_v8, %s3667_s0  ;;  %v1339_v24 = vadd.f32 %v1334_v3, %v1244_v50  ;;  %v1435_v0 = vadd.f32 %v6705_v48, %v1340_v47  ;;  %v1618_v49 = vsel %vm109_vm4, %v4669_v55, %v6709_v46 }
0x2216   :  { %v5953_v44 = vpop.permute.xlu0 %2754  ;;  %v1174_v8 = vadd.f32 %v6710_v19, %v1079_v15  ;;  %v1808_v55 = vsel %vm1784_vm13, %v4753_v36, %v6712_v4 }
0x2217   :  { %v1434_v31 = vadd.f32 %v1429_v21, %v1339_v24  ;;  %v1530_v32 = vadd.f32 %v6707_v12, %v1435_v0  ;;  %v6713_v21 = vld [vmem:[#allocation154_spill] sm:$0xff]  ;;  %v6714_v24 = vld [vmem:[#allocation161_spill] sm:$0xff] }
0x2218   :  { %v1269_v14 = vadd.f32 %v6545_v9, %v1174_v8  ;;  %v1903_v26 = vsel %vm1879_vm12, %v4805_v39, %v6713_v21  ;;  %v1998_v36 = vsel %vm1974_vm11, %v4859_v11, %v6714_v24  ;;  %v6717_v8 = vld [vmem:[#allocation186_spill] sm:$0xff] }
0x2219   :  { %v5964_v5 = vpop.permute.xlu1 %2869  ;;  %3016 = vrot.lane.b32.xlu1 %v3008_v23, %s3667_s0  ;;  %v1529_v35 = vadd.f32 %v1524_v53, %v1434_v31  ;;  %v1624_v54 = vadd.f32 %v6709_v46, %v1530_v32  ;;  %v6715_v53 = vld [vmem:[#allocation167_spill] sm:$0xff]  ;;  %v6716_v46 = vld [vmem:[#allocation174_spill] sm:$0xff] }
0x221a   :  { %v5968_v52 = vpop.permute.xlu0 %2776  ;;  %v1364_v50 = vadd.f32 %v6548_v56, %v1269_v14  ;;  %v2093_v39 = vsel %vm6330_vm10, %v4911_v1, %v6715_v53  ;;  %v2188_v11 = vsel %vm6331_vm9, %v4963_v20, %v6716_v46  ;;  %vm6718_vm10 = vcmask 293888   ;;  %v6719_v14 = vld [vmem:[#allocation192_spill] sm:$0xff] }
0x221b   :  { %v1623_v3 = vadd.f32 %v1618_v49, %v1529_v35  ;;  %v1719_v29 = vadd.f32 %v6711_v57, %v1624_v54  ;;  %v2283_v1 = vsel %vm6718_vm10, %v6529_v18, %v6717_v8  ;;  %vm6720_vm9 = vcmask 261120  }
0x221c   :  { %v1459_v9 = vadd.f32 %v6552_v58, %v1364_v50  ;;  %v2378_v20 = vsel %vm6720_vm9, %v6531_v59, %v6719_v14  ;;  %vm6722_vm10 = vcmask 228352   ;;  %v6723_v59 = vld [vmem:[#allocation133_spill] sm:$0xff]  ;;  %vm6724_vm9 = vcmask 195584  }
0x221d   :  { %v5979_v63 = vpop.permute.xlu1 %2873  ;;  %v1718_v47 = vadd.f32 %v1713_v2, %v1623_v3  ;;  %v1814_v48 = vadd.f32 %v6712_v4, %v1719_v29  ;;  %v6721_v4 = vld [vmem:[#allocation197_spill] sm:$0xff] }
0x221e   :  { %v2846_v10 = vpop.permute.xlu0 %2845  ;;  %v1554_v56 = vadd.f32 %v6555_v28, %v1459_v9  ;;  %v2473_v18 = vsel %vm6722_vm10, %v6533_v33, %v6721_v4  ;;  %vm3106_vm10 = vcmask 1039360  }
0x221f   :  { %v1813_v23 = vadd.f32 %v1808_v55, %v1718_v47  ;;  %v1909_v43 = vadd.f32 %v6713_v21, %v1814_v48  ;;  %v2756_v21 = vsel %vm2733_vm5, %v5910_v40, %v5919_v7 }
0x2220   :  { %v1648_v58 = vadd.f32 %v6558_v38, %v1554_v56  ;;  %v6727_v56 = vld [vmem:[#allocation176_spill] sm:$0xff] }
0x2221   :  { %v5991_v25 = vpop.permute.xlu1 %2942  ;;  %v1908_v0 = vadd.f32 %v1903_v26, %v1813_v23  ;;  %v2004_v12 = vadd.f32 %v6714_v24, %v1909_v43  ;;  %v6725_v26 = vld [vmem:[#allocation169_spill] sm:$0xff]  ;;  %v2662_v24 = vsel %vm2638_vm7, %v5896_v45, %v5916_v27 }
0x2222   :  { %v2850_v37 = vpop.permute.xlu0 %2849  ;;  %v1743_v28 = vadd.f32 %v6561_v62, %v1648_v58  ;;  %v6726_v23 = vld [vmem:[#allocation185_spill] sm:$0xff]  ;;  %v2757_v58 = vsel %vm2733_vm5, %v5919_v7, %v5953_v44  ;;  %v2685_v7 = vsel %vm2638_vm7, %v5900_v30, %v5928_v6 }
0x2223   :  { %v2003_v15 = vadd.f32 %v1998_v36, %v1908_v0  ;;  %v2099_v32 = vadd.f32 %v6715_v53, %v2004_v12  ;;  %v2851_v36 = vsel %vm2828_vm1, %v2846_v10, %v5947_v34 }
0x2224   :  { %v1838_v38 = vadd.f32 %v6564_v22, %v1743_v28  ;;  %v2661_v22 = vsel %vm2638_vm7, %v5906_v61, %v5896_v45  ;;  %v6729_v28 = vld [vmem:[#allocation193_spill] sm:$0xff] }
0x2225   :  { %v6003_v16 = vpop.permute.xlu1 %2964  ;;  %v2098_v49 = vadd.f32 %v2093_v39, %v2003_v15  ;;  %v2194_v19 = vadd.f32 %v6716_v46, %v2099_v32  ;;  %v2666_v43 = vadd.f32 %v2661_v22, %v6726_v23  ;;  %v6728_v15 = vld [vmem:[#allocation188_spill] sm:$0xff] }
0x2226   :  { %v6006_v31 = vpop.permute.xlu0 %2871  ;;  %v1933_v62 = vadd.f32 %v6567_v51, %v1838_v38  ;;  %v2567_v51 = vsel %vm6724_vm9, %v6723_v59, %v5526_v42 }
0x2227   :  { %v2193_v35 = vadd.f32 %v2188_v11, %v2098_v49  ;;  %v2289_v2 = vadd.f32 %v6717_v8, %v2194_v19  ;;  %v2761_v53 = vadd.f32 %v2756_v21, %v2666_v43  ;;  %v2852_v11 = vsel %vm2828_vm1, %v5947_v34, %v2850_v37 }
0x2228   :  { %v2028_v55 = vadd.f32 %v6570_v13, %v1933_v62  ;;  %v2875_v22 = vsel %vm2828_vm1, %v5964_v5, %v6006_v31 }
0x2229   :  { %v6018_v54 = vpop.permute.xlu1 %2968  ;;  %v2288_v3 = vadd.f32 %v2283_v1, %v2193_v35  ;;  %v2384_v29 = vadd.f32 %v6719_v14, %v2289_v2  ;;  %v2856_v46 = vadd.f32 %v2851_v36, %v2761_v53 }
0x222a   :  { %v2941_v57 = vpop.permute.xlu0 %2940  ;;  %v2123_v33 = vadd.f32 %v6725_v26, %v2028_v55 }
0x222b   :  { %v2383_v50 = vadd.f32 %v2378_v20, %v2288_v3  ;;  %v2479_v48 = vadd.f32 %v6721_v4, %v2384_v29  ;;  %v2780_v20 = vsel %vm2733_vm5, %v5925_v41, %v5968_v52  ;;  %v6731_v3 = vld [vmem:[#allocation153_spill] sm:$0xff]  ;;  %v6732_v4 = vld [vmem:[#allocation143_spill] sm:$0xff] }
0x222c   :  { %v2218_v0 = vadd.f32 %v6727_v56, %v2123_v33 }
0x222d   :  { %v2478_v9 = vadd.f32 %v2473_v18, %v2383_v50  ;;  %v3038_v61 = vpop.permute.xlu1 %3037  ;;  %v2573_v13 = vadd.f32 %v5526_v42, %v2479_v48  ;;  %v2946_v42 = vsel %vm2923_vm8, %v2941_v57, %v5991_v25  ;;  %v2690_v18 = vadd.f32 %v2685_v7, %v6732_v4 }
0x222e   :  { %v2945_v47 = vpop.permute.xlu0 %2944  ;;  %v2313_v32 = vadd.f32 %v6728_v15, %v2218_v0 }
0x222f   :  { %v2572_v12 = vadd.f32 %v2567_v51, %v2478_v9  ;;  %v2668_v39 = vadd.f32 %v5916_v27, %v2573_v13  ;;  %v2951_v27 = vadd.f32 %v2946_v42, %v2856_v46  ;;  %v2947_v35 = vsel %vm2923_vm8, %v5991_v25, %v2945_v47 }
0x2230   :  { %v2408_v49 = vadd.f32 %v6729_v28, %v2313_v32  ;;  %v2686_v25 = vsel %vm2638_vm7, %v5928_v6, %v5904_v60  ;;  %v2785_v50 = vadd.f32 %v2780_v20, %v2690_v18  ;;  %v2781_v51 = vsel %vm2733_vm5, %v5968_v52, %v5933_v17  ;;  %v6733_v6 = vld [vmem:[#allocation179_spill] sm:$0xff] }
0x2231   :  { %v2667_v45 = vadd.f32 %v2662_v24, %v2572_v12  ;;  %v2763_v10 = vadd.f32 %v5953_v44, %v2668_v39  ;;  %v3060_v8 = vpop.permute.xlu1 %3059  ;;  %v6730_v44 = vld [vmem:[#allocation199_spill] sm:$0xff]  ;;  %v2691_v26 = vadd.f32 %v2686_v25, %v6733_v6  ;;  %v6746_v25 = vld [vmem:[#allocation81_spill] sm:$0xff] }
0x2232   :  { %v2967_v40 = vpop.permute.xlu0 %2966  ;;  %v2503_v2 = vadd.f32 %v6730_v44, %v2408_v49  ;;  %v2880_v33 = vadd.f32 %v2875_v22, %v2785_v50  ;;  %v6736_v49 = vld [vmem:[#allocation96_spill] sm:$0xff]  ;;  %v6747_v50 = vld [vmem:[#allocation142_spill] sm:$0xff] }
0x2233   :  { %v2762_v19 = vadd.f32 %v2757_v58, %v2667_v45  ;;  %v2858_v38 = vadd.f32 %v2850_v37, %v2763_v10  ;;  %v2970_v21 = vsel %vm2923_vm8, %v6003_v16, %v2967_v40  ;;  %v2786_v52 = vadd.f32 %v2781_v51, %v2691_v26  ;;  %v6734_v10 = vld [vmem:[#allocation87_spill] sm:$0xff]  ;;  %v6749_v51 = vld [vmem:[#allocation152_spill] sm:$0xff] }
0x2234   :  { %v2597_v29 = vadd.f32 %v6731_v3, %v2503_v2  ;;  %v2975_v43 = vadd.f32 %v2970_v21, %v2880_v33  ;;  %v6743_v3 = vld [vmem:[#allocation123_spill] sm:$0xff] }
0x2235   :  { %v2857_v14 = vadd.f32 %v2852_v11, %v2762_v19  ;;  %v2953_v62 = vadd.f32 %v2945_v47, %v2858_v38  ;;  %v3064_v47 = vpop.permute.xlu1 %3063  ;;  %v6735_v11 = vld [vmem:[#allocation56_spill] sm:$0xff]  ;;  %v6737_v19 = vld [vmem:[#allocation69_spill] sm:$0xff]  ;;  %v6750_v21 = vld [vmem:[#allocation95_spill] sm:$0xff] }
0x2236   :  { %v3036_v1 = vpop.permute.xlu0 %3035  ;;  %v2692_v59 = vadd.f32 %v5904_v60, %v2597_v29  ;;  %v2876_v60 = vsel %vm2828_vm1, %v6006_v31, %v5979_v63  ;;  %v1217_v28 = vsel %vm1215_vm0, %v6735_v11, %v6734_v10  ;;  %v6739_v38 = vld [vmem:[#allocation105_spill] sm:$0xff]  ;;  %v6744_v29 = vld [vmem:[#allocation78_spill] sm:$0xff]  ;;  %v1881_v6 = vsel %vm1879_vm12, %v6750_v21, %v6749_v51  ;;  %v6765_v11 = vld [vmem:[#allocation196_spill] sm:$0xff] }
0x2237   :  { %v3041_v57 = vsel %vm3018_vm6, %v3036_v1, %v3038_v61  ;;  %v2952_v30 = vadd.f32 %v2947_v35, %v2857_v14  ;;  %v2881_v13 = vadd.f32 %v2876_v60, %v2786_v52  ;;  %v6740_v35 = vld [vmem:[#allocation72_spill] sm:$0xff]  ;;  %v6741_v14 = vld [vmem:[#allocation114_spill] sm:$0xff]  ;;  %v1596_v4 = vsel %vm109_vm4, %v6744_v29, %v6743_v3  ;;  %v6771_v29 = vld [vmem:[#allocation201_spill] sm:$0xff] }
0x2238   :  { %v3046_v34 = vadd.f32 %v3041_v57, %v2951_v27  ;;  %v2787_v9 = vadd.f32 %v5933_v17, %v2692_v59  ;;  %v1312_v27 = vsel %vm1310_vm2, %v6737_v19, %v6736_v49  ;;  %v1407_v57 = vsel %vm1405_vm3, %v6740_v35, %v6739_v38 }
0x2239   :  { %v3119_v24 = vpop.permute.xlu1 %3118  ;;  %vm6755_vm4 = vcmask 359424   ;;  %vm6761_vm12 = vcmask 293888   ;;  %vm3139_vm0 = vcmask 1031168  }
0x223a   :  { %3100 = vrot.lane.b32.xlu0 %v3046_v34, %s3671_s1  ;;  %v3040_v37 = vpop.permute.xlu0 %3039  ;;  %v2882_v16 = vadd.f32 %v5979_v63, %v2787_v9  ;;  %v6742_v34 = vld [vmem:[#allocation75_spill] sm:$0xff]  ;;  %v6752_v9 = vld [vmem:[#allocation104_spill] sm:$0xff] }
0x223b   :  { %v3042_v55 = vsel %vm3018_vm6, %v3038_v61, %v3040_v37  ;;  %v3048_v41 = vadd.f32 %v3040_v37, %v2953_v62  ;;  %v2971_v61 = vsel %vm2923_vm8, %v2967_v40, %v6018_v54  ;;  %v1502_v20 = vsel %vm1500_vm15, %v6742_v34, %v6741_v14  ;;  %v6745_v37 = vld [vmem:[#allocation132_spill] sm:$0xff]  ;;  %vm6770_vm15 = vmmov %vm6724_vm9 }
0x223c   :  { %v3047_v48 = vadd.f32 %v3042_v55, %v2952_v30  ;;  %v2977_v17 = vadd.f32 %v6018_v54, %v2882_v16  ;;  %v2976_v12 = vadd.f32 %v2971_v61, %v2881_v13  ;;  %v1691_v22 = vsel %vm1689_vm14, %v6746_v25, %v6745_v37  ;;  %v6754_v16 = vld [vmem:[#allocation113_spill] sm:$0xff] }
0x223d   :  { %v2633_v32 = vpop.permute.xlu1 %2632  ;;  %vm6767_vm14 = vcmask 228352  }
0x223e   :  { %3104 = vrot.lane.b32.xlu0 %v3048_v41, %s3671_s1  ;;  %3102 = vrot.lane.b32.xlu1 %v3047_v48, %s3671_s1  ;;  %v3062_v5 = vpop.permute.xlu0 %3061  ;;  %v3072_v39 = vadd.f32 %v3064_v47, %v2977_v17 }
0x223f   :  { %v3065_v23 = vsel %vm3018_vm6, %v3060_v8, %v3062_v5  ;;  %v3066_v0 = vsel %vm3018_vm6, %v3062_v5, %v3064_v47  ;;  %v6738_v8 = vld [vmem:[#allocation61_spill] sm:$0xff]  ;;  %v6748_v47 = vld [vmem:[#allocation86_spill] sm:$0xff]  ;;  %v6751_v5 = vld [vmem:[#allocation160_spill] sm:$0xff] }
0x2240   :  { %v3070_v36 = vadd.f32 %v3065_v23, %v2975_v43  ;;  %v3071_v58 = vadd.f32 %v3066_v0, %v2976_v12  ;;  %v1221_v1 = vadd.f32 %v1217_v28, %v6738_v8  ;;  %v1786_v48 = vsel %vm1784_vm13, %v6748_v47, %v6747_v50  ;;  %v6753_v43 = vld [vmem:[#allocation166_spill] sm:$0xff]  ;;  %v6760_v12 = vld [vmem:[#allocation131_spill] sm:$0xff]  ;;  %v6768_v8 = vld [vmem:[#allocation173_spill] sm:$0xff] }
0x2241   :  { %v2637_v54 = vpop.permute.xlu1 %2636  ;;  %v1976_v60 = vsel %vm1974_vm11, %v6752_v9, %v6751_v5  ;;  %v2071_v61 = vsel %vm6755_vm4, %v6754_v16, %v6753_v43  ;;  %vm6758_vm13 = vcmask 326656   ;;  %vm6764_vm11 = vcmask 261120   ;;  %v6766_v28 = vld [vmem:[#allocation151_spill] sm:$0xff] }
0x2242   :  { %v3117_v56 = vpop.permute.xlu0 %3116  ;;  %v1316_v44 = vadd.f32 %v1312_v27, %v1221_v1  ;;  %v2451_v49 = vsel %vm6767_vm14, %v6766_v28, %v6765_v11  ;;  %v6769_v1 = vld [vmem:[#allocation200_spill] sm:$0xff] }
0x2243   :  { %v3122_v31 = vsel %vm3106_vm10, %v3117_v56, %v3119_v24  ;;  %v2545_v38 = vsel %vm6770_vm15, %v6769_v1, %v6768_v8 }
0x2244   :  { %v3127_v53 = vadd.f32 %v3122_v31, %v3070_v36  ;;  %v1411_v62 = vadd.f32 %v1407_v57, %v1316_v44  ;;  %v6757_v36 = vld [vmem:[#allocation122_spill] sm:$0xff]  ;;  %v6759_v31 = vld [vmem:[#allocation183_spill] sm:$0xff] }
0x2245   :  { %v2730_v7 = vpop.permute.xlu1 %2729 }
0x2246   :  { %3133 = vrot.lane.b32.xlu1 %v3127_v53, %s3672_s17  ;;  %v3121_v63 = vpop.permute.xlu0 %3120  ;;  %v1506_v18 = vadd.f32 %v1502_v20, %v1411_v62  ;;  %v2261_v53 = vsel %vm6761_vm12, %v6760_v12, %v6759_v31 }
0x2247   :  { %v3123_v42 = vsel %vm3106_vm10, %v3119_v24, %v3121_v63  ;;  %v3129_v40 = vadd.f32 %v3121_v63, %v3072_v39  ;;  %v6756_v24 = vld [vmem:[#allocation172_spill] sm:$0xff]  ;;  %v6762_v63 = vld [vmem:[#allocation191_spill] sm:$0xff] }
0x2248   :  { %v3128_v15 = vadd.f32 %v3123_v42, %v3071_v58  ;;  %v1600_v55 = vadd.f32 %v1596_v4, %v1506_v18  ;;  %v2166_v56 = vsel %vm6758_vm13, %v6757_v36, %v6756_v24  ;;  %v6763_v42 = vld [vmem:[#allocation141_spill] sm:$0xff] }
0x2249   :  { %v2823_v30 = vpop.permute.xlu1 %2822 }
0x224a   :  { %3137 = vrot.lane.b32.xlu1 %v3129_v40, %s3672_s17  ;;  %3135 = vrot.lane.b32.xlu0 %v3128_v15, %s3672_s17  ;;  %v2635_v45 = vpop.permute.xlu0 %2634  ;;  %v1695_v59 = vadd.f32 %v1691_v22, %v1600_v55  ;;  %v2356_v40 = vsel %vm6764_vm11, %v6763_v42, %v6762_v63 }
0x224b   :  { %v2639_v57 = vsel %vm2638_vm7, %v2633_v32, %v2635_v45  ;;  %v2640_v44 = vsel %vm2638_vm7, %v2635_v45, %v2637_v54 }
0x224c   :  { %v1790_v26 = vadd.f32 %v1786_v48, %v1695_v59  ;;  %v2643_v4 = vadd.f32 %v2639_v57, %v6771_v29 }
0x224d   :  { %v2827_v33 = vpop.permute.xlu1 %2826 }
0x224e   :  { %v2728_v46 = vpop.permute.xlu0 %2727  ;;  %v1885_v23 = vadd.f32 %v1881_v6, %v1790_v26 }
0x224f   :  { %v2734_v62 = vsel %vm2733_vm5, %v2728_v46, %v2730_v7 }
0x2250   :  { %v1980_v13 = vadd.f32 %v1976_v60, %v1885_v23  ;;  %v2738_v22 = vadd.f32 %v2734_v62, %v2643_v4 }
0x2251   :  { %v2920_v0 = vpop.permute.xlu1 %2919 }
0x2252   :  { %v2732_v2 = vpop.permute.xlu0 %2731  ;;  %v2075_v17 = vadd.f32 %v2071_v61, %v1980_v13 }
0x2253   :  { %v2735_v3 = vsel %vm2733_vm5, %v2730_v7, %v2732_v2 }
0x2254   :  { %v2170_v39 = vadd.f32 %v2166_v56, %v2075_v17 }
0x2256   :  { %v2825_v41 = vpop.permute.xlu0 %2824  ;;  %v2265_v15 = vadd.f32 %v2261_v53, %v2170_v39 }
0x2257   :  { %v2829_v37 = vsel %vm2828_vm1, %v2823_v30, %v2825_v41  ;;  %v2830_v25 = vsel %vm2828_vm1, %v2825_v41, %v2827_v33 }
0x2258   :  { %v2360_v19 = vadd.f32 %v2356_v40, %v2265_v15  ;;  %v2833_v54 = vadd.f32 %v2829_v37, %v2738_v22 }
0x225a   :  { %v2918_v52 = vpop.permute.xlu0 %2917  ;;  %v2455_v35 = vadd.f32 %v2451_v49, %v2360_v19 }
0x225b   :  { %v2924_v32 = vsel %vm2923_vm8, %v2918_v52, %v2920_v0 }
0x225c   :  { %v2549_v14 = vadd.f32 %v2545_v38, %v2455_v35  ;;  %v2928_v2 = vadd.f32 %v2924_v32, %v2833_v54 }
0x225e   :  { %v2922_v58 = vpop.permute.xlu0 %2921  ;;  %v2644_v18 = vadd.f32 %v2640_v44, %v2549_v14 }
0x225f   :  { %v2925_v45 = vsel %vm2923_vm8, %v2920_v0, %v2922_v58 }
0x2260   :  { %v2739_v55 = vadd.f32 %v2735_v3, %v2644_v18 }
0x2262   :  { %v2834_v47 = vadd.f32 %v2830_v25, %v2739_v55 }
0x2264   :  { %v2929_v59 = vadd.f32 %v2925_v45, %v2834_v47 }
0x2287   :  { %v3013_v10 = vpop.permute.xlu1 %3012  ;;  %v3015_v27 = vpop.permute.xlu0 %3014 }
0x2288   :  { %v3019_v46 = vsel %vm3018_vm6, %v3013_v10, %v3015_v27 }
0x2289   :  { %v3023_v21 = vadd.f32 %v3019_v46, %v2928_v2 }
0x228b   :  { %v3017_v34 = vpop.permute.xlu1 %3016 }
0x228c   :  { %v3020_v7 = vsel %vm3018_vm6, %v3015_v27, %v3017_v34 }
0x228d   :  { %v3024_v6 = vadd.f32 %v3020_v7, %v2929_v59 }
0x22ac   :  { %v3101_v20 = vpop.permute.xlu0 %3100 }
0x22b0   :  { %v3103_v50 = vpop.permute.xlu1 %3102  ;;  %v3105_v48 = vpop.permute.xlu0 %3104 }
0x22b1   :  { %v3107_v30 = vsel %vm3106_vm10, %v3101_v20, %v3103_v50  ;;  %v3108_v41 = vsel %vm3106_vm10, %v3103_v50, %v3105_v48 }
0x22b2   :  { %v3111_v26 = vadd.f32 %v3107_v30, %v3023_v21  ;;  %v3112_v33 = vadd.f32 %v3108_v41, %v3024_v6 }
0x22b8   :  { %v3134_v51 = vpop.permute.xlu1 %3133 }
0x22bc   :  { %v3138_v5 = vpop.permute.xlu1 %3137  ;;  %v3136_v9 = vpop.permute.xlu0 %3135 }
0x22bd   :  { %v3140_v60 = vsel %vm3139_vm0, %v3134_v51, %v3136_v9  ;;  %v3141_v23 = vsel %vm3139_vm0, %v3136_v9, %v3138_v5 }
0x22be   :  { %v3144_v52 = vadd.f32 %v3140_v60, %v3111_v26  ;;  %v3145_v43 = vadd.f32 %v3141_v23, %v3112_v33 }
0x22c0   :  { %3146 = vst [vmem:[#allocation3] sm:$0xff] %v3144_v52  ;;  %3147 = vst [vmem:[#allocation3 + $0x8] sm:$0xff] %v3145_v43 }
0x22c1   :  { %3496 = shalt.err (!%p3493_p4)
}
0x22c2   :  { %s3497_s23 = scalar_lea.hbm %s6174_s2, 256 }
0x22c3   :  { %p3498_p5 = scmp.ne.s32.totalorder %s6174_s2, %s3497_s23  ;;  %p3501_p6 = scmp.lt.u32.totalorder %s3497_s23, %s6174_s2 }
0x22c5   :  { %p3503_p7 = pnand %p3501_p6, %p3498_p5 }
0x22c7   :  { %3506 = shalt.err (!%p3503_p7)
}
0x22c8   :  { %3157 = dma.vmem_to_hbm [thread:$0]  %s3155_s19, 256, %s6174_s2, [#allocation4]  }
0x22c9   :  { %3507 = dma.done.wait [#allocation4], 256  }
0x22ca   :  { %3508 = vsyncadd [#allocation4], 4294967040 }
0x22cb   :  { %3161 = vsyncpa [#allocation4], 1 }

</bundles_post_ra>
